<compile_context>
chip_gen: v7x
topology: tpu7x:2x2x1
jax: 0.10.0
libtpu: 0.0.40
codegen_flags: <defaults>
</compile_context>

<pallas_src>
import functools

import jax
import jax.numpy as jnp
from jax import lax
from jax.experimental import pallas as pl
from jax.experimental.pallas import tpu as pltpu


_LANE = 128       # output channels padded to a multiple of the 128-lane width
_COL_OFF = 8      # sublane-aligned column where the un-padded interior starts
_MAX_TH = 16      # output rows per grid step (tunable)


def _round_up(x, m):
    return (x + m - 1) // m * m


def _pick_row_block(H, need_even):
    """Largest divisor of H (even if required) <= _MAX_TH, preferring >= 2 blocks."""
    cands = [t for t in range(1, min(H, _MAX_TH) + 1)
             if H % t == 0 and (not need_even or t % 2 == 0)]
    multi = [t for t in cands if H // t >= 2]
    pool = multi if multi else cands
    return max(pool) if pool else H


# ----------------------------------------------------------------------------
# In-kernel helpers
# ----------------------------------------------------------------------------
def _conv3x3_bn_relu(xpad_ref, w_ref, s_ref, b_ref, *, rows_out, W, C):
    """3x3 conv + folded BN + ReLU over a zero-halo'd VMEM scratch.

    xpad_ref : (rows_out+2, W+16, C) bf16; interior at cols [8, 8+W); cols 7 and
               8+W (and out-of-image rows) are zero.
    w_ref    : (9*C, CP) bf16, row index = (ky*3+kx)*C + ci
    s_ref/b_ref : (1, CP) f32 folded BN scale / bias
    returns  : (rows_out*W, CP) f32, post-ReLU

    9 small dots accumulated in f32 -- no materialized im2col matrix.
    """
    acc = None
    for ky in range(3):
        for kx in range(3):
            k = ky * 3 + kx
            # ky rides the leading dim (free); kx is a +/-1 sublane shift.
            # TODO(synk): kx = 0/2 taps are sublane-misaligned loads; an aligned
            # load + pltpu.roll would move the shift onto the otherwise-idle XLU.
            c0 = _COL_OFF - 1 + kx
            tap = xpad_ref[ky:ky + rows_out, c0:c0 + W, :]
            wk = w_ref[k * C:(k + 1) * C, :]
            d = jnp.dot(tap.reshape(rows_out * W, C), wk,
                        preferred_element_type=jnp.float32)
            acc = d if acc is None else acc + d
    return jnp.maximum(acc * s_ref[...] + b_ref[...], 0.0)


def _decoder_block_kernel(*refs, TH, W, Cx, Cs, CP, row_rep, has_skip):
    if has_skip:
        (x_ref, skip_ref, w1_ref, w2_ref,
         s1_ref, b1_ref, s2_ref, b2_ref, o_ref, xpad1, xpad2) = refs
    else:
        (x_ref, w1_ref, w2_ref,
         s1_ref, b1_ref, s2_ref, b2_ref, o_ref, xpad1, xpad2) = refs

    r = pl.program_id(1)
    cin = Cx + Cs
    rows1 = TH + 4                 # conv1 input rows (2-row halo each side)
    rows2 = TH + 2                 # conv1 output rows == conv2 input rows
    wp = W + 2 * _COL_OFF

    # ---- zero only the 8-column halo strips (interior is overwritten below). ----
    # Done every step (cheap, ~16/(W+16) of a buffer write) so it stays correct
    # when megacore splits either "parallel" axis across cores.
    xpad1[:, 0:_COL_OFF, :] = jnp.zeros((rows1, _COL_OFF, cin), xpad1.dtype)
    xpad1[:, _COL_OFF + W:wp, :] = jnp.zeros((rows1, _COL_OFF, cin), xpad1.dtype)
    xpad2[:, 0:_COL_OFF, :] = jnp.zeros((rows2, _COL_OFF, CP), xpad2.dtype)
    xpad2[:, _COL_OFF + W:wp, :] = jnp.zeros((rows2, _COL_OFF, CP), xpad2.dtype)

    # ---- stage 0: gather this tile's halo'd input rows straight into VMEM ----
    # The x2 nearest ROW-upsample is folded here (leading-dim broadcast+reshape,
    # free).  Inputs arrive zero-padded along rows, so boundary tiles need no
    # special casing for conv1's own zero padding.
    if row_rep == 2:
        th = TH // 2
        xs = x_ref[0, pl.ds(r * th, th + 2), :, :]                    # (th+2, W, Cx)
        xs = jnp.broadcast_to(xs[:, None, :, :],
                              (th + 2, 2, W, Cx)).reshape(rows1, W, Cx)
    else:
        xs = x_ref[0, pl.ds(r * TH, rows1), :, :]                     # (rows1, W, Cx)
    # channel-concat via two channel-offset stores (no concatenated temporary)
    xpad1[:, _COL_OFF:_COL_OFF + W, 0:Cx] = xs
    if has_skip:
        xpad1[:, _COL_OFF:_COL_OFF + W, Cx:Cx + Cs] = (
            skip_ref[0, pl.ds(r * TH, rows1), :, :])

    # ---- conv1 3x3 + BN + ReLU over TH+2 rows (1-row halo for conv2) ----
    y1 = _conv3x3_bn_relu(xpad1, w1_ref, s1_ref, b1_ref,
                          rows_out=rows2, W=W, C=cin)
    # conv1 output stays resident in VMEM with CP channels (no lane-dim slice).
    xpad2[:, _COL_OFF:_COL_OFF + W, :] = (
        y1.reshape(rows2, W, CP).astype(xpad2.dtype))

    # conv2's "same" padding: rows outside the image must be zeros, NOT
    # conv1(zero input) (BN bias + ReLU would make those non-zero).
    @pl.when(r == 0)
    def _():
        xpad2[0:1, _COL_OFF:_COL_OFF + W, :] = jnp.zeros((1, W, CP), xpad2.dtype)

    @pl.when(r == pl.num_programs(1) - 1)
    def _():
        xpad2[rows2 - 1:rows2, _COL_OFF:_COL_OFF + W, :] = (
            jnp.zeros((1, W, CP), xpad2.dtype))

    # ---- conv2 3x3 + BN + ReLU -> bf16 lane-dense row-slab writeback ----
    y2 = _conv3x3_bn_relu(xpad2, w2_ref, s2_ref, b2_ref,
                          rows_out=TH, W=W, C=CP)
    o_ref[0] = y2.reshape(TH, W, CP).astype(o_ref.dtype)


# ----------------------------------------------------------------------------
# pallas_call wrapper
# ----------------------------------------------------------------------------
def _decoder_block_pallas(x_prep, skip_prep, w1_mat, w2_mat, s1, b1, s2, b2, *,
                          H, W, CP, TH, row_rep):
    N = x_prep.shape[0]
    Cx = x_prep.shape[-1]
    has_skip = skip_prep is not None
    Cs = skip_prep.shape[-1] if has_skip else 0
    cin = Cx + Cs
    R = H // TH
    rows1 = TH + 4
    rows2 = TH + 2
    wp = W + 2 * _COL_OFF

    kernel = functools.partial(_decoder_block_kernel, TH=TH, W=W, Cx=Cx, Cs=Cs,
                               CP=CP, row_rep=row_rep, has_skip=has_skip)

    xr = x_prep.shape[1]
    in_specs = [pl.BlockSpec((1, xr, W, Cx), lambda n, r: (n, 0, 0, 0))]
    inputs = [x_prep]
    if has_skip:
        sr = skip_prep.shape[1]
        in_specs.append(pl.BlockSpec((1, sr, W, Cs), lambda n, r: (n, 0, 0, 0)))
        inputs.append(skip_prep)
    in_specs += [
        pl.BlockSpec((9 * cin, CP), lambda n, r: (0, 0)),   # w1 (per-tap rows)
        pl.BlockSpec((9 * CP, CP), lambda n, r: (0, 0)),    # w2 (per-tap rows)
        pl.BlockSpec((1, CP), lambda n, r: (0, 0)),         # bn1 scale
        pl.BlockSpec((1, CP), lambda n, r: (0, 0)),         # bn1 bias
        pl.BlockSpec((1, CP), lambda n, r: (0, 0)),         # bn2 scale
        pl.BlockSpec((1, CP), lambda n, r: (0, 0)),         # bn2 bias
    ]
    inputs += [w1_mat, w2_mat, s1, b1, s2, b2]

    return pl.pallas_call(
        kernel,
        out_shape=jax.ShapeDtypeStruct((N, H, W, CP), jnp.bfloat16),
        grid_spec=pltpu.PrefetchScalarGridSpec(
            num_scalar_prefetch=0,
            grid=(N, R),
            in_specs=in_specs,
            out_specs=pl.BlockSpec((1, TH, W, CP), lambda n, r: (n, r, 0, 0)),
            scratch_shapes=[
                pltpu.VMEM((rows1, wp, cin), jnp.bfloat16),  # halo'd conv1 input
                pltpu.VMEM((rows2, wp, CP), jnp.bfloat16),   # halo'd conv1 output
            ],
        ),
        # Every (n, r) tile is independent (halo recompute) -> both axes parallel,
        # which also feeds v7x's two TensorCores when N == 1.
        compiler_params=pltpu.CompilerParams(
            dimension_semantics=("parallel", "parallel")),
    )(*inputs)


# ----------------------------------------------------------------------------
# Parameter handling (BN folding, per-tap weight layout)
# ----------------------------------------------------------------------------
def _fold_bn(gamma, beta, mean, var, eps=1e-5):
    scale = gamma / jnp.sqrt(var + eps)
    bias = beta - mean * scale
    return scale, bias


def _im2col_weight(w_oihw, cin_pad, cp):
    # (Cout, Cin, 3, 3) -> (9*cin_pad, cp) bf16, row index = (ky*3+kx)*cin_pad + ci.
    cout, cin = w_oihw.shape[0], w_oihw.shape[1]
    w = jnp.transpose(w_oihw, (2, 3, 1, 0))                         # (3,3,Cin,Cout)
    w = jnp.pad(w, ((0, 0), (0, 0), (0, cin_pad - cin), (0, cp - cout)))
    return w.reshape(9 * cin_pad, cp).astype(jnp.bfloat16)


def _pad_row(v, cp):
    return jnp.pad(v, (0, cp - v.shape[0])).reshape(1, cp).astype(jnp.float32)


def init_decoder_block_params(key, in_channels, out_channels):
    k1, k2, k3, k4, k5, k6 = jax.random.split(key, 6)
    p = {}
    p["w1"] = 0.1 * jax.random.normal(k1, (out_channels, in_channels, 3, 3), jnp.float32)
    p["w2"] = 0.1 * jax.random.normal(k2, (out_channels, out_channels, 3, 3), jnp.float32)
    # BatchNorm params (inference / eval mode).
    # TODO(synk): PyTorch BatchNorm2d in training mode uses batch statistics.
    p["bn1_gamma"] = 1.0 + 0.05 * jax.random.normal(k3, (out_channels,), jnp.float32)
    p["bn1_beta"] = 0.05 * jax.random.normal(k4, (out_channels,), jnp.float32)
    p["bn1_mean"] = jnp.zeros((out_channels,), jnp.float32)
    p["bn1_var"] = jnp.ones((out_channels,), jnp.float32)
    p["bn2_gamma"] = 1.0 + 0.05 * jax.random.normal(k5, (out_channels,), jnp.float32)
    p["bn2_beta"] = 0.05 * jax.random.normal(k6, (out_channels,), jnp.float32)
    p["bn2_mean"] = jnp.zeros((out_channels,), jnp.float32)
    p["bn2_var"] = jnp.ones((out_channels,), jnp.float32)
    return p


# ----------------------------------------------------------------------------
# Forward wrappers
# ----------------------------------------------------------------------------
def decoder_block_forward_nhwc(params, x_nhwc, skip_nhwc=None, scale_factor=2.0):
    """NHWC/bf16 entry point (keep activations NHWC+bf16 across decoder blocks).

    x_nhwc: (N, h, w, Cx).  skip_nhwc: (N, sf*h, sf*w, Cs) or None.
    Returns (N, sf*h, sf*w, Cout) bf16.
    """
    sf = float(scale_factor)
    if sf not in (1.0, 2.0):
        raise NotImplementedError("only scale_factor in {1, 2} is supported")
    row_rep = int(sf)

    x = x_nhwc.astype(jnp.bfloat16)
    N, h, w, Cx = x.shape
    H, W = row_rep * h, row_rep * w
    if row_rep == 2:
        # Column duplication of the nearest upsample stays in the wrapper
        # (sublane interleave); the row duplication is folded into the kernel.
        # TODO(synk): move the column duplication in-kernel too (strided store).
        x = jnp.repeat(x, 2, axis=2)                          # (N, h, W, Cx)
        x = jnp.pad(x, ((0, 0), (1, 1), (0, 0), (0, 0)))      # 1-row zero halo
    else:
        x = jnp.pad(x, ((0, 0), (2, 2), (0, 0), (0, 0)))      # 2-row zero halo

    skip = None
    Cs = 0
    if skip_nhwc is not None:
        Cs = skip_nhwc.shape[-1]
        skip = jnp.pad(skip_nhwc.astype(jnp.bfloat16),
                       ((0, 0), (2, 2), (0, 0), (0, 0)))      # 2-row zero halo

    cout, cin = params["w1"].shape[0], params["w1"].shape[1]
    assert cin == Cx + Cs, (cin, Cx, Cs)
    CP = _round_up(cout, _LANE)
    TH = _pick_row_block(H, need_even=(row_rep == 2))

    s1, b1 = _fold_bn(params["bn1_gamma"], params["bn1_beta"],
                      params["bn1_mean"], params["bn1_var"])
    s2, b2 = _fold_bn(params["bn2_gamma"], params["bn2_beta"],
                      params["bn2_mean"], params["bn2_var"])

    y = _decoder_block_pallas(
        x, skip,
        _im2col_weight(params["w1"], cin_pad=cin, cp=CP),
        _im2col_weight(params["w2"], cin_pad=CP, cp=CP),
        _pad_row(s1, CP), _pad_row(b1, CP), _pad_row(s2, CP), _pad_row(b2, CP),
        H=H, W=W, CP=CP, TH=TH, row_rep=row_rep)

    # TODO(synk): for Cout < 128 a masked Cout-wide writeback would save HBM bytes.
    return y[..., :cout]


def decoder_block_forward(params, x_nchw, skip_nchw=None, scale_factor=2.0):
    """PyTorch-convention wrapper: NCHW f32 in, NCHW f32 out."""
    x = jnp.transpose(x_nchw, (0, 2, 3, 1))
    skip = (jnp.transpose(skip_nchw, (0, 2, 3, 1))
            if skip_nchw is not None else None)
    y = decoder_block_forward_nhwc(params, x, skip, scale_factor)
    return jnp.transpose(y.astype(jnp.float32), (0, 3, 1, 2))


# ----------------------------------------------------------------------------
# Pure-JAX references (for self-check)
# ----------------------------------------------------------------------------
def _ref_conv_bn_relu_nhwc(x, w_oihw, scale, bias, compute_dtype):
    w_hwio = jnp.transpose(w_oihw, (2, 3, 1, 0)).astype(compute_dtype)
    y = lax.conv_general_dilated(
        x.astype(compute_dtype), w_hwio, window_strides=(1, 1), padding="SAME",
        dimension_numbers=("NHWC", "HWIO", "NHWC"),
        preferred_element_type=jnp.float32)
    y = y * scale[None, None, None, :] + bias[None, None, None, :]
    return jnp.maximum(y, 0.0)


def decoder_block_reference(params, x_nchw, skip_nchw, scale_factor=2.0,
                            compute_dtype=jnp.float32):
    x = x_nchw
    if scale_factor != 1.0:
        sf = int(scale_factor)
        x = jnp.repeat(jnp.repeat(x, sf, axis=2), sf, axis=3)
    if skip_nchw is not None:
        x = jnp.concatenate([x, skip_nchw], axis=1)
    x = jnp.transpose(x, (0, 2, 3, 1)).astype(jnp.float32)
    s1, b1 = _fold_bn(params["bn1_gamma"], params["bn1_beta"],
                      params["bn1_mean"], params["bn1_var"])
    s2, b2 = _fold_bn(params["bn2_gamma"], params["bn2_beta"],
                      params["bn2_mean"], params["bn2_var"])
    y = _ref_conv_bn_relu_nhwc(x, params["w1"], s1, b1, compute_dtype)
    y = _ref_conv_bn_relu_nhwc(y, params["w2"], s2, b2, compute_dtype)
    return jnp.transpose(y, (0, 3, 1, 2))


if __name__ == "__main__":
    key = jax.random.PRNGKey(0)
    kx, ks, kp = jax.random.split(key, 3)

    N = 2
    C_x, C_skip = 4, 4            # in_channels = C_x + C_skip = 8
    in_channels, out_channels = 8, 8
    h, w = 8, 8                   # upsampled to 16x16, matching skip

    x = jax.random.normal(kx, (N, C_x, h, w), jnp.float32)
    skip = jax.random.normal(ks, (N, C_skip, 2 * h, 2 * w), jnp.float32)
    params = init_decoder_block_params(kp, in_channels, out_channels)

    out = jax.block_until_ready(decoder_block_forward(params, x, skip, 2.0))
    assert out.shape == (N, out_channels, 2 * h, 2 * w), out.shape

    # Precision-matched reference (bf16 MXU inputs, f32 accumulation): tight check.
    ref_bf16 = jax.block_until_ready(
        decoder_block_reference(params, x, skip, 2.0, compute_dtype=jnp.bfloat16))
    assert jnp.allclose(out, ref_bf16, atol=1e-2, rtol=1e-2), "mismatch vs bf16-matched ref"

    # Full-f32 reference (true module semantics): loose check (bf16 rounding only).
    ref_f32 = jax.block_until_ready(
        decoder_block_reference(params, x, skip, 2.0, compute_dtype=jnp.float32))
    assert jnp.allclose(out, ref_f32, atol=5e-2, rtol=5e-2), "mismatch vs f32 ref"

    print("KERNEL_OK")
</pallas_src>

<mosaic_0001>
module attributes {stable_mosaic.version = 11 : i64} {
  func.func @_decoder_block_kernel(%arg0: i32, %arg1: i32, %arg2: memref<1x10x16x4xbf16, #tpu.memory_space<vmem>>, %arg3: memref<1x20x16x4xbf16, #tpu.memory_space<vmem>>, %arg4: memref<72x128xbf16, #tpu.memory_space<vmem>>, %arg5: memref<1152x128xbf16, #tpu.memory_space<vmem>>, %arg6: memref<1x128xf32, #tpu.memory_space<vmem>>, %arg7: memref<1x128xf32, #tpu.memory_space<vmem>>, %arg8: memref<1x128xf32, #tpu.memory_space<vmem>>, %arg9: memref<1x128xf32, #tpu.memory_space<vmem>>, %arg10: memref<1x8x16x128xbf16, #tpu.memory_space<vmem>>, %arg11: memref<12x32x8xbf16, #tpu.memory_space<vmem>>, %arg12: memref<10x32x128xbf16, #tpu.memory_space<vmem>>) attributes {dimension_semantics = [#tpu.dimension_semantics<parallel>, #tpu.dimension_semantics<parallel>], iteration_bounds = array<i64: 2, 2>, scalar_prefetch = 0 : i64, scratch_operands = 2 : i64, tpu.core_type = #tpu.core_type<tc>, window_params = [{transform_indices = @transform_0, window_bounds = array<i64: 1, 10, 16, 4>}, {transform_indices = @transform_1, window_bounds = array<i64: 1, 20, 16, 4>}, {pipeline_mode = #tpu.pipeline_mode<synchronous>, transform_indices = @transform_2, window_bounds = array<i64: 72, 128>}, {pipeline_mode = #tpu.pipeline_mode<synchronous>, transform_indices = @transform_3, window_bounds = array<i64: 1152, 128>}, {pipeline_mode = #tpu.pipeline_mode<synchronous>, transform_indices = @transform_4, window_bounds = array<i64: 1, 128>}, {pipeline_mode = #tpu.pipeline_mode<synchronous>, transform_indices = @transform_5, window_bounds = array<i64: 1, 128>}, {pipeline_mode = #tpu.pipeline_mode<synchronous>, transform_indices = @transform_6, window_bounds = array<i64: 1, 128>}, {pipeline_mode = #tpu.pipeline_mode<synchronous>, transform_indices = @transform_7, window_bounds = array<i64: 1, 128>}, {transform_indices = @transform_8, window_bounds = array<i64: 1, 8, 16, 128>}]} {
    %cst = arith.constant 0.000000e+00 : bf16
    %0 = vector.broadcast %cst : bf16 to vector<12x8x8xbf16>
    %c0 = arith.constant 0 : index
    %c0_0 = arith.constant 0 : index
    %c0_1 = arith.constant 0 : index
    %1 = vector.load %arg11[%c0, %c0_0, %c0_1] : memref<12x32x8xbf16, #tpu.memory_space<vmem>>, vector<12x8x8xbf16>
    tpu.vector_store %arg11[%c0, %c0_0, %c0_1], %0 {strides = array<i32>} : memref<12x32x8xbf16, #tpu.memory_space<vmem>>, vector<12x8x8xbf16>,
    %cst_2 = arith.constant 0.000000e+00 : bf16
    %2 = vector.broadcast %cst_2 : bf16 to vector<12x8x8xbf16>
    %c0_3 = arith.constant 0 : index
    %c24 = arith.constant 24 : index
    %c0_4 = arith.constant 0 : index
    %3 = vector.load %arg11[%c0_3, %c24, %c0_4] : memref<12x32x8xbf16, #tpu.memory_space<vmem>>, vector<12x8x8xbf16>
    tpu.vector_store %arg11[%c0_3, %c24, %c0_4], %2 {strides = array<i32>} : memref<12x32x8xbf16, #tpu.memory_space<vmem>>, vector<12x8x8xbf16>,
    %cst_5 = arith.constant 0.000000e+00 : bf16
    %4 = vector.broadcast %cst_5 : bf16 to vector<10x8x128xbf16>
    %c0_6 = arith.constant 0 : index
    %c0_7 = arith.constant 0 : index
    %c0_8 = arith.constant 0 : index
    %5 = vector.load %arg12[%c0_6, %c0_7, %c0_8] : memref<10x32x128xbf16, #tpu.memory_space<vmem>>, vector<10x8x128xbf16>
    tpu.vector_store %arg12[%c0_6, %c0_7, %c0_8], %4 {strides = array<i32>} : memref<10x32x128xbf16, #tpu.memory_space<vmem>>, vector<10x8x128xbf16>,
    %cst_9 = arith.constant 0.000000e+00 : bf16
    %6 = vector.broadcast %cst_9 : bf16 to vector<10x8x128xbf16>
    %c0_10 = arith.constant 0 : index
    %c24_11 = arith.constant 24 : index
    %c0_12 = arith.constant 0 : index
    %7 = vector.load %arg12[%c0_10, %c24_11, %c0_12] : memref<10x32x128xbf16, #tpu.memory_space<vmem>>, vector<10x8x128xbf16>
    tpu.vector_store %arg12[%c0_10, %c24_11, %c0_12], %6 {strides = array<i32>} : memref<10x32x128xbf16, #tpu.memory_space<vmem>>, vector<10x8x128xbf16>,
    %c4_i32 = arith.constant 4 : i32
    %8 = arith.muli %arg1, %c4_i32 : i32
    %c0_13 = arith.constant 0 : index
    %9 = arith.index_cast %8 : i32 to index
    %c0_14 = arith.constant 0 : index
    %c0_15 = arith.constant 0 : index
    %10 = vector.load %arg2[%c0_13, %9, %c0_14, %c0_15] : memref<1x10x16x4xbf16, #tpu.memory_space<vmem>>, vector<1x6x16x4xbf16>
    %11 = vector.shape_cast %10 : vector<1x6x16x4xbf16> to vector<6x16x4xbf16>
    %12 = vector.shape_cast %11 : vector<6x16x4xbf16> to vector<6x1x16x4xbf16>
    %13 = vector.shape_cast %12 : vector<6x1x16x4xbf16> to vector<6x1x16x4xbf16>
    %14 = vector.broadcast %13 : vector<6x1x16x4xbf16> to vector<6x2x16x4xbf16>
    %15 = vector.shape_cast %14 : vector<6x2x16x4xbf16> to vector<12x16x4xbf16>
    %c0_16 = arith.constant 0 : index
    %c8 = arith.constant 8 : index
    %c0_17 = arith.constant 0 : index
    %16 = vector.load %arg11[%c0_16, %c8, %c0_17] : memref<12x32x8xbf16, #tpu.memory_space<vmem>>, vector<12x16x4xbf16>
    tpu.vector_store %arg11[%c0_16, %c8, %c0_17], %15 {strides = array<i32>} : memref<12x32x8xbf16, #tpu.memory_space<vmem>>, vector<12x16x4xbf16>,
    %c8_i32 = arith.constant 8 : i32
    %17 = arith.muli %arg1, %c8_i32 : i32
    %c0_18 = arith.constant 0 : index
    %18 = arith.index_cast %17 : i32 to index
    %c0_19 = arith.constant 0 : index
    %c0_20 = arith.constant 0 : index
    %19 = vector.load %arg3[%c0_18, %18, %c0_19, %c0_20] : memref<1x20x16x4xbf16, #tpu.memory_space<vmem>>, vector<1x12x16x4xbf16>
    %20 = vector.shape_cast %19 : vector<1x12x16x4xbf16> to vector<12x16x4xbf16>
    %c0_21 = arith.constant 0 : index
    %c8_22 = arith.constant 8 : index
    %c4 = arith.constant 4 : index
    %21 = vector.load %arg11[%c0_21, %c8_22, %c4] : memref<12x32x8xbf16, #tpu.memory_space<vmem>>, vector<12x16x4xbf16>
    tpu.vector_store %arg11[%c0_21, %c8_22, %c4], %20 {strides = array<i32>} : memref<12x32x8xbf16, #tpu.memory_space<vmem>>, vector<12x16x4xbf16>,
    %c0_23 = arith.constant 0 : index
    %c7 = arith.constant 7 : index
    %c0_24 = arith.constant 0 : index
    %22 = vector.load %arg11[%c0_23, %c7, %c0_24] : memref<12x32x8xbf16, #tpu.memory_space<vmem>>, vector<10x16x8xbf16>
    %c0_25 = arith.constant 0 : index
    %c0_26 = arith.constant 0 : index
    %23 = vector.load %arg4[%c0_25, %c0_26] : memref<72x128xbf16, #tpu.memory_space<vmem>>, vector<8x128xbf16>
    %24 = vector.shape_cast %22 : vector<10x16x8xbf16> to vector<160x8xbf16>
    %cst_27 = arith.constant dense<0.000000e+00> : vector<160x128xf32>
    %25 = tpu.matmul %24, %23, %cst_27 {dimension_numbers = #tpu.dot_dimension_numbers<[1], [0], [0], [1], [0, 0, 1, 1], [], []>} : vector<160x8xbf16>, vector<8x128xbf16>, vector<160x128xf32> -> vector<160x128xf32>
    %c0_28 = arith.constant 0 : index
    %c8_29 = arith.constant 8 : index
    %c0_30 = arith.constant 0 : index
    %26 = vector.load %arg11[%c0_28, %c8_29, %c0_30] : memref<12x32x8xbf16, #tpu.memory_space<vmem>>, vector<10x16x8xbf16>
    %c8_31 = arith.constant 8 : index
    %c0_32 = arith.constant 0 : index
    %27 = vector.load %arg4[%c8_31, %c0_32] : memref<72x128xbf16, #tpu.memory_space<vmem>>, vector<8x128xbf16>
    %28 = vector.shape_cast %26 : vector<10x16x8xbf16> to vector<160x8xbf16>
    %cst_33 = arith.constant dense<0.000000e+00> : vector<160x128xf32>
    %29 = tpu.matmul %28, %27, %cst_33 {dimension_numbers = #tpu.dot_dimension_numbers<[1], [0], [0], [1], [0, 0, 1, 1], [], []>} : vector<160x8xbf16>, vector<8x128xbf16>, vector<160x128xf32> -> vector<160x128xf32>
    %30 = arith.addf %25, %29 : vector<160x128xf32>
    %c0_34 = arith.constant 0 : index
    %c9 = arith.constant 9 : index
    %c0_35 = arith.constant 0 : index
    %31 = vector.load %arg11[%c0_34, %c9, %c0_35] : memref<12x32x8xbf16, #tpu.memory_space<vmem>>, vector<10x16x8xbf16>
    %c16 = arith.constant 16 : index
    %c0_36 = arith.constant 0 : index
    %32 = vector.load %arg4[%c16, %c0_36] : memref<72x128xbf16, #tpu.memory_space<vmem>>, vector<8x128xbf16>
    %33 = vector.shape_cast %31 : vector<10x16x8xbf16> to vector<160x8xbf16>
    %cst_37 = arith.constant dense<0.000000e+00> : vector<160x128xf32>
    %34 = tpu.matmul %33, %32, %cst_37 {dimension_numbers = #tpu.dot_dimension_numbers<[1], [0], [0], [1], [0, 0, 1, 1], [], []>} : vector<160x8xbf16>, vector<8x128xbf16>, vector<160x128xf32> -> vector<160x128xf32>
    %35 = arith.addf %30, %34 : vector<160x128xf32>
    %c1 = arith.constant 1 : index
    %c7_38 = arith.constant 7 : index
    %c0_39 = arith.constant 0 : index
    %36 = vector.load %arg11[%c1, %c7_38, %c0_39] : memref<12x32x8xbf16, #tpu.memory_space<vmem>>, vector<10x16x8xbf16>
    %c24_40 = arith.constant 24 : index
    %c0_41 = arith.constant 0 : index
    %37 = vector.load %arg4[%c24_40, %c0_41] : memref<72x128xbf16, #tpu.memory_space<vmem>>, vector<8x128xbf16>
    %38 = vector.shape_cast %36 : vector<10x16x8xbf16> to vector<160x8xbf16>
    %cst_42 = arith.constant dense<0.000000e+00> : vector<160x128xf32>
    %39 = tpu.matmul %38, %37, %cst_42 {dimension_numbers = #tpu.dot_dimension_numbers<[1], [0], [0], [1], [0, 0, 1, 1], [], []>} : vector<160x8xbf16>, vector<8x128xbf16>, vector<160x128xf32> -> vector<160x128xf32>
    %40 = arith.addf %35, %39 : vector<160x128xf32>
    %c1_43 = arith.constant 1 : index
    %c8_44 = arith.constant 8 : index
    %c0_45 = arith.constant 0 : index
    %41 = vector.load %arg11[%c1_43, %c8_44, %c0_45] : memref<12x32x8xbf16, #tpu.memory_space<vmem>>, vector<10x16x8xbf16>
    %c32 = arith.constant 32 : index
    %c0_46 = arith.constant 0 : index
    %42 = vector.load %arg4[%c32, %c0_46] : memref<72x128xbf16, #tpu.memory_space<vmem>>, vector<8x128xbf16>
    %43 = vector.shape_cast %41 : vector<10x16x8xbf16> to vector<160x8xbf16>
    %cst_47 = arith.constant dense<0.000000e+00> : vector<160x128xf32>
    %44 = tpu.matmul %43, %42, %cst_47 {dimension_numbers = #tpu.dot_dimension_numbers<[1], [0], [0], [1], [0, 0, 1, 1], [], []>} : vector<160x8xbf16>, vector<8x128xbf16>, vector<160x128xf32> -> vector<160x128xf32>
    %45 = arith.addf %40, %44 : vector<160x128xf32>
    %c1_48 = arith.constant 1 : index
    %c9_49 = arith.constant 9 : index
    %c0_50 = arith.constant 0 : index
    %46 = vector.load %arg11[%c1_48, %c9_49, %c0_50] : memref<12x32x8xbf16, #tpu.memory_space<vmem>>, vector<10x16x8xbf16>
    %c40 = arith.constant 40 : index
    %c0_51 = arith.constant 0 : index
    %47 = vector.load %arg4[%c40, %c0_51] : memref<72x128xbf16, #tpu.memory_space<vmem>>, vector<8x128xbf16>
    %48 = vector.shape_cast %46 : vector<10x16x8xbf16> to vector<160x8xbf16>
    %cst_52 = arith.constant dense<0.000000e+00> : vector<160x128xf32>
    %49 = tpu.matmul %48, %47, %cst_52 {dimension_numbers = #tpu.dot_dimension_numbers<[1], [0], [0], [1], [0, 0, 1, 1], [], []>} : vector<160x8xbf16>, vector<8x128xbf16>, vector<160x128xf32> -> vector<160x128xf32>
    %50 = arith.addf %45, %49 : vector<160x128xf32>
    %c2 = arith.constant 2 : index
    %c7_53 = arith.constant 7 : index
    %c0_54 = arith.constant 0 : index
    %51 = vector.load %arg11[%c2, %c7_53, %c0_54] : memref<12x32x8xbf16, #tpu.memory_space<vmem>>, vector<10x16x8xbf16>
    %c48 = arith.constant 48 : index
    %c0_55 = arith.constant 0 : index
    %52 = vector.load %arg4[%c48, %c0_55] : memref<72x128xbf16, #tpu.memory_space<vmem>>, vector<8x128xbf16>
    %53 = vector.shape_cast %51 : vector<10x16x8xbf16> to vector<160x8xbf16>
    %cst_56 = arith.constant dense<0.000000e+00> : vector<160x128xf32>
    %54 = tpu.matmul %53, %52, %cst_56 {dimension_numbers = #tpu.dot_dimension_numbers<[1], [0], [0], [1], [0, 0, 1, 1], [], []>} : vector<160x8xbf16>, vector<8x128xbf16>, vector<160x128xf32> -> vector<160x128xf32>
    %55 = arith.addf %50, %54 : vector<160x128xf32>
    %c2_57 = arith.constant 2 : index
    %c8_58 = arith.constant 8 : index
    %c0_59 = arith.constant 0 : index
    %56 = vector.load %arg11[%c2_57, %c8_58, %c0_59] : memref<12x32x8xbf16, #tpu.memory_space<vmem>>, vector<10x16x8xbf16>
    %c56 = arith.constant 56 : index
    %c0_60 = arith.constant 0 : index
    %57 = vector.load %arg4[%c56, %c0_60] : memref<72x128xbf16, #tpu.memory_space<vmem>>, vector<8x128xbf16>
    %58 = vector.shape_cast %56 : vector<10x16x8xbf16> to vector<160x8xbf16>
    %cst_61 = arith.constant dense<0.000000e+00> : vector<160x128xf32>
    %59 = tpu.matmul %58, %57, %cst_61 {dimension_numbers = #tpu.dot_dimension_numbers<[1], [0], [0], [1], [0, 0, 1, 1], [], []>} : vector<160x8xbf16>, vector<8x128xbf16>, vector<160x128xf32> -> vector<160x128xf32>
    %60 = arith.addf %55, %59 : vector<160x128xf32>
    %c2_62 = arith.constant 2 : index
    %c9_63 = arith.constant 9 : index
    %c0_64 = arith.constant 0 : index
    %61 = vector.load %arg11[%c2_62, %c9_63, %c0_64] : memref<12x32x8xbf16, #tpu.memory_space<vmem>>, vector<10x16x8xbf16>
    %c64 = arith.constant 64 : index
    %c0_65 = arith.constant 0 : index
    %62 = vector.load %arg4[%c64, %c0_65] : memref<72x128xbf16, #tpu.memory_space<vmem>>, vector<8x128xbf16>
    %63 = vector.shape_cast %61 : vector<10x16x8xbf16> to vector<160x8xbf16>
    %cst_66 = arith.constant dense<0.000000e+00> : vector<160x128xf32>
    %64 = tpu.matmul %63, %62, %cst_66 {dimension_numbers = #tpu.dot_dimension_numbers<[1], [0], [0], [1], [0, 0, 1, 1], [], []>} : vector<160x8xbf16>, vector<8x128xbf16>, vector<160x128xf32> -> vector<160x128xf32>
    %65 = arith.addf %60, %64 : vector<160x128xf32>
    %c0_67 = arith.constant 0 : index
    %c0_68 = arith.constant 0 : index
    %66 = vector.load %arg6[%c0_67, %c0_68] : memref<1x128xf32, #tpu.memory_space<vmem>>, vector<1x128xf32>
    %67 = vector.broadcast %66 : vector<1x128xf32> to vector<160x128xf32>
    %68 = arith.mulf %65, %67 : vector<160x128xf32>
    %c0_69 = arith.constant 0 : index
    %c0_70 = arith.constant 0 : index
    %69 = vector.load %arg7[%c0_69, %c0_70] : memref<1x128xf32, #tpu.memory_space<vmem>>, vector<1x128xf32>
    %70 = vector.broadcast %69 : vector<1x128xf32> to vector<160x128xf32>
    %71 = arith.addf %68, %70 : vector<160x128xf32>
    %cst_71 = arith.constant 0.000000e+00 : f32
    %72 = vector.broadcast %cst_71 : f32 to vector<160x128xf32>
    %73 = arith.maximumf %71, %72 : vector<160x128xf32>
    %74 = vector.shape_cast %73 : vector<160x128xf32> to vector<10x16x128xf32>
    %75 = arith.truncf %74 : vector<10x16x128xf32> to vector<10x16x128xbf16>
    %c0_72 = arith.constant 0 : index
    %c8_73 = arith.constant 8 : index
    %c0_74 = arith.constant 0 : index
    %76 = vector.load %arg12[%c0_72, %c8_73, %c0_74] : memref<10x32x128xbf16, #tpu.memory_space<vmem>>, vector<10x16x128xbf16>
    tpu.vector_store %arg12[%c0_72, %c8_73, %c0_74], %75 {strides = array<i32>} : memref<10x32x128xbf16, #tpu.memory_space<vmem>>, vector<10x16x128xbf16>,
    %c0_i32 = arith.constant 0 : i32
    %77 = arith.cmpi eq, %arg1, %c0_i32 : i32
    %78 = arith.extui %77 : i1 to i32
    %c0_i32_75 = arith.constant 0 : i32
    %79 = arith.cmpi ne, %78, %c0_i32_75 : i32
    scf.if %79 {
      %cst_132 = arith.constant 0.000000e+00 : bf16
      %140 = vector.broadcast %cst_132 : bf16 to vector<1x16x128xbf16>
      %c0_133 = arith.constant 0 : index
      %c8_134 = arith.constant 8 : index
      %c0_135 = arith.constant 0 : index
      %141 = vector.load %arg12[%c0_133, %c8_134, %c0_135] : memref<10x32x128xbf16, #tpu.memory_space<vmem>>, vector<1x16x128xbf16>
      tpu.vector_store %arg12[%c0_133, %c8_134, %c0_135], %140 {strides = array<i32>} : memref<10x32x128xbf16, #tpu.memory_space<vmem>>, vector<1x16x128xbf16>,
    } else {
    }
    %c1_i32 = arith.constant 1 : i32
    %80 = arith.cmpi eq, %arg1, %c1_i32 : i32
    %81 = arith.extui %80 : i1 to i32
    %c0_i32_76 = arith.constant 0 : i32
    %82 = arith.cmpi ne, %81, %c0_i32_76 : i32
    scf.if %82 {
      %cst_132 = arith.constant 0.000000e+00 : bf16
      %140 = vector.broadcast %cst_132 : bf16 to vector<1x16x128xbf16>
      %c9_133 = arith.constant 9 : index
      %c8_134 = arith.constant 8 : index
      %c0_135 = arith.constant 0 : index
      %141 = vector.load %arg12[%c9_133, %c8_134, %c0_135] : memref<10x32x128xbf16, #tpu.memory_space<vmem>>, vector<1x16x128xbf16>
      tpu.vector_store %arg12[%c9_133, %c8_134, %c0_135], %140 {strides = array<i32>} : memref<10x32x128xbf16, #tpu.memory_space<vmem>>, vector<1x16x128xbf16>,
    } else {
    }
    %c0_77 = arith.constant 0 : index
    %c7_78 = arith.constant 7 : index
    %c0_79 = arith.constant 0 : index
    %83 = vector.load %arg12[%c0_77, %c7_78, %c0_79] : memref<10x32x128xbf16, #tpu.memory_space<vmem>>, vector<8x16x128xbf16>
    %c0_80 = arith.constant 0 : index
    %c0_81 = arith.constant 0 : index
    %84 = vector.load %arg5[%c0_80, %c0_81] : memref<1152x128xbf16, #tpu.memory_space<vmem>>, vector<128x128xbf16>
    %85 = vector.shape_cast %83 : vector<8x16x128xbf16> to vector<128x128xbf16>
    %cst_82 = arith.constant dense<0.000000e+00> : vector<128x128xf32>
    %86 = tpu.matmul %85, %84, %cst_82 {dimension_numbers = #tpu.dot_dimension_numbers<[1], [0], [0], [1], [0, 0, 1, 1], [], []>} : vector<128x128xbf16>, vector<128x128xbf16>, vector<128x128xf32> -> vector<128x128xf32>
    %c0_83 = arith.constant 0 : index
    %c8_84 = arith.constant 8 : index
    %c0_85 = arith.constant 0 : index
    %87 = vector.load %arg12[%c0_83, %c8_84, %c0_85] : memref<10x32x128xbf16, #tpu.memory_space<vmem>>, vector<8x16x128xbf16>
    %c128 = arith.constant 128 : index
    %c0_86 = arith.constant 0 : index
    %88 = vector.load %arg5[%c128, %c0_86] : memref<1152x128xbf16, #tpu.memory_space<vmem>>, vector<128x128xbf16>
    %89 = vector.shape_cast %87 : vector<8x16x128xbf16> to vector<128x128xbf16>
    %cst_87 = arith.constant dense<0.000000e+00> : vector<128x128xf32>
    %90 = tpu.matmul %89, %88, %cst_87 {dimension_numbers = #tpu.dot_dimension_numbers<[1], [0], [0], [1], [0, 0, 1, 1], [], []>} : vector<128x128xbf16>, vector<128x128xbf16>, vector<128x128xf32> -> vector<128x128xf32>
    %91 = arith.addf %86, %90 : vector<128x128xf32>
    %c0_88 = arith.constant 0 : index
    %c9_89 = arith.constant 9 : index
    %c0_90 = arith.constant 0 : index
    %92 = vector.load %arg12[%c0_88, %c9_89, %c0_90] : memref<10x32x128xbf16, #tpu.memory_space<vmem>>, vector<8x16x128xbf16>
    %c256 = arith.constant 256 : index
    %c0_91 = arith.constant 0 : index
    %93 = vector.load %arg5[%c256, %c0_91] : memref<1152x128xbf16, #tpu.memory_space<vmem>>, vector<128x128xbf16>
    %94 = vector.shape_cast %92 : vector<8x16x128xbf16> to vector<128x128xbf16>
    %cst_92 = arith.constant dense<0.000000e+00> : vector<128x128xf32>
    %95 = tpu.matmul %94, %93, %cst_92 {dimension_numbers = #tpu.dot_dimension_numbers<[1], [0], [0], [1], [0, 0, 1, 1], [], []>} : vector<128x128xbf16>, vector<128x128xbf16>, vector<128x128xf32> -> vector<128x128xf32>
    %96 = arith.addf %91, %95 : vector<128x128xf32>
    %c1_93 = arith.constant 1 : index
    %c7_94 = arith.constant 7 : index
    %c0_95 = arith.constant 0 : index
    %97 = vector.load %arg12[%c1_93, %c7_94, %c0_95] : memref<10x32x128xbf16, #tpu.memory_space<vmem>>, vector<8x16x128xbf16>
    %c384 = arith.constant 384 : index
    %c0_96 = arith.constant 0 : index
    %98 = vector.load %arg5[%c384, %c0_96] : memref<1152x128xbf16, #tpu.memory_space<vmem>>, vector<128x128xbf16>
    %99 = vector.shape_cast %97 : vector<8x16x128xbf16> to vector<128x128xbf16>
    %cst_97 = arith.constant dense<0.000000e+00> : vector<128x128xf32>
    %100 = tpu.matmul %99, %98, %cst_97 {dimension_numbers = #tpu.dot_dimension_numbers<[1], [0], [0], [1], [0, 0, 1, 1], [], []>} : vector<128x128xbf16>, vector<128x128xbf16>, vector<128x128xf32> -> vector<128x128xf32>
    %101 = arith.addf %96, %100 : vector<128x128xf32>
    %c1_98 = arith.constant 1 : index
    %c8_99 = arith.constant 8 : index
    %c0_100 = arith.constant 0 : index
    %102 = vector.load %arg12[%c1_98, %c8_99, %c0_100] : memref<10x32x128xbf16, #tpu.memory_space<vmem>>, vector<8x16x128xbf16>
    %c512 = arith.constant 512 : index
    %c0_101 = arith.constant 0 : index
    %103 = vector.load %arg5[%c512, %c0_101] : memref<1152x128xbf16, #tpu.memory_space<vmem>>, vector<128x128xbf16>
    %104 = vector.shape_cast %102 : vector<8x16x128xbf16> to vector<128x128xbf16>
    %cst_102 = arith.constant dense<0.000000e+00> : vector<128x128xf32>
    %105 = tpu.matmul %104, %103, %cst_102 {dimension_numbers = #tpu.dot_dimension_numbers<[1], [0], [0], [1], [0, 0, 1, 1], [], []>} : vector<128x128xbf16>, vector<128x128xbf16>, vector<128x128xf32> -> vector<128x128xf32>
    %106 = arith.addf %101, %105 : vector<128x128xf32>
    %c1_103 = arith.constant 1 : index
    %c9_104 = arith.constant 9 : index
    %c0_105 = arith.constant 0 : index
    %107 = vector.load %arg12[%c1_103, %c9_104, %c0_105] : memref<10x32x128xbf16, #tpu.memory_space<vmem>>, vector<8x16x128xbf16>
    %c640 = arith.constant 640 : index
    %c0_106 = arith.constant 0 : index
    %108 = vector.load %arg5[%c640, %c0_106] : memref<1152x128xbf16, #tpu.memory_space<vmem>>, vector<128x128xbf16>
    %109 = vector.shape_cast %107 : vector<8x16x128xbf16> to vector<128x128xbf16>
    %cst_107 = arith.constant dense<0.000000e+00> : vector<128x128xf32>
    %110 = tpu.matmul %109, %108, %cst_107 {dimension_numbers = #tpu.dot_dimension_numbers<[1], [0], [0], [1], [0, 0, 1, 1], [], []>} : vector<128x128xbf16>, vector<128x128xbf16>, vector<128x128xf32> -> vector<128x128xf32>
    %111 = arith.addf %106, %110 : vector<128x128xf32>
    %c2_108 = arith.constant 2 : index
    %c7_109 = arith.constant 7 : index
    %c0_110 = arith.constant 0 : index
    %112 = vector.load %arg12[%c2_108, %c7_109, %c0_110] : memref<10x32x128xbf16, #tpu.memory_space<vmem>>, vector<8x16x128xbf16>
    %c768 = arith.constant 768 : index
    %c0_111 = arith.constant 0 : index
    %113 = vector.load %arg5[%c768, %c0_111] : memref<1152x128xbf16, #tpu.memory_space<vmem>>, vector<128x128xbf16>
    %114 = vector.shape_cast %112 : vector<8x16x128xbf16> to vector<128x128xbf16>
    %cst_112 = arith.constant dense<0.000000e+00> : vector<128x128xf32>
    %115 = tpu.matmul %114, %113, %cst_112 {dimension_numbers = #tpu.dot_dimension_numbers<[1], [0], [0], [1], [0, 0, 1, 1], [], []>} : vector<128x128xbf16>, vector<128x128xbf16>, vector<128x128xf32> -> vector<128x128xf32>
    %116 = arith.addf %111, %115 : vector<128x128xf32>
    %c2_113 = arith.constant 2 : index
    %c8_114 = arith.constant 8 : index
    %c0_115 = arith.constant 0 : index
    %117 = vector.load %arg12[%c2_113, %c8_114, %c0_115] : memref<10x32x128xbf16, #tpu.memory_space<vmem>>, vector<8x16x128xbf16>
    %c896 = arith.constant 896 : index
    %c0_116 = arith.constant 0 : index
    %118 = vector.load %arg5[%c896, %c0_116] : memref<1152x128xbf16, #tpu.memory_space<vmem>>, vector<128x128xbf16>
    %119 = vector.shape_cast %117 : vector<8x16x128xbf16> to vector<128x128xbf16>
    %cst_117 = arith.constant dense<0.000000e+00> : vector<128x128xf32>
    %120 = tpu.matmul %119, %118, %cst_117 {dimension_numbers = #tpu.dot_dimension_numbers<[1], [0], [0], [1], [0, 0, 1, 1], [], []>} : vector<128x128xbf16>, vector<128x128xbf16>, vector<128x128xf32> -> vector<128x128xf32>
    %121 = arith.addf %116, %120 : vector<128x128xf32>
    %c2_118 = arith.constant 2 : index
    %c9_119 = arith.constant 9 : index
    %c0_120 = arith.constant 0 : index
    %122 = vector.load %arg12[%c2_118, %c9_119, %c0_120] : memref<10x32x128xbf16, #tpu.memory_space<vmem>>, vector<8x16x128xbf16>
    %c1024 = arith.constant 1024 : index
    %c0_121 = arith.constant 0 : index
    %123 = vector.load %arg5[%c1024, %c0_121] : memref<1152x128xbf16, #tpu.memory_space<vmem>>, vector<128x128xbf16>
    %124 = vector.shape_cast %122 : vector<8x16x128xbf16> to vector<128x128xbf16>
    %cst_122 = arith.constant dense<0.000000e+00> : vector<128x128xf32>
    %125 = tpu.matmul %124, %123, %cst_122 {dimension_numbers = #tpu.dot_dimension_numbers<[1], [0], [0], [1], [0, 0, 1, 1], [], []>} : vector<128x128xbf16>, vector<128x128xbf16>, vector<128x128xf32> -> vector<128x128xf32>
    %126 = arith.addf %121, %125 : vector<128x128xf32>
    %c0_123 = arith.constant 0 : index
    %c0_124 = arith.constant 0 : index
    %127 = vector.load %arg8[%c0_123, %c0_124] : memref<1x128xf32, #tpu.memory_space<vmem>>, vector<1x128xf32>
    %128 = vector.broadcast %127 : vector<1x128xf32> to vector<128x128xf32>
    %129 = arith.mulf %126, %128 : vector<128x128xf32>
    %c0_125 = arith.constant 0 : index
    %c0_126 = arith.constant 0 : index
    %130 = vector.load %arg9[%c0_125, %c0_126] : memref<1x128xf32, #tpu.memory_space<vmem>>, vector<1x128xf32>
    %131 = vector.broadcast %130 : vector<1x128xf32> to vector<128x128xf32>
    %132 = arith.addf %129, %131 : vector<128x128xf32>
    %cst_127 = arith.constant 0.000000e+00 : f32
    %133 = vector.broadcast %cst_127 : f32 to vector<128x128xf32>
    %134 = arith.maximumf %132, %133 : vector<128x128xf32>
    %135 = vector.shape_cast %134 : vector<128x128xf32> to vector<8x16x128xf32>
    %136 = arith.truncf %135 : vector<8x16x128xf32> to vector<8x16x128xbf16>
    %c0_128 = arith.constant 0 : index
    %c0_129 = arith.constant 0 : index
    %c0_130 = arith.constant 0 : index
    %c0_131 = arith.constant 0 : index
    %137 = vector.load %arg10[%c0_128, %c0_129, %c0_130, %c0_131] : memref<1x8x16x128xbf16, #tpu.memory_space<vmem>>, vector<1x8x16x128xbf16>
    %138 = vector.shape_cast %137 : vector<1x8x16x128xbf16> to vector<8x16x128xbf16>
    %139 = vector.shape_cast %136 : vector<8x16x128xbf16> to vector<1x8x16x128xbf16>
    tpu.vector_store %arg10[%c0_128, %c0_129, %c0_130, %c0_131], %139 {strides = array<i32>} : memref<1x8x16x128xbf16, #tpu.memory_space<vmem>>, vector<1x8x16x128xbf16>,
    return
  }
  func.func @transform_0(%arg0: i32, %arg1: i32) -> (i32, i32, i32, i32) {
    %c0_i32 = arith.constant 0 : i32
    %c0_i32_0 = arith.constant 0 : i32
    %c0_i32_1 = arith.constant 0 : i32
    %c0_i32_2 = arith.constant 0 : i32
    return %arg0, %c0_i32, %c0_i32_0, %c0_i32_1 : i32, i32, i32, i32
  }
  func.func @transform_1(%arg0: i32, %arg1: i32) -> (i32, i32, i32, i32) {
    %c0_i32 = arith.constant 0 : i32
    %c0_i32_0 = arith.constant 0 : i32
    %c0_i32_1 = arith.constant 0 : i32
    %c0_i32_2 = arith.constant 0 : i32
    return %arg0, %c0_i32, %c0_i32_0, %c0_i32_1 : i32, i32, i32, i32
  }
  func.func @transform_2(%arg0: i32, %arg1: i32) -> (i32, i32) {
    %c0_i32 = arith.constant 0 : i32
    %c0_i32_0 = arith.constant 0 : i32
    %c0_i32_1 = arith.constant 0 : i32
    return %c0_i32, %c0_i32_0 : i32, i32
  }
  func.func @transform_3(%arg0: i32, %arg1: i32) -> (i32, i32) {
    %c0_i32 = arith.constant 0 : i32
    %c0_i32_0 = arith.constant 0 : i32
    %c0_i32_1 = arith.constant 0 : i32
    return %c0_i32, %c0_i32_0 : i32, i32
  }
  func.func @transform_4(%arg0: i32, %arg1: i32) -> (i32, i32) {
    %c0_i32 = arith.constant 0 : i32
    %c0_i32_0 = arith.constant 0 : i32
    %c0_i32_1 = arith.constant 0 : i32
    return %c0_i32, %c0_i32_0 : i32, i32
  }
  func.func @transform_5(%arg0: i32, %arg1: i32) -> (i32, i32) {
    %c0_i32 = arith.constant 0 : i32
    %c0_i32_0 = arith.constant 0 : i32
    %c0_i32_1 = arith.constant 0 : i32
    return %c0_i32, %c0_i32_0 : i32, i32
  }
  func.func @transform_6(%arg0: i32, %arg1: i32) -> (i32, i32) {
    %c0_i32 = arith.constant 0 : i32
    %c0_i32_0 = arith.constant 0 : i32
    %c0_i32_1 = arith.constant 0 : i32
    return %c0_i32, %c0_i32_0 : i32, i32
  }
  func.func @transform_7(%arg0: i32, %arg1: i32) -> (i32, i32) {
    %c0_i32 = arith.constant 0 : i32
    %c0_i32_0 = arith.constant 0 : i32
    %c0_i32_1 = arith.constant 0 : i32
    return %c0_i32, %c0_i32_0 : i32, i32
  }
  func.func @transform_8(%arg0: i32, %arg1: i32) -> (i32, i32, i32, i32) {
    %c0_i32 = arith.constant 0 : i32
    %c0_i32_0 = arith.constant 0 : i32
    %c0_i32_1 = arith.constant 0 : i32
    return %arg0, %arg1, %c0_i32, %c0_i32_0 : i32, i32, i32, i32
  }
}

</mosaic_0001>

<bundles_post_ra>
// kernel: tpu_custom_call.1
= control target key start
LH: loop header
LB: loop body
LE: loop exit
PB: predicated region body
PF: predicated region fallthrough
CT: control target
= control target key end

     0   :  { %13 = vsyncpa [#allocation5], 0  ;;  %s9742_s0 = inlined_call_operand.vmem [shape: bf16[2,10,16,4], index: 0, kind: input, shape index: {}]   ;;  %s9743_s1 = inlined_call_operand.vmem [shape: bf16[2,20,16,4], index: 1, kind: input, shape index: {}]   ;;  %s9744_s2 = inlined_call_operand.hbm [shape: bf16[72,128], index: 2, kind: input, shape index: {}]   ;;  %s9745_s3 = inlined_call_operand.vmem [shape: bf16[1152,128], index: 3, kind: input, shape index: {}]   ;;  %s9746_s4 = inlined_call_operand.vmem [shape: f32[1,128], index: 4, kind: input, shape index: {}]   ;;  %s9747_s5 = inlined_call_operand.vmem [shape: f32[1,128], index: 5, kind: input, shape index: {}]   ;;  %s9748_s6 = inlined_call_operand.vmem [shape: f32[1,128], index: 6, kind: input, shape index: {}]   ;;  %s9749_s7 = inlined_call_operand.vmem [shape: f32[1,128], index: 7, kind: input, shape index: {}]   ;;  %s9750_s8 = inlined_call_operand.hbm [shape: bf16[2,16,16,128], index: 8, kind: output, shape index: {}]  }
   0x1   :  { %14 = vsyncpa [#allocation6], 0 }
   0x2   :  { %16 = vsyncpa [#allocation6 + $0x1], 0  ;;  %s8244_s27 = smov 0   ;;  %s8246_s28 = smov 0  }
   0x3   :  { %s8248_s29 = smov 0   ;;  %s8250_s30 = smov 0  }
   0x4   :  { %s8252_s9 = smov 0   ;;  %s8254_s10 = smov 0  }
   0x5   :  { %s8256_s11 = smov 0   ;;  %s8258_s12 = smov 0  }
   0x6 LB: > { %9758 = sst [smem:[#allocation10_spill]] %s8184_s11  ;;  %s6526_s13 = sadd.s32 4294967295, %s8188_s12   ;;  %s8188_s12 = sphi %s8258_s12, %s22_s12   ;;  %s8184_s11 = sphi %s8256_s11, %s9772_s11   ;;  %s8180_s10 = sphi %s8254_s10, %s9777_s10   ;;  %s8176_s9 = sphi %s8252_s9, %s9770_s9   ;;  %s8172_s30 = sphi %s8250_s30, %s9776_s30   ;;  %s8168_s29 = sphi %s8248_s29, %s9775_s29   ;;  %s8164_s28 = sphi %s8246_s28, %s9774_s28   ;;  %s8160_s27 = sphi %s8244_s27, %s9773_s27  }
   0x7   : > { %s6527_s14 = sadd.s32 4294967294, %s8188_s12   ;;  %s31_s15 = sadd.s32 1, %s8180_s10 }
   0x8   : > { %s34_s16 = sadd.s32 1, %s8184_s11  ;;  %p32_p0 = scmp.ge.s32.totalorder %s31_s15, 2 }
   0x9   : > { %s221_s17 = sadd.s32 1, %s8168_s29  ;;  %p231_p1 = scmp.ne.s32.totalorder %s8168_s29, %s8164_s28 }
   0xa   : > { %p232_p2 = scmp.eq.s32.totalorder %s6526_s13, 3  ;;  %s9779_s15 = smov (%p32_p0, %s31_s15), 0 }
   0xb   : > { %9759 = sst [smem:[#allocation11_spill]] %s9779_s15  ;;  %s9781_s16 = smov (!%p32_p0, %s34_s16), %s8184_s11 }
   0xc   : > { %s217_s18 = ssub.s32 %s8180_s10, %s9779_s15  ;;  %p8296_p3 = por %p232_p2, %p231_p1 }
   0xd   : > { %p36_p4 = scmp.ge.s32.totalorder %s9781_s16, 2  ;;  %p237_p5 = scmp.ne.s32.totalorder %s8164_s28, %s8160_s27 }
   0xe   : > { %s9760_s19 = scalar_select %p8296_p3, 1, 0 }
   0xf   : > { %p238_p6 = scmp.eq.s32.totalorder %s6527_s14, 3  ;;  %p6528_p7 = scmp.ge.s32.totalorder %s8188_s12, 1 }
  0x10   : > { %s9783_s16 = smov (%p36_p4, %s9781_s16), 0  ;;  %p245_p9 = scmp.lt.s32.totalorder %s8188_s12, 5 }
  0x11   : > { %9761 = sst [smem:[#allocation12_spill]] %s9783_s16  ;;  %p8305_p8 = por %p238_p6, %p237_p5 }
  0x12   : > { %s216_s21 = ssub.s32 %s8184_s11, %s9783_s16  ;;  %p8312_p10 = pnand %p6528_p7, %p245_p9 }
  0x13   : > { %s9762_s20 = scalar_select %p8305_p8, 1, 0 }
  0x14   : > { %s218_s22 = sor.u32 %s217_s18, %s216_s21  ;;  %p8316_p12 = scmp.eq.s32.totalorder %s6526_s13, 0 }
  0x15   : > { %s9763_s23 = scalar_select %p8312_p10, 1, 0 }
  0x16   : > { %p219_p11 = scmp.eq.s32.totalorder %s218_s22, 0  ;;  %p7871_p13 = pneg %p8312_p10 }
  0x17   : > { %s9764_s24 = scalar_select %p8316_p12, 1, 0 }
  0x18   : > { %s8323_s25 = scalar_select %p219_p11, %s8168_s29, %s221_s17  }
  0x19   : > { %s8190_s26 = smov [#allocation4]   ;;  %p8327_p0 = pnand %p8316_p12, %p7871_p13 }
  0x1a   : > { %s257_s14 = sshll.u32 %s8190_s26, 4  ;;  %s8062_s13 = scalar_lea.hbm %s9744_s2, 576  ;;  %s258_s14 = int_to_ptr.vmem [resolvable:$true] %s257_s14 }
  0x1b   : > { %p8063_p1 = scmp.ne.s32.totalorder %s9744_s2, %s8062_s13  ;;  %p8064_p2 = pneg %p8327_p0 }
  0x1c   : > { %p8069_p6 = scmp.lt.u32.totalorder %s8062_s13, %s9744_s2 }
  0x1d   : > { %p8065_p4 = pnand %p8064_p2, %p8063_p1 }
  0x1f   : > { %p8066_p5 = pneg %p8065_p4 }
  0x21   : > { %p8071_p7 = pnand %p8069_p6, %p8066_p5 }
  0x23   : > { %8074 = shalt.err (!%p8071_p7)
}
  0x24   : > { %s8075_s11 = scalar_lea.vmem %s258_s14, 576  ;;  %p8083_p8 = scmp.lt.s32.totalorder %s258_s14, %s258_s14 }
  0x25   : > { %p8076_p9 = scmp.ne.s32.totalorder %s258_s14, %s8075_s11  ;;  %p8084_p3 = scmp.lt.s32.totalorder %s8075_s11, %s8075_s11 }
  0x27   : > { %p8078_p11 = pnand %p8076_p9, %p8064_p2  ;;  %p8085_p12 = por %p8084_p3, %p8083_p8 }
  0x29   : > { %p8079_p13 = pneg %p8078_p11 }
  0x2b   : > { %p8086_p10 = pnand %p8085_p12, %p8079_p13 }
  0x2d   : > { %8089 = shalt.err (!%p8086_p10)
}
  0x2e   : > { %s8191_s15 = smov 64   ;;  %s8192_s16 = smov 4  }
  0x2f   : > { %7874 = dma.hbm_to_vmem [thread:$0]  (!%p8327_p0), %s9744_s2, 576, %s258_s14, [#allocation5], %s8191_s15, %s8191_s15, %s8192_s16  }
  0x30   : > { %p9766_p1 = scmp.ne.s32.totalorder %s9763_s23, 0 }
  0x31   : > { %p9767_p4 = scmp.ne.s32.totalorder (!%p9766_p1), %s9764_s24, 0 }
  0x32   : > { %304 = sbr.rel (%p9766_p1) target bundleno = 1304 (0x518), region = 52 }
  0x39   : > { %8151 = dma.done.wait (%p9767_p4), [#allocation5], 576  }
  0x3a   : > { %8153 = vsyncadd (%p9767_p4), [#allocation5], 4294966720  ;;  %p343_p3 = scmp.lt.s32.totalorder %s8176_s9, 1  ;;  %vm355_vm0 = vcmask 60416   ;;  %v8193_v0 = vmov 0   ;;  %vm368_vm1 = vcmask 64516  }
  0x3b   : > { %356 = vst.msk [vmem:[#allocation2] sm:$0xf] %vm355_vm0, %v8193_v0  ;;  %381 = vst [vmem:[#allocation3] sm:$0xf] %v8193_v0  ;;  %s6772_s24 = sshll.u32 %s8172_s30, 6  ;;  %vm912_vm2 = vcmask 1043456  }
  0x3c   : > { %s8355_s11 = scalar_select %p343_p3, %s8176_s9, 1  ;;  %382 = vst [vmem:[#allocation3 + $0x10] sm:$0xf] %v8193_v0  ;;  %383 = vst [vmem:[#allocation3 + $0x20] sm:$0xf] %v8193_v0  ;;  %vm465_vm3 = vcmask 31748  }
  0x3d   : > { %384 = vst [vmem:[#allocation3 + $0x30] sm:$0xf] %v8193_v0  ;;  %385 = vst [vmem:[#allocation3 + $0x40] sm:$0xf] %v8193_v0  ;;  %v891_v1 = vld [vmem:[#allocation4 + $0x4] sm:$0xf] }
  0x3e   : > { %386 = vst [vmem:[#allocation3 + $0x50] sm:$0xf] %v8193_v0  ;;  %387 = vst [vmem:[#allocation3 + $0x60] sm:$0xf] %v8193_v0  ;;  %s7864_s23 = smul.u32 160, %s8355_s11  ;;  %7854 = vmatprep.subr.msk.bf16.mxu1 %vm912_vm2, %v891_v1  ;;  %s8194_s26 = smov 4  }
  0x3f   : > { %388 = vst [vmem:[#allocation3 + $0x70] sm:$0xf] %v8193_v0  ;;  %389 = vst [vmem:[#allocation3 + $0x80] sm:$0xf] %v8193_v0  ;;  %s7863_s15 = smul.u32 80, %s8355_s11  ;;  %vm467_vm4 = vcmask 27648  }
  0x40   : > { %390 = vst [vmem:[#allocation3 + $0x90] sm:$0xf] %v8193_v0  ;;  %391 = vst [vmem:[#allocation3 + $0x8] sm:$0xf0] %v8193_v0  ;;  %s352_s13 = scalar_lea.vmem %s9743_s1, %s7864_s23  ;;  %s6770_s23 = sshll.u32 %s8172_s30, 5  ;;  %v976_v18 = vsel %vm912_vm2, %v891_v1, 0 }
  0x41   : > { %392 = vst [vmem:[#allocation3 + $0x18] sm:$0xf0] %v8193_v0  ;;  %393 = vst [vmem:[#allocation3 + $0x28] sm:$0xf0] %v8193_v0  ;;  %s8374_s17 = scalar_lea.vmem %s352_s13, %s6772_s24  ;;  %s347_s22 = scalar_lea.vmem %s9742_s0, %s7863_s15  ;;  %7081 = vmatpush3.bf16.msra.mxu1 %v976_v18  ;;  %v709_v19 = vld [vmem:[#allocation4] sm:$0xf] }
  0x42   : > { %394 = vst [vmem:[#allocation3 + $0x38] sm:$0xf0] %v8193_v0  ;;  %395 = vst [vmem:[#allocation3 + $0x48] sm:$0xf0] %v8193_v0  ;;  %v7954_v2 = vld [vmem:[%s8374_s17 + $0x8] ss:$0 sps:$4 sm:$0xff]   ;;  %s8394_s24 = scalar_lea.vmem %s347_s22, %s6770_s23  ;;  %7855 = vmatprep.subr.msk.bf16.mxu0 %vm912_vm2, %v709_v19 }
  0x43   : > { %396 = vst [vmem:[#allocation3 + $0x58] sm:$0xf0] %v8193_v0  ;;  %397 = vst [vmem:[#allocation3 + $0x68] sm:$0xf0] %v8193_v0  ;;  %v7955_v3 = vld [vmem:[%s8374_s17] ss:$0 sps:$4 sm:$0xff]   ;;  %595 = vrot.lane.b32.xlu1 %v7954_v2, %s8194_s26 }
  0x44   : > { %398 = vst [vmem:[#allocation3 + $0x78] sm:$0xf0] %v8193_v0  ;;  %399 = vst [vmem:[#allocation3 + $0x88] sm:$0xf0] %v8193_v0  ;;  %v7956_v4 = vld [vmem:[%s8374_s17 + $0xc] ss:$0 sps:$4 sm:$0xff]   ;;  %591 = vrot.lane.b32.xlu0 %v7955_v3, %s8194_s26 }
  0x45   : > { %400 = vst [vmem:[#allocation3 + $0x98] sm:$0xf0] %v8193_v0  ;;  %357 = vst.msk [vmem:[#allocation2 + $0x10] sm:$0xf] %vm355_vm0, %v8193_v0  ;;  %v7957_v5 = vld [vmem:[%s8374_s17 + $0x4] ss:$0 sps:$4 sm:$0xff]  }
  0x46   : > { %358 = vst.msk [vmem:[#allocation2 + $0x20] sm:$0xf] %vm355_vm0, %v8193_v0  ;;  %359 = vst.msk [vmem:[#allocation2 + $0x30] sm:$0xf] %vm355_vm0, %v8193_v0  ;;  %v7958_v6 = vld [vmem:[%s8374_s17 + $0x14] ss:$0 sps:$4 sm:$0xff]  }
  0x47   : > { %360 = vst.msk [vmem:[#allocation2 + $0x40] sm:$0xf] %vm355_vm0, %v8193_v0  ;;  %361 = vst.msk [vmem:[#allocation2 + $0x50] sm:$0xf] %vm355_vm0, %v8193_v0  ;;  %597 = vrot.lane.b32.xlu1 %v7956_v4, %s8194_s26  ;;  %v7959_v7 = vld [vmem:[%s8374_s17 + $0x10] ss:$0 sps:$4 sm:$0xff]  }
  0x48   : > { %362 = vst.msk [vmem:[#allocation2 + $0x60] sm:$0xf] %vm355_vm0, %v8193_v0  ;;  %363 = vst.msk [vmem:[#allocation2 + $0x70] sm:$0xf] %vm355_vm0, %v8193_v0  ;;  %593 = vrot.lane.b32.xlu0 %v7957_v5, %s8194_s26  ;;  %v7960_v8 = vld [vmem:[%s8374_s17 + $0x1c] ss:$0 sps:$4 sm:$0xff]  }
  0x49   : > { %364 = vst.msk [vmem:[#allocation2 + $0x80] sm:$0xf] %vm355_vm0, %v8193_v0  ;;  %365 = vst.msk [vmem:[#allocation2 + $0x90] sm:$0xf] %vm355_vm0, %v8193_v0  ;;  %v7961_v9 = vld [vmem:[%s8374_s17 + $0x18] ss:$0 sps:$4 sm:$0xff]  }
  0x4a   : > { %366 = vst.msk [vmem:[#allocation2 + $0xa0] sm:$0xf] %vm355_vm0, %v8193_v0  ;;  %367 = vst.msk [vmem:[#allocation2 + $0xb0] sm:$0xf] %vm355_vm0, %v8193_v0  ;;  %v7974_v10 = vld [vmem:[%s8394_s24] ss:$0 sps:$4 sm:$0xff]  }
  0x4b   : > { %369 = vst.msk [vmem:[#allocation2 + $0x8] sm:$0xf0] %vm368_vm1, %v8193_v0  ;;  %370 = vst.msk [vmem:[#allocation2 + $0x18] sm:$0xf0] %vm368_vm1, %v8193_v0  ;;  %601 = vrot.lane.b32.xlu1 %v7958_v6, %s8194_s26  ;;  %s340_s11 = sand.u32 1, %s8164_s28   ;;  %v1122_v20 = vsel %vm912_vm2, %v709_v19, 0 }
  0x4c   : > { %371 = vst.msk [vmem:[#allocation2 + $0x28] sm:$0xf0] %vm368_vm1, %v8193_v0  ;;  %372 = vst.msk [vmem:[#allocation2 + $0x38] sm:$0xf0] %vm368_vm1, %v8193_v0  ;;  %599 = vrot.lane.b32.xlu0 %v7959_v7, %s8194_s26  ;;  %v7962_v11 = vld [vmem:[%s8374_s17 + $0x24] ss:$0 sps:$4 sm:$0xff]   ;;  %7103 = vmatpush3.bf16.msra.mxu0 %v1122_v20 }
  0x4d   : > { %373 = vst.msk [vmem:[#allocation2 + $0x48] sm:$0xf0] %vm368_vm1, %v8193_v0  ;;  %374 = vst.msk [vmem:[#allocation2 + $0x58] sm:$0xf0] %vm368_vm1, %v8193_v0  ;;  %v7963_v12 = vld [vmem:[%s8374_s17 + $0x20] ss:$0 sps:$4 sm:$0xff]  }
  0x4e   : > { %375 = vst.msk [vmem:[#allocation2 + $0x68] sm:$0xf0] %vm368_vm1, %v8193_v0  ;;  %376 = vst.msk [vmem:[#allocation2 + $0x78] sm:$0xf0] %vm368_vm1, %v8193_v0  ;;  %v7977_v13 = vld [vmem:[%s8394_s24 + $0x4] ss:$0 sps:$4 sm:$0xff]  }
  0x4f   : > { %377 = vst.msk [vmem:[#allocation2 + $0x88] sm:$0xf0] %vm368_vm1, %v8193_v0  ;;  %378 = vst.msk [vmem:[#allocation2 + $0x98] sm:$0xf0] %vm368_vm1, %v8193_v0  ;;  %605 = vrot.lane.b32.xlu1 %v7960_v8, %s8194_s26  ;;  %v7964_v14 = vld [vmem:[%s8374_s17 + $0x2c] ss:$0 sps:$4 sm:$0xff]  }
  0x50   : > { %379 = vst.msk [vmem:[#allocation2 + $0xa8] sm:$0xf0] %vm368_vm1, %v8193_v0  ;;  %380 = vst.msk [vmem:[#allocation2 + $0xb8] sm:$0xf0] %vm368_vm1, %v8193_v0  ;;  %603 = vrot.lane.b32.xlu0 %v7961_v9, %s8194_s26  ;;  %v7978_v15 = vld [vmem:[%s8394_s24 + $0xc] ss:$0 sps:$4 sm:$0xff]  }
  0x51   : > { %469 = vst.msk [vmem:[#allocation2 + $0x10] sm:$0xf0] %vm465_vm3, %v7974_v10  ;;  %466 = vst.msk [vmem:[#allocation2] sm:$0xf0] %vm465_vm3, %v7974_v10  ;;  %v7965_v16 = vld [vmem:[%s8374_s17 + $0x28] ss:$0 sps:$4 sm:$0xff]  }
  0x52   : > { %470 = vst.msk [vmem:[#allocation2 + $0x18] sm:$0xf] %vm467_vm4, %v7977_v13  ;;  %468 = vst.msk [vmem:[#allocation2 + $0x8] sm:$0xf] %vm467_vm4, %v7977_v13  ;;  %v7979_v17 = vld [vmem:[%s8394_s24 + $0x8] ss:$0 sps:$4 sm:$0xff]  }
  0x53   : > { %s8415_s14 = sshll.u32 %s340_s11, 6  ;;  %609 = vrot.lane.b32.xlu1 %v7962_v11, %s8194_s26  ;;  %472 = vst.msk [vmem:[#allocation2 + $0x28] sm:$0xf] %vm467_vm4, %v7978_v15  ;;  %474 = vst.msk [vmem:[#allocation2 + $0x38] sm:$0xf] %vm467_vm4, %v7978_v15  ;;  %vm663_vm5 = vcmask 64548  }
  0x54   : > { %607 = vrot.lane.b32.xlu0 %v7963_v12, %s8194_s26  ;;  %471 = vst.msk [vmem:[#allocation2 + $0x20] sm:$0xf0] %vm465_vm3, %v7979_v17  ;;  %473 = vst.msk [vmem:[#allocation2 + $0x30] sm:$0xf0] %vm465_vm3, %v7979_v17  ;;  %v7980_v21 = vld [vmem:[%s8394_s24 + $0x14] ss:$0 sps:$4 sm:$0xff]  }
  0x55   : > { %v7966_v22 = vld [vmem:[%s8374_s17 + $0x34] ss:$0 sps:$4 sm:$0xff]   ;;  %v7981_v23 = vld [vmem:[%s8394_s24 + $0x10] ss:$0 sps:$4 sm:$0xff]   ;;  %v8429_v24 = vld [vmem:[#allocation4 + $0x8] sm:$0xf] }
  0x56   : > { %v7967_v25 = vld [vmem:[%s8374_s17 + $0x30] ss:$0 sps:$4 sm:$0xff]   ;;  %476 = vst.msk [vmem:[#allocation2 + $0x48] sm:$0xf] %vm467_vm4, %v7980_v21  ;;  %478 = vst.msk [vmem:[#allocation2 + $0x58] sm:$0xf] %vm467_vm4, %v7980_v21  ;;  %7856 = vmatprep.subr.msk.bf16.mxu0 %vm912_vm2, %v8429_v24 }
  0x57   : > { %v7982_v26 = vld [vmem:[%s8394_s24 + $0x1c] ss:$0 sps:$4 sm:$0xff]   ;;  %613 = vrot.lane.b32.xlu1 %v7964_v14, %s8194_s26  ;;  %475 = vst.msk [vmem:[#allocation2 + $0x40] sm:$0xf0] %vm465_vm3, %v7981_v23  ;;  %477 = vst.msk [vmem:[#allocation2 + $0x50] sm:$0xf0] %vm465_vm3, %v7981_v23 }
  0x58   : > { %v7983_v27 = vld [vmem:[%s8394_s24 + $0x18] ss:$0 sps:$4 sm:$0xff]   ;;  %611 = vrot.lane.b32.xlu0 %v7965_v16, %s8194_s26  ;;  %480 = vst.msk [vmem:[#allocation2 + $0x68] sm:$0xf] %vm467_vm4, %v7982_v26  ;;  %482 = vst.msk [vmem:[#allocation2 + $0x78] sm:$0xf] %vm467_vm4, %v7982_v26 }
  0x59   : > { %v7984_v28 = vld [vmem:[%s8394_s24 + $0x24] ss:$0 sps:$4 sm:$0xff]   ;;  %v7985_v29 = vld [vmem:[%s8394_s24 + $0x20] ss:$0 sps:$4 sm:$0xff]   ;;  %479 = vst.msk [vmem:[#allocation2 + $0x60] sm:$0xf0] %vm465_vm3, %v7983_v27 }
  0x5a   : > { %481 = vst.msk [vmem:[#allocation2 + $0x70] sm:$0xf0] %vm465_vm3, %v7983_v27  ;;  %483 = vst.msk [vmem:[#allocation2 + $0x80] sm:$0xf0] %vm465_vm3, %v7985_v29  ;;  %v7968_v30 = vld [vmem:[%s8374_s17 + $0x3c] ss:$0 sps:$4 sm:$0xff]  }
  0x5b   : > { %484 = vst.msk [vmem:[#allocation2 + $0x88] sm:$0xf] %vm467_vm4, %v7984_v28  ;;  %486 = vst.msk [vmem:[#allocation2 + $0x98] sm:$0xf] %vm467_vm4, %v7984_v28  ;;  %617 = vrot.lane.b32.xlu1 %v7966_v22, %s8194_s26  ;;  %v7969_v31 = vld [vmem:[%s8374_s17 + $0x38] ss:$0 sps:$4 sm:$0xff]  }
  0x5c   : > { %485 = vst.msk [vmem:[#allocation2 + $0x90] sm:$0xf0] %vm465_vm3, %v7985_v29  ;;  %615 = vrot.lane.b32.xlu0 %v7967_v25, %s8194_s26  ;;  %v7970_v32 = vld [vmem:[%s8374_s17 + $0x44] ss:$0 sps:$4 sm:$0xff]   ;;  %v7971_v33 = vld [vmem:[%s8374_s17 + $0x40] ss:$0 sps:$4 sm:$0xff]  }
  0x5d   : > { %v7972_v34 = vld [vmem:[%s8374_s17 + $0x4c] ss:$0 sps:$4 sm:$0xff]   ;;  %v7973_v35 = vld [vmem:[%s8374_s17 + $0x48] ss:$0 sps:$4 sm:$0xff]   ;;  %v7975_v36 = vld [vmem:[%s8374_s17 + $0x54] ss:$0 sps:$4 sm:$0xff]  }
  0x5e   : > { %v7976_v37 = vld [vmem:[%s8374_s17 + $0x50] ss:$0 sps:$4 sm:$0xff]   ;;  %v7986_v38 = vld [vmem:[%s8394_s24 + $0x2c] ss:$0 sps:$4 sm:$0xff]   ;;  %v7987_v39 = vld [vmem:[%s8394_s24 + $0x28] ss:$0 sps:$4 sm:$0xff]  }
  0x5f   : > { %621 = vrot.lane.b32.xlu1 %v7968_v30, %s8194_s26  ;;  %488 = vst.msk [vmem:[#allocation2 + $0xa8] sm:$0xf] %vm467_vm4, %v7986_v38  ;;  %490 = vst.msk [vmem:[#allocation2 + $0xb8] sm:$0xf] %vm467_vm4, %v7986_v38  ;;  %v7988_v40 = vld [vmem:[%s8374_s17 + $0x5c] ss:$0 sps:$4 sm:$0xff]  }
  0x60   : > { %619 = vrot.lane.b32.xlu0 %v7969_v31, %s8194_s26  ;;  %487 = vst.msk [vmem:[#allocation2 + $0xa0] sm:$0xf0] %vm465_vm3, %v7987_v39  ;;  %489 = vst.msk [vmem:[#allocation2 + $0xb0] sm:$0xf0] %vm465_vm3, %v7987_v39  ;;  %v7989_v41 = vld [vmem:[%s8374_s17 + $0x58] ss:$0 sps:$4 sm:$0xff]  }
  0x61   : > { %vm665_vm6 = vcmask 60448   ;;  %vm943_vm7 = vcmask 64512   ;;  %vm710_vm8 = vsmask.f32 4352  ;;  %v1450_v15 = vsel %vm912_vm2, %v8429_v24, 0  ;;  %s9095_s16 = scalar_lea.vmem [#allocation7], %s8415_s14 }
  0x62   : > { %vm1248_vm9 = vsmask.f32 3328  ;;  %p6670_p8 = scmp.ne.s32.totalorder %s8172_s30, 0 }
  0x63   : > { %625 = vrot.lane.b32.xlu1 %v7970_v32, %s8194_s26 }
  0x64   : > { %623 = vrot.lane.b32.xlu0 %v7971_v33, %s8194_s26 }
  0x67   : > { %629 = vrot.lane.b32.xlu1 %v7972_v34, %s8194_s26 }
  0x68   : > { %627 = vrot.lane.b32.xlu0 %v7973_v35, %s8194_s26 }
  0x6b   : > { %633 = vrot.lane.b32.xlu1 %v7975_v36, %s8194_s26  ;;  %v8507_v36 = vld [vmem:[#allocation4 + $0xc] sm:$0xf] }
  0x6c   : > { %631 = vrot.lane.b32.xlu0 %v7976_v37, %s8194_s26 }
  0x6f   : > { %637 = vrot.lane.b32.xlu1 %v7988_v40, %s8194_s26 }
  0x70   : > { %635 = vrot.lane.b32.xlu0 %v7989_v41, %s8194_s26 }
  0xb5   : > { %v596_v42 = vpop.permute.xlu1 %595 }
  0xb6   : > { %667 = vst.msk [vmem:[#allocation2 + $0x10] sm:$0xf0] %vm663_vm5, %v596_v42  ;;  %v592_v43 = vpop.permute.xlu0 %591 }
  0xb7   : > { %664 = vst.msk [vmem:[#allocation2] sm:$0xf0] %vm663_vm5, %v592_v43 }
  0xb9   : > { %v598_v44 = vpop.permute.xlu1 %597 }
  0xba   : > { %668 = vst.msk [vmem:[#allocation2 + $0x18] sm:$0xf] %vm665_vm6, %v598_v44  ;;  %v594_v45 = vpop.permute.xlu0 %593 }
  0xbb   : > { %666 = vst.msk [vmem:[#allocation2 + $0x8] sm:$0xf] %vm665_vm6, %v594_v45 }
  0xbd   : > { %v602_v46 = vpop.permute.xlu1 %601  ;;  %v691_v47 = vld [vmem:[#allocation2 + $0x10] sm:$0xf8] }
  0xbe   : > { %670 = vst.msk [vmem:[#allocation2 + $0x28] sm:$0xf] %vm665_vm6, %v602_v46  ;;  %v600_v48 = vpop.permute.xlu0 %599  ;;  %v8485_v49 = vld [vmem:[#allocation2] sm:$0xf0]  ;;  %v8487_v50 = vld [vmem:[#allocation2 + $0x10] sm:$0xf0] }
  0xbf   : > { %669 = vst.msk [vmem:[#allocation2 + $0x20] sm:$0xf0] %vm663_vm5, %v600_v48  ;;  %v689_v51 = vld [vmem:[#allocation2] sm:$0xf8]  ;;  %v729_v52 = vshrl.u32 %v691_v47, 16  ;;  %v732_v55 = vshll.u32 %v691_v47, 16 }
  0xc0   : > { %v712_v53 = vshrl.u32 %v689_v51, 16  ;;  %v715_v54 = vshll.u32 %v689_v51, 16  ;;  %v913_v57 = vrot.slane %v8485_v49, 4  ;;  %v916_v59 = vrot.slane %v8487_v50, 4 }
  0xc1   : > { %v606_v56 = vpop.permute.xlu1 %605  ;;  %v692_v58 = vld [vmem:[#allocation2 + $0x18] sm:$0xf]  ;;  %v731_v5 = vrot.slane %v729_v52, 3  ;;  %v734_v7 = vrot.slane %v732_v55, 4 }
  0xc2   : > { %672 = vst.msk [vmem:[#allocation2 + $0x38] sm:$0xf] %vm665_vm6, %v606_v56  ;;  %v604_v60 = vpop.permute.xlu0 %603  ;;  %v690_v61 = vld [vmem:[#allocation2 + $0x8] sm:$0xf]  ;;  %v917_v62 = vrot.slane %v692_v58, 4  ;;  %v714_v63 = vrot.slane %v712_v53, 3 }
  0xc3   : > { %v717_v0 = vrot.slane %v715_v54, 4  ;;  %v737_v1 = vshrl.u32 %v692_v58, 16  ;;  %671 = vst.msk [vmem:[#allocation2 + $0x30] sm:$0xf0] %vm663_vm5, %v604_v60  ;;  %v914_v2 = vrot.slane %v690_v61, 4  ;;  %v720_v3 = vshrl.u32 %v690_v61, 16 }
  0xc4   : > { %v723_v4 = vshll.u32 %v690_v61, 16  ;;  %v918_v6 = vsel %vm912_vm2, %v916_v59, %v917_v62  ;;  %v740_v9 = vshll.u32 %v692_v58, 16  ;;  %v735_v26 = vor.u32 %v734_v7, %v731_v5 }
  0xc5   : > { %v739_v8 = vrot.slane %v737_v1, 3  ;;  %v915_v10 = vsel %vm912_vm2, %v913_v57, %v914_v2  ;;  %v610_v11 = vpop.permute.xlu1 %609  ;;  %v722_v12 = vrot.slane %v720_v3, 3  ;;  %v694_v14 = vld [vmem:[#allocation2 + $0x28] sm:$0xf]  ;;  %v718_v17 = vor.u32 %v717_v0, %v714_v63 }
  0xc6   : > { %v725_v13 = vrot.slane %v723_v4, 4  ;;  %7082 = vmatprep.mubr.msk.bf16.mxu1 %vm943_vm7, %v915_v10  ;;  %674 = vst.msk [vmem:[#allocation2 + $0x48] sm:$0xf] %vm665_vm6, %v610_v11  ;;  %v608_v16 = vpop.permute.xlu0 %607  ;;  %v8500_v18 = vld [vmem:[#allocation2 + $0x20] sm:$0xf0]  ;;  %v920_v19 = vrot.slane %v694_v14, 4 }
  0xc7   : > { %v742_v20 = vrot.slane %v740_v9, 4  ;;  %v693_v21 = vld [vmem:[#allocation2 + $0x20] sm:$0xf8]  ;;  %673 = vst.msk [vmem:[#allocation2 + $0x40] sm:$0xf0] %vm663_vm5, %v608_v16  ;;  %7083 = vmatmul.mubr.msk.bf16.vlgmr.msra.gmra.mrb[0].mxu1 %vm943_vm7, %v918_v6  ;;  %v919_v23 = vrot.slane %v8500_v18, 4 }
  0xc8   : > { %v726_v22 = vor.u32 %v725_v13, %v722_v12  ;;  %v746_v25 = vshrl.u32 %v693_v21, 16  ;;  %v749_v24 = vshll.u32 %v693_v21, 16  ;;  %v754_v28 = vshrl.u32 %v694_v14, 16 }
  0xc9   : > { %v743_v27 = vor.u32 %v742_v20, %v739_v8  ;;  %v757_v29 = vshll.u32 %v694_v14, 16  ;;  %v614_v31 = vpop.permute.xlu1 %613  ;;  %v921_v32 = vsel %vm912_vm2, %v919_v23, %v920_v19  ;;  %v696_v33 = vld [vmem:[#allocation2 + $0x38] sm:$0xf]  ;;  %v1250_v5 = vshrl.u32 %v8485_v49, 16 }
  0xca   : > { %v727_v30 = vsel %vm710_vm8, %v718_v17, %v726_v22  ;;  %v748_v34 = vrot.slane %v746_v25, 3  ;;  %v751_v35 = vrot.slane %v749_v24, 4  ;;  %676 = vst.msk [vmem:[#allocation2 + $0x58] sm:$0xf] %vm665_vm6, %v614_v31  ;;  %v612_v37 = vpop.permute.xlu0 %611  ;;  %7086 = vmatprep.mubr.msk.bf16.mxu1 %vm943_vm7, %v921_v32  ;;  %v8513_v39 = vld [vmem:[#allocation2 + $0x30] sm:$0xf0] }
  0xcb   : > { %7104 = vmatprep.mubr.msk.bf16.mxu0 %vm943_vm7, %v727_v30  ;;  %v744_v38 = vsel %vm710_vm8, %v735_v26, %v743_v27  ;;  %v923_v40 = vrot.slane %v696_v33, 4  ;;  %v756_v41 = vrot.slane %v754_v28, 3  ;;  %v759_v42 = vrot.slane %v757_v29, 4  ;;  %675 = vst.msk [vmem:[#allocation2 + $0x50] sm:$0xf0] %vm663_vm5, %v612_v37 }
  0xcc   : > { %7105 = vmatmul.mubr.msk.bf16.vlgmr.msra.gmra.mrb[0].mxu0 %vm943_vm7, %v744_v38  ;;  %v922_v43 = vrot.slane %v8513_v39, 4  ;;  %v752_v44 = vor.u32 %v751_v35, %v748_v34  ;;  %v695_v45 = vld [vmem:[#allocation2 + $0x30] sm:$0xf8]  ;;  %v771_v46 = vshrl.u32 %v696_v33, 16  ;;  %v774_v47 = vshll.u32 %v696_v33, 16 }
  0xcd   : > { %7125 = vmatpush3.bf16.msra.mxu0 %v1450_v15  ;;  %v760_v48 = vor.u32 %v759_v42, %v756_v41  ;;  %v763_v51 = vshrl.u32 %v695_v45, 16  ;;  %v766_v52 = vshll.u32 %v695_v45, 16  ;;  %v618_v53 = vpop.permute.xlu1 %617  ;;  %v698_v55 = vld [vmem:[#allocation2 + $0x48] sm:$0xf]  ;;  %v1253_v9 = vshll.u32 %v8485_v49, 16 }
  0xce   : > { %v924_v54 = vsel %vm912_vm2, %v922_v43, %v923_v40  ;;  %v773_v56 = vrot.slane %v771_v46, 3  ;;  %v776_v57 = vrot.slane %v774_v47, 4  ;;  %7857 = vmatprep.subr.msk.bf16.mxu0 %vm912_vm2, %v8507_v36  ;;  %678 = vst.msk [vmem:[#allocation2 + $0x68] sm:$0xf] %vm665_vm6, %v618_v53  ;;  %v616_v58 = vpop.permute.xlu0 %615  ;;  %v8523_v60 = vld [vmem:[#allocation2 + $0x40] sm:$0xf0] }
  0xcf   : > { %v761_v59 = vsel %vm710_vm8, %v752_v44, %v760_v48  ;;  %v926_v61 = vrot.slane %v698_v55, 4  ;;  %v765_v62 = vrot.slane %v763_v51, 3  ;;  %v768_v63 = vrot.slane %v766_v52, 4  ;;  %677 = vst.msk [vmem:[#allocation2 + $0x60] sm:$0xf0] %vm663_vm5, %v616_v58  ;;  %7087 = vmatmul.mubr.msk.bf16.gmra.mrb[4].mxu1 %vm943_vm7, %v924_v54 }
  0xd0   : > { %7108 = vmatprep.mubr.msk.bf16.mxu0 %vm943_vm7, %v761_v59  ;;  %v925_v0 = vrot.slane %v8523_v60, 4  ;;  %v777_v1 = vor.u32 %v776_v57, %v773_v56  ;;  %v697_v2 = vld [vmem:[#allocation2 + $0x40] sm:$0xf8]  ;;  %v788_v3 = vshrl.u32 %v698_v55, 16  ;;  %v791_v4 = vshll.u32 %v698_v55, 16 }
  0xd1   : > { %v769_v6 = vor.u32 %v768_v63, %v765_v62  ;;  %v780_v7 = vshrl.u32 %v697_v2, 16  ;;  %v783_v8 = vshll.u32 %v697_v2, 16  ;;  %v622_v10 = vpop.permute.xlu1 %621  ;;  %v700_v12 = vld [vmem:[#allocation2 + $0x58] sm:$0xf]  ;;  %v8540_v29 = vrot.slane %v1250_v5, 4 }
  0xd2   : > { %v927_v11 = vsel %vm912_vm2, %v925_v0, %v926_v61  ;;  %v790_v13 = vrot.slane %v788_v3, 3  ;;  %v793_v14 = vrot.slane %v791_v4, 4  ;;  %680 = vst.msk [vmem:[#allocation2 + $0x78] sm:$0xf] %vm665_vm6, %v622_v10  ;;  %v620_v15 = vpop.permute.xlu0 %619  ;;  %v8535_v17 = vld [vmem:[#allocation2 + $0x50] sm:$0xf0] }
  0xd3   : > { %7090 = vmatprep.mubr.msk.bf16.mxu1 %vm943_vm7, %v927_v11  ;;  %v778_v16 = vsel %vm710_vm8, %v769_v6, %v777_v1  ;;  %v929_v19 = vrot.slane %v700_v12, 4  ;;  %v782_v20 = vrot.slane %v780_v7, 3  ;;  %v785_v21 = vrot.slane %v783_v8, 4  ;;  %679 = vst.msk [vmem:[#allocation2 + $0x70] sm:$0xf0] %vm663_vm5, %v620_v15 }
  0xd4   : > { %7109 = vmatmul.mubr.msk.bf16.gmra.mrb[4].mxu0 %vm943_vm7, %v778_v16  ;;  %v928_v49 = vrot.slane %v8535_v17, 4  ;;  %v794_v22 = vor.u32 %v793_v14, %v790_v13  ;;  %v699_v23 = vld [vmem:[#allocation2 + $0x50] sm:$0xf8]  ;;  %v805_v25 = vshrl.u32 %v700_v12, 16  ;;  %v808_v24 = vshll.u32 %v700_v12, 16 }
  0xd5   : > { %v786_v26 = vor.u32 %v785_v21, %v782_v20  ;;  %v797_v27 = vshrl.u32 %v699_v23, 16  ;;  %v800_v28 = vshll.u32 %v699_v23, 16  ;;  %v626_v30 = vpop.permute.xlu1 %625  ;;  %v702_v32 = vld [vmem:[#allocation2 + $0x68] sm:$0xf]  ;;  %v8553_v54 = vrot.slane %v1253_v9, 5 }
  0xd6   : > { %v930_v31 = vsel %vm912_vm2, %v928_v49, %v929_v19  ;;  %v807_v33 = vrot.slane %v805_v25, 3  ;;  %v810_v34 = vrot.slane %v808_v24, 4  ;;  %v8543_v35 = vld [vmem:[#allocation2 + $0x8] sm:$0x1f]  ;;  %682 = vst.msk [vmem:[#allocation2 + $0x88] sm:$0xf] %vm665_vm6, %v626_v30  ;;  %v624_v37 = vpop.permute.xlu0 %623 }
  0xd7   : > { %v795_v38 = vsel %vm710_vm8, %v786_v26, %v794_v22  ;;  %v8547_v40 = vld [vmem:[#allocation2 + $0x60] sm:$0xf0]  ;;  %v932_v41 = vrot.slane %v702_v32, 4  ;;  %v799_v42 = vrot.slane %v797_v27, 3  ;;  %v802_v43 = vrot.slane %v800_v28, 4  ;;  %7091 = vmatmul.mubr.msk.bf16.gmra.mrb[8].mxu1 %vm943_vm7, %v930_v31 }
  0xd8   : > { %681 = vst.msk [vmem:[#allocation2 + $0x80] sm:$0xf0] %vm663_vm5, %v624_v37  ;;  %7112 = vmatprep.mubr.msk.bf16.mxu0 %vm943_vm7, %v795_v38  ;;  %v931_v44 = vrot.slane %v8547_v40, 4  ;;  %v811_v45 = vor.u32 %v810_v34, %v807_v33  ;;  %v701_v46 = vld [vmem:[#allocation2 + $0x60] sm:$0xf8]  ;;  %v822_v47 = vshrl.u32 %v702_v32, 16 }
  0xd9   : > { %v825_v48 = vshll.u32 %v702_v32, 16  ;;  %v803_v51 = vor.u32 %v802_v43, %v799_v42  ;;  %v814_v52 = vshrl.u32 %v701_v46, 16  ;;  %v817_v53 = vshll.u32 %v701_v46, 16  ;;  %v630_v55 = vpop.permute.xlu1 %629  ;;  %v704_v57 = vld [vmem:[#allocation2 + $0x78] sm:$0xf] }
  0xda   : > { %v933_v56 = vsel %vm912_vm2, %v931_v44, %v932_v41  ;;  %v824_v58 = vrot.slane %v822_v47, 3  ;;  %v1258_v61 = vshrl.u32 %v8543_v35, 16  ;;  %684 = vst.msk [vmem:[#allocation2 + $0x98] sm:$0xf] %vm665_vm6, %v630_v55  ;;  %v628_v62 = vpop.permute.xlu0 %627  ;;  %v8560_v0 = vld [vmem:[#allocation2 + $0x70] sm:$0xf0] }
  0xdb   : > { %v827_v59 = vrot.slane %v825_v48, 4  ;;  %7094 = vmatprep.mubr.msk.bf16.mxu1 %vm943_vm7, %v933_v56  ;;  %v812_v63 = vsel %vm710_vm8, %v803_v51, %v811_v45  ;;  %v935_v1 = vrot.slane %v704_v57, 4  ;;  %v816_v2 = vrot.slane %v814_v52, 3  ;;  %683 = vst.msk [vmem:[#allocation2 + $0x90] sm:$0xf0] %vm663_vm5, %v628_v62 }
  0xdc   : > { %v819_v3 = vrot.slane %v817_v53, 4  ;;  %7113 = vmatmul.mubr.msk.bf16.gmra.mrb[8].mxu0 %vm943_vm7, %v812_v63  ;;  %v934_v4 = vrot.slane %v8560_v0, 4  ;;  %v703_v6 = vld [vmem:[#allocation2 + $0x70] sm:$0xf8]  ;;  %v839_v7 = vshrl.u32 %v704_v57, 16  ;;  %v842_v8 = vshll.u32 %v704_v57, 16 }
  0xdd   : > { %v828_v5 = vor.u32 %v827_v59, %v824_v58  ;;  %v831_v10 = vshrl.u32 %v703_v6, 16  ;;  %v834_v11 = vshll.u32 %v703_v6, 16  ;;  %v1261_v12 = vshll.u32 %v8543_v35, 16  ;;  %v8566_v13 = vld [vmem:[#allocation2 + $0x18] sm:$0x1f]  ;;  %v634_v21 = vpop.permute.xlu1 %633 }
  0xde   : > { %v820_v9 = vor.u32 %v819_v3, %v816_v2  ;;  %v936_v14 = vsel %vm912_vm2, %v934_v4, %v935_v1  ;;  %v706_v15 = vld [vmem:[#allocation2 + $0x88] sm:$0xf]  ;;  %v841_v16 = vrot.slane %v839_v7, 3  ;;  %v844_v19 = vrot.slane %v842_v8, 4  ;;  %686 = vst.msk [vmem:[#allocation2 + $0xa8] sm:$0xf] %vm665_vm6, %v634_v21  ;;  %v632_v26 = vpop.permute.xlu0 %631 }
  0xdf   : > { %v8569_v20 = vrot.slane %v1258_v61, 4  ;;  %v8572_v22 = vld [vmem:[#allocation2 + $0x80] sm:$0xf0]  ;;  %v938_v23 = vrot.slane %v706_v15, 4  ;;  %v833_v25 = vrot.slane %v831_v10, 3  ;;  %v836_v24 = vrot.slane %v834_v11, 4  ;;  %7095 = vmatmul.mubr.msk.bf16.gmra.mrb[12].mxu1 %vm943_vm7, %v936_v14 }
  0xe0   : > { %v829_v49 = vsel %vm710_vm8, %v820_v9, %v828_v5  ;;  %v937_v27 = vrot.slane %v8572_v22, 4  ;;  %v845_v28 = vor.u32 %v844_v19, %v841_v16  ;;  %v705_v30 = vld [vmem:[#allocation2 + $0x80] sm:$0xf8]  ;;  %v856_v31 = vshrl.u32 %v706_v15, 16  ;;  %685 = vst.msk [vmem:[#allocation2 + $0xa0] sm:$0xf0] %vm663_vm5, %v632_v26 }
  0xe1   : > { %7116 = vmatprep.mubr.msk.bf16.mxu0 %vm943_vm7, %v829_v49  ;;  %v859_v32 = vshll.u32 %v706_v15, 16  ;;  %v837_v33 = vor.u32 %v836_v24, %v833_v25  ;;  %v848_v34 = vshrl.u32 %v705_v30, 16  ;;  %v851_v35 = vshll.u32 %v705_v30, 16  ;;  %v708_v41 = vld [vmem:[#allocation2 + $0x98] sm:$0xf] }
  0xe2   : > { %v1263_v37 = vrot.slane %v1261_v12, 5  ;;  %v939_v38 = vsel %vm912_vm2, %v937_v27, %v938_v23  ;;  %v858_v42 = vrot.slane %v856_v31, 3  ;;  %v1275_v44 = vshrl.u32 %v8566_v13, 16  ;;  %v8583_v46 = vld [vmem:[#allocation2 + $0x90] sm:$0xf0] }
  0xe3   : > { %v861_v43 = vrot.slane %v859_v32, 4  ;;  %7098 = vmatprep.mubr.msk.bf16.mxu1 %vm943_vm7, %v939_v38  ;;  %v846_v45 = vsel %vm710_vm8, %v837_v33, %v845_v28  ;;  %v941_v47 = vrot.slane %v708_v41, 4  ;;  %v850_v48 = vrot.slane %v848_v34, 3  ;;  %v707_v55 = vld [vmem:[#allocation2 + $0x90] sm:$0xf8] }
  0xe4   : > { %v853_v51 = vrot.slane %v851_v35, 4  ;;  %7117 = vmatmul.mubr.msk.bf16.gmra.mrb[12].mxu0 %vm943_vm7, %v846_v45  ;;  %v940_v52 = vrot.slane %v8583_v46, 4  ;;  %v873_v56 = vshrl.u32 %v708_v41, 16  ;;  %v876_v57 = vshll.u32 %v708_v41, 16  ;;  %v1239_v63 = vld [vmem:[#allocation2 + $0x28] sm:$0x1f] }
  0xe5   : > { %v862_v53 = vor.u32 %v861_v43, %v858_v42  ;;  %v865_v59 = vshrl.u32 %v707_v55, 16  ;;  %v868_v61 = vshll.u32 %v707_v55, 16  ;;  %v1278_v62 = vshll.u32 %v8566_v13, 16  ;;  %v1240_v25 = vld [vmem:[#allocation2 + $0x38] sm:$0x1f] }
  0xe6   : > { %v854_v58 = vor.u32 %v853_v51, %v850_v48  ;;  %v942_v1 = vsel %vm912_vm2, %v940_v52, %v941_v47  ;;  %v875_v2 = vrot.slane %v873_v56, 3  ;;  %v878_v3 = vrot.slane %v876_v57, 4  ;;  %v1242_v52 = vld [vmem:[#allocation2 + $0x58] sm:$0x1f] }
  0xe7   : > { %v1284_v4 = vshrl.u32 %v8500_v18, 16  ;;  %v867_v6 = vrot.slane %v865_v59, 3  ;;  %v870_v7 = vrot.slane %v868_v61, 4  ;;  %v1287_v8 = vshll.u32 %v8500_v18, 16  ;;  %7099 = vmatmul.mubr.msk.bf16.gmra.mrb[16].mxu1 %vm943_vm7, %v942_v1 }
  0xe8   : > { %v863_v5 = vsel %vm710_vm8, %v854_v58, %v862_v53  ;;  %v879_v9 = vor.u32 %v878_v3, %v875_v2  ;;  %v1264_v10 = vor.u32 %v1263_v37, %v8569_v20  ;;  %v1292_v11 = vshrl.u32 %v1239_v63, 16  ;;  %v8610_v53 = vld [vmem:[#allocation4 + $0x10] sm:$0xf]  ;;  %v1243_v58 = vld [vmem:[#allocation2 + $0x68] sm:$0x1f] }
  0xe9   : > { %7120 = vmatprep.mubr.msk.bf16.mxu0 %vm943_vm7, %v863_v5  ;;  %v1295_v12 = vshll.u32 %v1239_v63, 16  ;;  %v1267_v13 = vshrl.u32 %v8487_v50, 16  ;;  %v1270_v14 = vshll.u32 %v8487_v50, 16  ;;  %v871_v15 = vor.u32 %v870_v7, %v867_v6 }
  0xea   : > { %v1256_v16 = vor.u32 %v8553_v54, %v8540_v29  ;;  %v1277_v19 = vrot.slane %v1275_v44, 4  ;;  %v1280_v21 = vrot.slane %v1278_v62, 5  ;;  %v1286_v49 = vrot.slane %v1284_v4, 4  ;;  %v1241_v54 = vld [vmem:[#allocation2 + $0x48] sm:$0x1f] }
  0xeb   : > { %v880_v18 = vsel %vm710_vm8, %v871_v15, %v879_v9  ;;  %v1289_v23 = vrot.slane %v1287_v8, 5  ;;  %v1294_v24 = vrot.slane %v1292_v11, 4  ;;  %v1297_v26 = vrot.slane %v1295_v12, 5 }
  0xec   : > { %7121 = vmatmul.mubr.msk.bf16.gmra.mrb[16].mxu0 %vm943_vm7, %v880_v18  ;;  %v1265_v20 = vsel %vm1248_vm9, %v1256_v16, %v1264_v10  ;;  %v1269_v27 = vrot.slane %v1267_v13, 4  ;;  %v1272_v50 = vrot.slane %v1270_v14, 5  ;;  %v1301_v28 = vshrl.u32 %v8513_v39, 16  ;;  %v1244_v16 = vld [vmem:[#allocation2 + $0x78] sm:$0x1f] }
  0xed   : > { %7126 = vmatprep.mubr.msk.bf16.mxu0 %vm943_vm7, %v1265_v20  ;;  %v1304_v29 = vshll.u32 %v8513_v39, 16  ;;  %v1309_v30 = vshrl.u32 %v1240_v25, 16  ;;  %v1312_v31 = vshll.u32 %v1240_v25, 16  ;;  %v1281_v32 = vor.u32 %v1280_v21, %v1277_v19 }
  0xee   : > { %v1290_v33 = vor.u32 %v1289_v23, %v1286_v49  ;;  %v1318_v34 = vshrl.u32 %v8523_v60, 16  ;;  %v1298_v35 = vor.u32 %v1297_v26, %v1294_v24  ;;  %v1321_v37 = vshll.u32 %v8523_v60, 16 }
  0xef   : > { %v1326_v38 = vshrl.u32 %v1241_v54, 16  ;;  %v1329_v41 = vshll.u32 %v1241_v54, 16  ;;  %v1273_v42 = vor.u32 %v1272_v50, %v1269_v27  ;;  %v1303_v43 = vrot.slane %v1301_v28, 4 }
  0xf0   : > { %v1306_v44 = vrot.slane %v1304_v29, 5  ;;  %v1808_v45 = vsel %vm912_vm2, %v8507_v36, 0  ;;  %v1311_v47 = vrot.slane %v1309_v30, 4  ;;  %v1314_v39 = vrot.slane %v1312_v31, 5 }
  0xf1   : > { %v1282_v48 = vsel %vm1248_vm9, %v1273_v42, %v1281_v32  ;;  %v1320_v51 = vrot.slane %v1318_v34, 4  ;;  %v1299_v60 = vsel %vm1248_vm9, %v1290_v33, %v1298_v35  ;;  %v1323_v55 = vrot.slane %v1321_v37, 5 }
  0xf2   : > { %v1328_v56 = vrot.slane %v1326_v38, 4  ;;  %v1331_v57 = vrot.slane %v1329_v41, 5  ;;  %v1307_v36 = vor.u32 %v1306_v44, %v1303_v43  ;;  %v1335_v59 = vshrl.u32 %v8535_v17, 16  ;;  %v1246_v41 = vld [vmem:[#allocation2 + $0x98] sm:$0x1f] }
  0xf3   : > { %v1315_v61 = vor.u32 %v1314_v39, %v1311_v47  ;;  %v1338_v62 = vshll.u32 %v8535_v17, 16  ;;  %v1343_v63 = vshrl.u32 %v1242_v52, 16  ;;  %v1346_v1 = vshll.u32 %v1242_v52, 16  ;;  %v1586_v44 = vld [vmem:[#allocation2 + $0x10] sm:$0xf8] }
  0xf4   : > { %7127 = vmatmul.mubr.msk.bf16.vlgmr.msra.gmra.mrb[0].mxu0 %vm943_vm7, %v1282_v48  ;;  %v1352_v2 = vshrl.u32 %v8547_v40, 16  ;;  %v1355_v3 = vshll.u32 %v8547_v40, 16  ;;  %v1360_v4 = vshrl.u32 %v1243_v58, 16  ;;  %v1363_v5 = vshll.u32 %v1243_v58, 16  ;;  %v1245_v40 = vld [vmem:[#allocation2 + $0x88] sm:$0x1f] }
  0xf5   : > { %7147 = vmatpush3.bf16.msra.mxu0 %v1808_v45  ;;  %7130 = vmatprep.mubr.msk.bf16.mxu0 %vm943_vm7, %v1299_v60  ;;  %v1324_v6 = vor.u32 %v1323_v55, %v1320_v51  ;;  %v1332_v7 = vor.u32 %v1331_v57, %v1328_v56  ;;  %v1337_v8 = vrot.slane %v1335_v59, 4  ;;  %v1316_v9 = vsel %vm1248_vm9, %v1307_v36, %v1315_v61  ;;  %v1588_v36 = vld [vmem:[#allocation2 + $0x20] sm:$0xf8] }
  0xf6   : > { %7858 = vmatprep.subr.msk.bf16.mxu0 %vm912_vm2, %v8610_v53  ;;  %v1340_v10 = vrot.slane %v1338_v62, 5  ;;  %v1345_v11 = vrot.slane %v1343_v63, 4  ;;  %v1348_v12 = vrot.slane %v1346_v1, 5  ;;  %v1354_v17 = vrot.slane %v1352_v2, 4  ;;  %v8640_v1 = vld [vmem:[#allocation2 + $0x28] sm:$0xf] }
  0xf7   : > { %v1357_v13 = vrot.slane %v1355_v3, 5  ;;  %v1362_v14 = vrot.slane %v1360_v4, 4  ;;  %v1365_v15 = vrot.slane %v1363_v5, 5  ;;  %v1333_v19 = vsel %vm1248_vm9, %v1324_v6, %v1332_v7  ;;  %v1590_v4 = vld [vmem:[#allocation2 + $0x30] sm:$0xf8] }
  0xf8   : > { %v1369_v18 = vshrl.u32 %v8560_v0, 16  ;;  %v1372_v21 = vshll.u32 %v8560_v0, 16  ;;  %v1377_v49 = vshrl.u32 %v1244_v16, 16  ;;  %v1380_v23 = vshll.u32 %v1244_v16, 16  ;;  %v8645_v7 = vld [vmem:[#allocation2 + $0x38] sm:$0xf] }
  0xf9   : > { %v1341_v25 = vor.u32 %v1340_v10, %v1337_v8  ;;  %v1349_v20 = vor.u32 %v1348_v12, %v1345_v11  ;;  %v1358_v24 = vor.u32 %v1357_v13, %v1354_v17  ;;  %v1366_v26 = vor.u32 %v1365_v15, %v1362_v14 }
  0xfa   : > { %v1386_v27 = vshrl.u32 %v8572_v22, 16  ;;  %v1389_v50 = vshll.u32 %v8572_v22, 16  ;;  %v1394_v28 = vshrl.u32 %v1245_v40, 16  ;;  %v1397_v29 = vshll.u32 %v1245_v40, 16  ;;  %v8633_v22 = vld [vmem:[#allocation2 + $0x18] sm:$0xf] }
  0xfb   : > { %v1371_v54 = vrot.slane %v1369_v18, 4  ;;  %v1374_v30 = vrot.slane %v1372_v21, 5  ;;  %v1379_v31 = vrot.slane %v1377_v49, 4  ;;  %v1382_v32 = vrot.slane %v1380_v23, 5 }
  0xfc   : > { %7131 = vmatmul.mubr.msk.bf16.gmra.mrb[4].mxu0 %vm943_vm7, %v1316_v9  ;;  %v1350_v33 = vsel %vm1248_vm9, %v1341_v25, %v1349_v20  ;;  %v1367_v0 = vsel %vm1248_vm9, %v1358_v24, %v1366_v26  ;;  %v1388_v34 = vrot.slane %v1386_v27, 4  ;;  %v1391_v35 = vrot.slane %v1389_v50, 5  ;;  %v1592_v26 = vld [vmem:[#allocation2 + $0x40] sm:$0xf8] }
  0xfd   : > { %7134 = vmatprep.mubr.msk.bf16.mxu0 %vm943_vm7, %v1333_v19  ;;  %v1396_v37 = vrot.slane %v1394_v28, 4  ;;  %v1399_v38 = vrot.slane %v1397_v29, 5  ;;  %v1375_v42 = vor.u32 %v1374_v30, %v1371_v54  ;;  %v1383_v43 = vor.u32 %v1382_v32, %v1379_v31  ;;  %v8654_v29 = vld [vmem:[#allocation2 + $0x48] sm:$0xf]  ;;  %v1594_v54 = vld [vmem:[#allocation2 + $0x50] sm:$0xf8] }
  0xfe   : > { %v1403_v45 = vshrl.u32 %v8583_v46, 16  ;;  %v1406_v47 = vshll.u32 %v8583_v46, 16  ;;  %v1411_v39 = vshrl.u32 %v1246_v41, 16  ;;  %v1414_v48 = vshll.u32 %v1246_v41, 16  ;;  %v8657_v30 = vld [vmem:[#allocation2 + $0x58] sm:$0xf] }
  0xff   : > { %v1392_v51 = vor.u32 %v1391_v35, %v1388_v34  ;;  %v1400_v52 = vor.u32 %v1399_v38, %v1396_v37  ;;  %v1616_v60 = vshrl.u32 %v8633_v22, 16  ;;  %v1619_v55 = vshll.u32 %v8633_v22, 16 }
 0x100   : > { %v1608_v56 = vshrl.u32 %v1586_v44, 16  ;;  %v1384_v57 = vsel %vm1248_vm9, %v1375_v42, %v1383_v43  ;;  %v1611_v58 = vshll.u32 %v1586_v44, 16  ;;  %v1405_v59 = vrot.slane %v1403_v45, 4 }
 0x101   : > { %v1408_v61 = vrot.slane %v1406_v47, 5  ;;  %v1413_v62 = vrot.slane %v1411_v39, 4  ;;  %v1416_v63 = vrot.slane %v1414_v48, 5  ;;  %v1401_v46 = vsel %vm1248_vm9, %v1392_v51, %v1400_v52  ;;  %v1596_v48 = vld [vmem:[#allocation2 + $0x60] sm:$0xf8] }
 0x102   : > { %v1618_v2 = vrot.slane %v1616_v60, 3  ;;  %v1621_v3 = vrot.slane %v1619_v55, 4  ;;  %v1610_v5 = vrot.slane %v1608_v56, 3  ;;  %v1625_v6 = vshrl.u32 %v1588_v36, 16  ;;  %v8666_v51 = vld [vmem:[#allocation4 + $0x14] sm:$0xf] }
 0x103   : > { %v1613_v8 = vrot.slane %v1611_v58, 4  ;;  %v1628_v9 = vshll.u32 %v1588_v36, 16  ;;  %v1633_v10 = vshrl.u32 %v8640_v1, 16  ;;  %v1636_v11 = vshll.u32 %v8640_v1, 16 }
 0x104   : > { %7135 = vmatmul.mubr.msk.bf16.gmra.mrb[8].mxu0 %vm943_vm7, %v1350_v33  ;;  %v1409_v12 = vor.u32 %v1408_v61, %v1405_v59  ;;  %v1417_v17 = vor.u32 %v1416_v63, %v1413_v62  ;;  %v1642_v13 = vshrl.u32 %v1590_v4, 16  ;;  %v1645_v14 = vshll.u32 %v1590_v4, 16  ;;  %v1598_v62 = vld [vmem:[#allocation2 + $0x70] sm:$0xf8] }
 0x105   : > { %7138 = vmatprep.mubr.msk.bf16.mxu0 %vm943_vm7, %v1367_v0  ;;  %v1622_v15 = vor.u32 %v1621_v3, %v1618_v2  ;;  %v1650_v16 = vshrl.u32 %v8645_v7, 16  ;;  %v1653_v19 = vshll.u32 %v8645_v7, 16  ;;  %v1627_v40 = vrot.slane %v1625_v6, 3 }
 0x106   : > { %v1614_v18 = vor.u32 %v1613_v8, %v1610_v5  ;;  %v1630_v21 = vrot.slane %v1628_v9, 4  ;;  %v1635_v49 = vrot.slane %v1633_v10, 3  ;;  %v1638_v23 = vrot.slane %v1636_v11, 4 }
 0x107   : > { %v1418_v25 = vsel %vm1248_vm9, %v1409_v12, %v1417_v17  ;;  %v1644_v20 = vrot.slane %v1642_v13, 3  ;;  %v1647_v24 = vrot.slane %v1645_v14, 4  ;;  %v1652_v50 = vrot.slane %v1650_v16, 3 }
 0x108   : > { %v1623_v27 = vsel %vm710_vm8, %v1614_v18, %v1622_v15  ;;  %v1655_v28 = vrot.slane %v1653_v19, 4  ;;  %v1631_v31 = vor.u32 %v1630_v21, %v1627_v40  ;;  %v1639_v32 = vor.u32 %v1638_v23, %v1635_v49  ;;  %v1600_v18 = vld [vmem:[#allocation2 + $0x80] sm:$0xf8]  ;;  %v638_v21 = vpop.permute.xlu1 %637  ;;  %v636_v49 = vpop.permute.xlu0 %635 }
 0x109   : > { %v1659_v33 = vshrl.u32 %v1592_v26, 16  ;;  %v1662_v0 = vshll.u32 %v1592_v26, 16  ;;  %v1648_v34 = vor.u32 %v1647_v24, %v1644_v20  ;;  %v1667_v35 = vshrl.u32 %v8654_v29, 16  ;;  %v8684_v24 = vld [vmem:[#allocation2 + $0x88] sm:$0xf] }
 0x10a   : > { %v1670_v37 = vshll.u32 %v8654_v29, 16  ;;  %v1676_v38 = vshrl.u32 %v1594_v54, 16  ;;  %v1656_v41 = vor.u32 %v1655_v28, %v1652_v50  ;;  %v1679_v42 = vshll.u32 %v1594_v54, 16  ;;  %v1602_v26 = vld [vmem:[#allocation2 + $0x90] sm:$0xf8] }
 0x10b   : > { %v1684_v43 = vshrl.u32 %v8657_v30, 16  ;;  %v1687_v44 = vshll.u32 %v8657_v30, 16  ;;  %v1640_v45 = vsel %vm710_vm8, %v1631_v31, %v1639_v32  ;;  %v2035_v47 = vsel %vm912_vm2, %v8610_v53, 0  ;;  %v8673_v53 = vld [vmem:[#allocation2 + $0x78] sm:$0xf] }
 0x10c   : > { %7139 = vmatmul.mubr.msk.bf16.gmra.mrb[12].mxu0 %vm943_vm7, %v1384_v57  ;;  %v1661_v39 = vrot.slane %v1659_v33, 3  ;;  %v1664_v52 = vrot.slane %v1662_v0, 4  ;;  %v1669_v60 = vrot.slane %v1667_v35, 3  ;;  %v1672_v55 = vrot.slane %v1670_v37, 4  ;;  %v8668_v57 = vld [vmem:[#allocation2 + $0x68] sm:$0xf] }
 0x10d   : > { %7142 = vmatprep.mubr.msk.bf16.mxu0 %vm943_vm7, %v1401_v46  ;;  %v1678_v56 = vrot.slane %v1676_v38, 3  ;;  %v1657_v58 = vsel %vm710_vm8, %v1648_v34, %v1656_v41  ;;  %v1681_v36 = vrot.slane %v1679_v42, 4  ;;  %v1686_v59 = vrot.slane %v1684_v43, 3  ;;  %688 = vst.msk [vmem:[#allocation2 + $0xb8] sm:$0xf] %vm665_vm6, %v638_v21 }
 0x10e   : > { %v1689_v61 = vrot.slane %v1687_v44, 4  ;;  %v1693_v63 = vshrl.u32 %v1596_v48, 16  ;;  %v1696_v46 = vshll.u32 %v1596_v48, 16  ;;  %v1701_v2 = vshrl.u32 %v8668_v57, 16  ;;  %687 = vst.msk [vmem:[#allocation2 + $0xb0] sm:$0xf0] %vm663_vm5, %v636_v49 }
 0x10f   : > { %v1704_v3 = vshll.u32 %v8668_v57, 16  ;;  %v1665_v4 = vor.u32 %v1664_v52, %v1661_v39  ;;  %v1673_v5 = vor.u32 %v1672_v55, %v1669_v60  ;;  %v1710_v6 = vshrl.u32 %v1598_v62, 16  ;;  %v1604_v44 = vld [vmem:[#allocation2 + $0xa0] sm:$0xf8] }
 0x110   : > { %v1713_v8 = vshll.u32 %v1598_v62, 16  ;;  %v1682_v9 = vor.u32 %v1681_v36, %v1678_v56  ;;  %v1690_v10 = vor.u32 %v1689_v61, %v1686_v59  ;;  %v1718_v11 = vshrl.u32 %v8673_v53, 16 }
 0x111   : > { %v1721_v12 = vshll.u32 %v8673_v53, 16  ;;  %v1695_v17 = vrot.slane %v1693_v63, 3  ;;  %v1698_v13 = vrot.slane %v1696_v46, 4  ;;  %v1703_v14 = vrot.slane %v1701_v2, 3 }
 0x112   : > { %v1706_v15 = vrot.slane %v1704_v3, 4  ;;  %v1674_v16 = vsel %vm710_vm8, %v1665_v4, %v1673_v5  ;;  %v1712_v19 = vrot.slane %v1710_v6, 3  ;;  %v1715_v40 = vrot.slane %v1713_v8, 4 }
 0x113   : > { %v1691_v23 = vsel %vm710_vm8, %v1682_v9, %v1690_v10  ;;  %v1723_v20 = vrot.slane %v1721_v12, 4  ;;  %v1699_v50 = vor.u32 %v1698_v13, %v1695_v17  ;;  %v1727_v54 = vshrl.u32 %v1600_v18, 16  ;;  %v1943_v17 = vld [vmem:[#allocation2 + $0x10] sm:$0xf0] }
 0x114   : > { %7143 = vmatmul.mubr.msk.bf16.gmra.mrb[16].mxu0 %vm943_vm7, %v1418_v25  ;;  %v1720_v25 = vrot.slane %v1718_v11, 3  ;;  %v1707_v28 = vor.u32 %v1706_v15, %v1703_v14  ;;  %v1730_v31 = vshll.u32 %v1600_v18, 16  ;;  %v1716_v32 = vor.u32 %v1715_v40, %v1712_v19  ;;  %v8711_v19 = vld [vmem:[#allocation2 + $0x20] sm:$0xf0]  ;;  %v8714_v40 = vld [vmem:[#allocation2 + $0x30] sm:$0xf0] }
 0x115   : > { %7148 = vmatprep.mubr.msk.bf16.mxu0 %vm943_vm7, %v1623_v27  ;;  %v8689_v27 = vld [vmem:[#allocation2 + $0x98] sm:$0xf]  ;;  %v1735_v33 = vshrl.u32 %v8684_v24, 16  ;;  %v1738_v0 = vshll.u32 %v8684_v24, 16  ;;  %v1744_v34 = vshrl.u32 %v1602_v26, 16  ;;  %v1747_v37 = vshll.u32 %v1602_v26, 16 }
 0x116   : > { %v1724_v35 = vor.u32 %v1723_v20, %v1720_v25  ;;  %v1752_v38 = vshrl.u32 %v8689_v27, 16  ;;  %v1755_v41 = vshll.u32 %v8689_v27, 16  ;;  %v1708_v42 = vsel %vm710_vm8, %v1699_v50, %v1707_v28  ;;  %v8723_v20 = vld [vmem:[#allocation4 + $0x18] sm:$0xf]  ;;  %v8727_v50 = vld [vmem:[#allocation2 + $0x40] sm:$0xf0] }
 0x117   : > { %v1729_v43 = vrot.slane %v1727_v54, 3  ;;  %v1737_v39 = vrot.slane %v1735_v33, 3  ;;  %v1740_v48 = vrot.slane %v1738_v0, 4  ;;  %v1746_v52 = vrot.slane %v1744_v34, 3  ;;  %v8741_v33 = vld [vmem:[#allocation2 + $0x60] sm:$0xf0] }
 0x118   : > { %v1725_v60 = vsel %vm710_vm8, %v1716_v32, %v1724_v35  ;;  %v1749_v55 = vrot.slane %v1747_v37, 4  ;;  %v1754_v56 = vrot.slane %v1752_v38, 3  ;;  %v1761_v36 = vshrl.u32 %v1604_v44, 16  ;;  %v8744_v0 = vld [vmem:[#allocation2 + $0x70] sm:$0xf0] }
 0x119   : > { %v1764_v59 = vshll.u32 %v1604_v44, 16  ;;  %v1741_v46 = vor.u32 %v1740_v48, %v1737_v39  ;;  %v1975_v13 = vrot.slane %v8633_v22, 4  ;;  %v1974_v15 = vrot.slane %v1943_v17, 4 }
 0x11a   : > { %v1750_v2 = vor.u32 %v1749_v55, %v1746_v52  ;;  %v1763_v4 = vrot.slane %v1761_v36, 3  ;;  %v1977_v18 = vrot.slane %v8711_v19, 4  ;;  %v1978_v21 = vrot.slane %v8640_v1, 4  ;;  %v8730_v1 = vld [vmem:[#allocation2 + $0x50] sm:$0xf0] }
 0x11b   : > { %v1766_v5 = vrot.slane %v1764_v59, 4  ;;  %v1980_v49 = vrot.slane %v8714_v40, 4  ;;  %v1981_v22 = vrot.slane %v8645_v7, 4  ;;  %v1983_v7 = vrot.slane %v8727_v50, 4  ;;  %v2171_v36 = vld [vmem:[#allocation2 + $0x28] sm:$0x1f] }
 0x11c   : > { %7149 = vmatmul.mubr.msk.bf16.vlgmr.msra.gmra.mrb[0].mxu0 %vm943_vm7, %v1640_v45  ;;  %v8696_v45 = vld [vmem:[#allocation2 + $0xa8] sm:$0xf]  ;;  %v1979_v25 = vsel %vm912_vm2, %v1977_v18, %v1978_v21  ;;  %v1986_v28 = vrot.slane %v8730_v1, 4  ;;  %v1987_v54 = vrot.slane %v8657_v30, 4  ;;  %v1989_v34 = vrot.slane %v8741_v33, 4 }
 0x11d   : > { %7169 = vmatpush3.bf16.msra.mxu0 %v2035_v47  ;;  %7152 = vmatprep.mubr.msk.bf16.mxu0 %vm943_vm7, %v1657_v58  ;;  %v1732_v47 = vrot.slane %v1730_v31, 4  ;;  %v1757_v58 = vrot.slane %v1755_v41, 4  ;;  %v1769_v61 = vshrl.u32 %v8696_v45, 16  ;;  %v1772_v62 = vshll.u32 %v8696_v45, 16  ;;  %v8753_v41 = vld [vmem:[#allocation2 + $0x80] sm:$0xf0] }
 0x11e   : > { %7859 = vmatprep.subr.msk.bf16.mxu0 %vm912_vm2, %v8666_v51  ;;  %v1767_v11 = vor.u32 %v1766_v5, %v1763_v4  ;;  %v1982_v26 = vsel %vm912_vm2, %v1980_v49, %v1981_v22  ;;  %v1988_v32 = vsel %vm912_vm2, %v1986_v28, %v1987_v54  ;;  %v1992_v35 = vrot.slane %v8744_v0, 4  ;;  %v2173_v22 = vld [vmem:[#allocation2 + $0x48] sm:$0x1f] }
 0x11f   : > { %v1733_v63 = vor.u32 %v1732_v47, %v1729_v43  ;;  %v1758_v3 = vor.u32 %v1757_v58, %v1754_v56  ;;  %v1771_v6 = vrot.slane %v1769_v61, 3  ;;  %v1774_v8 = vrot.slane %v1772_v62, 4  ;;  %v8756_v43 = vld [vmem:[#allocation2 + $0x90] sm:$0xf0]  ;;  %v8765_v61 = vld [vmem:[#allocation2 + $0xa0] sm:$0xf0] }
 0x120   : > { %v1993_v30 = vrot.slane %v8673_v53, 4  ;;  %v1995_v44 = vrot.slane %v8753_v41, 4  ;;  %v1998_v53 = vrot.slane %v8756_v43, 4  ;;  %v1999_v48 = vrot.slane %v8689_v27, 4 }
 0x121   : > { %v1742_v9 = vsel %vm710_vm8, %v1733_v63, %v1741_v46  ;;  %v1759_v10 = vsel %vm710_vm8, %v1750_v2, %v1758_v3  ;;  %v1775_v12 = vor.u32 %v1774_v8, %v1771_v6  ;;  %v2182_v52 = vshrl.u32 %v1943_v17, 16  ;;  %v2172_v63 = vld [vmem:[#allocation2 + $0x38] sm:$0x1f] }
 0x122   : > { %v1994_v38 = vsel %vm912_vm2, %v1992_v35, %v1993_v30  ;;  %v2000_v59 = vsel %vm912_vm2, %v1998_v53, %v1999_v48  ;;  %v2199_v27 = vshrl.u32 %v8711_v19, 16  ;;  %v2202_v46 = vshll.u32 %v8711_v19, 16  ;;  %v8785_v53 = vld [vmem:[#allocation4 + $0x1c] sm:$0xf] }
 0x123   : > { %v1776_v14 = vsel %vm710_vm8, %v1767_v11, %v1775_v12  ;;  %v2207_v2 = vshrl.u32 %v2171_v36, 16  ;;  %v2210_v3 = vshll.u32 %v2171_v36, 16  ;;  %v2001_v4 = vrot.slane %v8765_v61, 4 }
 0x124   : > { %7153 = vmatmul.mubr.msk.bf16.gmra.mrb[4].mxu0 %vm943_vm7, %v1674_v16  ;;  %v1976_v16 = vsel %vm912_vm2, %v1974_v15, %v1975_v13  ;;  %v2002_v5 = vrot.slane %v8696_v45, 4  ;;  %v2216_v8 = vshrl.u32 %v8714_v40, 16  ;;  %v2227_v11 = vshll.u32 %v2172_v63, 16 }
 0x125   : > { %7156 = vmatprep.mubr.msk.bf16.mxu0 %vm943_vm7, %v1691_v23  ;;  %v2382_v23 = vsel %vm912_vm2, %v8666_v51, 0  ;;  %v1984_v51 = vrot.slane %v8654_v29, 4  ;;  %v1990_v29 = vrot.slane %v8668_v57, 4  ;;  %v1996_v57 = vrot.slane %v8684_v24, 4 }
 0x126   : > { %v2184_v24 = vrot.slane %v2182_v52, 4  ;;  %v2204_v13 = vrot.slane %v2202_v46, 5  ;;  %v2212_v15 = vrot.slane %v2210_v3, 5  ;;  %v2218_v18 = vrot.slane %v2216_v8, 4 }
 0x127   : > { %v1985_v31 = vsel %vm912_vm2, %v1983_v7, %v1984_v51  ;;  %v1991_v37 = vsel %vm912_vm2, %v1989_v34, %v1990_v29  ;;  %v1997_v55 = vsel %vm912_vm2, %v1995_v44, %v1996_v57  ;;  %v2229_v49 = vrot.slane %v2227_v11, 5  ;;  %v2175_v44 = vld [vmem:[#allocation2 + $0x68] sm:$0x1f] }
 0x128   : > { %v2236_v7 = vshll.u32 %v8727_v50, 16  ;;  %v2241_v51 = vshrl.u32 %v2173_v22, 16  ;;  %v2244_v28 = vshll.u32 %v2173_v22, 16  ;;  %v2250_v54 = vshrl.u32 %v8730_v1, 16 }
 0x12a   : > { %v2243_v57 = vrot.slane %v2241_v51, 4  ;;  %v2179_v51 = vld [vmem:[#allocation2 + $0xa8] sm:$0x1f] }
 0x12c   : > { %7157 = vmatmul.mubr.msk.bf16.gmra.mrb[8].mxu0 %vm943_vm7, %v1708_v42  ;;  %v2170_v42 = vld [vmem:[#allocation2 + $0x18] sm:$0x1f] }
 0x12d   : > { %7160 = vmatprep.mubr.msk.bf16.mxu0 %vm943_vm7, %v1725_v60  ;;  %v2190_v47 = vshrl.u32 %v2170_v42, 16  ;;  %v2193_v39 = vshll.u32 %v2170_v42, 16  ;;  %v2185_v60 = vshll.u32 %v1943_v17, 16  ;;  %v2201_v17 = vrot.slane %v2199_v27, 4 }
 0x12e   : > { %v2238_v42 = vrot.slane %v2236_v7, 5  ;;  %v2287_v27 = vshll.u32 %v8744_v0, 16 }
 0x12f   : > { %v2192_v56 = vrot.slane %v2190_v47, 4  ;;  %v2195_v58 = vrot.slane %v2193_v39, 5  ;;  %v2187_v62 = vrot.slane %v2185_v60, 5  ;;  %v2252_v47 = vrot.slane %v2250_v54, 4  ;;  %v2176_v60 = vld [vmem:[#allocation2 + $0x78] sm:$0x1f] }
 0x130   : > { %v2292_v46 = vshrl.u32 %v2176_v60, 16 }
 0x131   : > { %v2196_v6 = vor.u32 %v2195_v58, %v2192_v56  ;;  %v2188_v12 = vor.u32 %v2187_v62, %v2184_v24  ;;  %v2275_v56 = vshrl.u32 %v2175_v44, 16  ;;  %v2278_v58 = vshll.u32 %v2175_v44, 16 }
 0x132   : > { %v2284_v62 = vshrl.u32 %v8744_v0, 16  ;;  %v2294_v11 = vrot.slane %v2292_v46, 4  ;;  %v2178_v0 = vld [vmem:[#allocation2 + $0x98] sm:$0x1f] }
 0x133   : > { %v2197_v19 = vsel %vm1248_vm9, %v2188_v12, %v2196_v6  ;;  %v2280_v6 = vrot.slane %v2278_v58, 5  ;;  %v2520_v58 = vld [vmem:[#allocation2 + $0x30] sm:$0xf8] }
 0x134   : > { %7161 = vmatmul.mubr.msk.bf16.gmra.mrb[12].mxu0 %vm943_vm7, %v1742_v9  ;;  %v2219_v9 = vshll.u32 %v8714_v40, 16  ;;  %v2174_v40 = vld [vmem:[#allocation2 + $0x58] sm:$0x1f]  ;;  %v2286_v8 = vrot.slane %v2284_v62, 4 }
 0x135   : > { %7164 = vmatprep.mubr.msk.bf16.mxu0 %vm943_vm7, %v1759_v10  ;;  %v2224_v10 = vshrl.u32 %v2172_v63, 16  ;;  %v2258_v29 = vshrl.u32 %v2174_v40, 16  ;;  %v2261_v35 = vshll.u32 %v2174_v40, 16  ;;  %v2326_v40 = vshrl.u32 %v2178_v0, 16 }
 0x136   : > { %v2221_v45 = vrot.slane %v2219_v9, 5 }
 0x137   : > { %v2226_v21 = vrot.slane %v2224_v10, 4  ;;  %v2260_v48 = vrot.slane %v2258_v29, 4  ;;  %v2263_v52 = vrot.slane %v2261_v35, 5  ;;  %v2289_v10 = vrot.slane %v2287_v27, 5 }
 0x138   : > { %v2335_v35 = vshrl.u32 %v8765_v61, 16 }
 0x139   : > { %v2230_v34 = vor.u32 %v2229_v49, %v2226_v21  ;;  %v2264_v63 = vor.u32 %v2263_v52, %v2260_v48  ;;  %v2321_v21 = vshll.u32 %v8756_v43, 16  ;;  %v2290_v49 = vor.u32 %v2289_v10, %v2286_v8 }
 0x13c   : > { %7165 = vmatmul.mubr.msk.bf16.gmra.mrb[16].mxu0 %vm943_vm7, %v1776_v14  ;;  %v2209_v14 = vrot.slane %v2207_v2, 4  ;;  %v2295_v2 = vshll.u32 %v2176_v60, 16  ;;  %v2337_v60 = vrot.slane %v2335_v35, 4 }
 0x13d   : > { %7170 = vmatprep.mubr.msk.bf16.mxu0 %vm943_vm7, %v1976_v16  ;;  %v2003_v16 = vsel %vm912_vm2, %v2001_v4, %v2002_v5  ;;  %v2277_v5 = vrot.slane %v2275_v56, 4 }
 0x13e   : > { %v2297_v12 = vrot.slane %v2295_v2, 5  ;;  %v8819_v2 = vld [vmem:[#allocation2 + $0x48] sm:$0xf] }
 0x140   : > { %v2298_v22 = vor.u32 %v2297_v12, %v2294_v11  ;;  %v2582_v11 = vshrl.u32 %v8819_v2, 16  ;;  %v2585_v12 = vshll.u32 %v8819_v2, 16 }
 0x144   : > { %7171 = vmatmul.mubr.msk.bf16.vlgmr.msra.gmra.mrb[0].mxu0 %vm943_vm7, %v1979_v25  ;;  %v2213_v25 = vor.u32 %v2212_v15, %v2209_v14  ;;  %v2281_v14 = vor.u32 %v2280_v6, %v2277_v5  ;;  %v2301_v15 = vshrl.u32 %v8753_v41, 16  ;;  %v2557_v5 = vshrl.u32 %v2520_v58, 16 }
 0x145   : > { %7191 = vmatpush3.bf16.msra.mxu0 %v2382_v23  ;;  %7174 = vmatprep.mubr.msk.bf16.mxu0 %vm943_vm7, %v1982_v26  ;;  %v2205_v23 = vor.u32 %v2204_v13, %v2201_v17  ;;  %v2233_v26 = vshrl.u32 %v8727_v50, 16  ;;  %v2246_v50 = vrot.slane %v2244_v28, 5  ;;  %v2177_v17 = vld [vmem:[#allocation2 + $0x88] sm:$0x1f]  ;;  %v2560_v6 = vshll.u32 %v2520_v58, 16 }
 0x146   : > { %7860 = vmatprep.subr.msk.bf16.mxu0 %vm912_vm2, %v8723_v20 }
 0x147   : > { %v2214_v30 = vsel %vm1248_vm9, %v2205_v23, %v2213_v25  ;;  %v2329_v23 = vshll.u32 %v2178_v0, 16 }
 0x149   : > { %v2331_v29 = vrot.slane %v2329_v23, 5 }
 0x14c   : > { %7175 = vmatmul.mubr.msk.bf16.gmra.mrb[4].mxu0 %vm943_vm7, %v1985_v31  ;;  %v2253_v31 = vshll.u32 %v8730_v1, 16 }
 0x14d   : > { %7178 = vmatprep.mubr.msk.bf16.mxu0 %vm943_vm7, %v1988_v32  ;;  %v2222_v32 = vor.u32 %v2221_v45, %v2218_v18  ;;  %v2312_v18 = vshll.u32 %v2177_v17, 16  ;;  %v2318_v45 = vshrl.u32 %v8756_v43, 16  ;;  %v2518_v43 = vld [vmem:[#allocation2 + $0x20] sm:$0xf8] }
 0x14e   : > { %v2255_v39 = vrot.slane %v2253_v31, 5 }
 0x14f   : > { %v2231_v1 = vsel %vm1248_vm9, %v2222_v32, %v2230_v34  ;;  %v2314_v54 = vrot.slane %v2312_v18, 5  ;;  %v2320_v31 = vrot.slane %v2318_v45, 4  ;;  %v2323_v32 = vrot.slane %v2321_v21, 5  ;;  %v2524_v18 = vld [vmem:[#allocation2 + $0x50] sm:$0xf8] }
 0x150   : > { %v2256_v24 = vor.u32 %v2255_v39, %v2252_v47  ;;  %v2328_v34 = vrot.slane %v2326_v40, 4  ;;  %v2540_v47 = vshrl.u32 %v2518_v43, 16  ;;  %v8827_v40 = vld [vmem:[#allocation2 + $0x58] sm:$0xf] }
 0x152   : > { %v2265_v9 = vsel %vm1248_vm9, %v2256_v24, %v2264_v63  ;;  %v2332_v39 = vor.u32 %v2331_v29, %v2328_v34  ;;  %v2522_v24 = vld [vmem:[#allocation2 + $0x40] sm:$0xf8] }
 0x153   : > { %v2577_v10 = vshll.u32 %v2522_v24, 16 }
 0x154   : > { %7179 = vmatmul.mubr.msk.bf16.gmra.mrb[8].mxu0 %vm943_vm7, %v1991_v37  ;;  %v2740_v37 = vsel %vm912_vm2, %v8723_v20, 0  ;;  %v2267_v20 = vshrl.u32 %v8741_v33, 16 }
 0x155   : > { %7182 = vmatprep.mubr.msk.bf16.mxu0 %vm943_vm7, %v1994_v38  ;;  %v2235_v38 = vrot.slane %v2233_v26, 4  ;;  %v2303_v26 = vrot.slane %v2301_v15, 4  ;;  %v2562_v15 = vrot.slane %v2560_v6, 4  ;;  %v2579_v21 = vrot.slane %v2577_v10, 4 }
 0x156   : > { %v2269_v3 = vrot.slane %v2267_v20, 4 }
 0x157   : > { %v2239_v36 = vor.u32 %v2238_v42, %v2235_v38  ;;  %v2346_v38 = vshll.u32 %v2179_v51, 16  ;;  %v8810_v42 = vld [vmem:[#allocation2 + $0x28] sm:$0xf] }
 0x158   : > { %v2548_v48 = vshrl.u32 %v8810_v42, 16  ;;  %v2551_v52 = vshll.u32 %v8810_v42, 16 }
 0x159   : > { %v2348_v56 = vrot.slane %v2346_v38, 5 }
 0x15a   : > { %v2550_v27 = vrot.slane %v2548_v48, 3  ;;  %v2553_v46 = vrot.slane %v2551_v52, 4  ;;  %v8842_v48 = vld [vmem:[#allocation2 + $0x78] sm:$0xf]  ;;  %v2530_v52 = vld [vmem:[#allocation2 + $0x80] sm:$0xf8] }
 0x15c   : > { %7183 = vmatmul.mubr.msk.bf16.gmra.mrb[12].mxu0 %vm943_vm7, %v1997_v55  ;;  %v2270_v55 = vshll.u32 %v8741_v33, 16  ;;  %v2554_v0 = vor.u32 %v2553_v46, %v2550_v27  ;;  %v2636_v27 = vshll.u32 %v8842_v48, 16  ;;  %v2642_v46 = vshrl.u32 %v2530_v52, 16 }
 0x15d   : > { %7186 = vmatprep.mubr.msk.bf16.mxu0 %vm943_vm7, %v2000_v59  ;;  %v2247_v59 = vor.u32 %v2246_v50, %v2243_v57  ;;  %v2324_v50 = vor.u32 %v2323_v32, %v2320_v31 }
 0x15e   : > { %v2272_v4 = vrot.slane %v2270_v55, 5 }
 0x15f   : > { %v2248_v33 = vsel %vm1248_vm9, %v2239_v36, %v2247_v59  ;;  %v2542_v36 = vrot.slane %v2540_v47, 3  ;;  %v8815_v59 = vld [vmem:[#allocation2 + $0x38] sm:$0xf]  ;;  %v2333_v62 = vsel %vm1248_vm9, %v2324_v50, %v2332_v39  ;;  %v2528_v47 = vld [vmem:[#allocation2 + $0x70] sm:$0xf8] }
 0x160   : > { %v2273_v13 = vor.u32 %v2272_v4, %v2269_v3  ;;  %v2568_v8 = vshll.u32 %v8815_v59, 16 }
 0x162   : > { %v2282_v25 = vsel %vm1248_vm9, %v2273_v13, %v2281_v14  ;;  %v2559_v14 = vrot.slane %v2557_v5, 3 }
 0x164   : > { %7187 = vmatmul.mubr.msk.bf16.gmra.mrb[16].mxu0 %vm943_vm7, %v2003_v16  ;;  %v2304_v16 = vshll.u32 %v8753_v41, 16  ;;  %v2299_v41 = vsel %vm1248_vm9, %v2290_v49, %v2298_v22  ;;  %v2584_v49 = vrot.slane %v2582_v11, 3  ;;  %v2587_v22 = vrot.slane %v2585_v12, 4 }
 0x165   : > { %7192 = vmatprep.mubr.msk.bf16.mxu0 %vm943_vm7, %v2197_v19  ;;  %v2309_v19 = vshrl.u32 %v2177_v17, 16  ;;  %v2563_v31 = vor.u32 %v2562_v15, %v2559_v14  ;;  %v2638_v12 = vrot.slane %v2636_v27, 4 }
 0x166   : > { %v2306_v7 = vrot.slane %v2304_v16, 5  ;;  %v2588_v34 = vor.u32 %v2587_v22, %v2584_v49  ;;  %v2534_v49 = vld [vmem:[#allocation2 + $0xa0] sm:$0xf8]  ;;  %v8868_v22 = vld [vmem:[#allocation2 + $0xa8] sm:$0xf] }
 0x167   : > { %v2311_v28 = vrot.slane %v2309_v19, 4  ;;  %v2570_v19 = vrot.slane %v2568_v8, 4 }
 0x168   : > { %v2307_v44 = vor.u32 %v2306_v7, %v2303_v26  ;;  %v2594_v26 = vshll.u32 %v2524_v18, 16  ;;  %v2526_v7 = vld [vmem:[#allocation2 + $0x60] sm:$0xf8] }
 0x169   : > { %v2315_v57 = vor.u32 %v2314_v54, %v2311_v28  ;;  %v2599_v28 = vshrl.u32 %v8827_v40, 16  ;;  %v2602_v54 = vshll.u32 %v8827_v40, 16  ;;  %v2608_v29 = vshrl.u32 %v2526_v7, 16 }
 0x16a   : > { %v2596_v38 = vrot.slane %v2594_v26, 4 }
 0x16b   : > { %v2604_v50 = vrot.slane %v2602_v54, 4 }
 0x16c   : > { %7193 = vmatmul.mubr.msk.bf16.vlgmr.msra.gmra.mrb[0].mxu0 %vm943_vm7, %v2214_v30  ;;  %v2338_v30 = vshll.u32 %v8765_v61, 16  ;;  %v2316_v61 = vsel %vm1248_vm9, %v2307_v44, %v2315_v57  ;;  %v2967_v44 = vsel %vm912_vm2, %v8785_v53, 0  ;;  %v2601_v57 = vrot.slane %v2599_v28, 3 }
 0x16d   : > { %7213 = vmatpush3.bf16.msra.mxu0 %v2740_v37  ;;  %7196 = vmatprep.mubr.msk.bf16.mxu0 %vm943_vm7, %v2231_v1  ;;  %v2343_v37 = vshrl.u32 %v2179_v51, 16  ;;  %v2543_v1 = vshll.u32 %v2518_v43, 16  ;;  %v8832_v51 = vld [vmem:[#allocation2 + $0x68] sm:$0xf]  ;;  %v2611_v43 = vshll.u32 %v2526_v7, 16 }
 0x16e   : > { %7861 = vmatprep.subr.msk.bf16.mxu0 %vm912_vm2, %v8785_v53  ;;  %v2340_v20 = vrot.slane %v2338_v30, 5  ;;  %v2616_v35 = vshrl.u32 %v8832_v51, 16  ;;  %v2619_v30 = vshll.u32 %v8832_v51, 16 }
 0x16f   : > { %v2345_v55 = vrot.slane %v2343_v37, 4  ;;  %v2545_v63 = vrot.slane %v2543_v1, 4 }
 0x170   : > { %v2341_v3 = vor.u32 %v2340_v20, %v2337_v60  ;;  %v8844_v60 = vld [vmem:[#allocation4 + $0x20] sm:$0xf]  ;;  %v2610_v20 = vrot.slane %v2608_v29, 3  ;;  %v2621_v58 = vrot.slane %v2619_v30, 4  ;;  %v2679_v29 = vshll.u32 %v2534_v49, 16 }
 0x171   : > { %v2349_v4 = vor.u32 %v2348_v56, %v2345_v55  ;;  %v2546_v17 = vor.u32 %v2545_v63, %v2542_v36  ;;  %v2613_v55 = vrot.slane %v2611_v43, 4  ;;  %v2618_v56 = vrot.slane %v2616_v35, 3 }
 0x172   : > { %v2625_v36 = vshrl.u32 %v2528_v47, 16  ;;  %v2633_v63 = vshrl.u32 %v8842_v48, 16  ;;  %v2684_v43 = vshrl.u32 %v8868_v22, 16  ;;  %v2687_v35 = vshll.u32 %v8868_v22, 16 }
 0x173   : > { %v2350_v13 = vsel %vm1248_vm9, %v2341_v3, %v2349_v4  ;;  %v2555_v23 = vsel %vm710_vm8, %v2546_v17, %v2554_v0  ;;  %v2645_v3 = vshll.u32 %v2530_v52, 16  ;;  %v2614_v6 = vor.u32 %v2613_v55, %v2610_v20  ;;  %v2532_v17 = vld [vmem:[#allocation2 + $0x90] sm:$0xf8] }
 0x174   : > { %7197 = vmatmul.mubr.msk.bf16.gmra.mrb[4].mxu0 %vm943_vm7, %v2248_v33  ;;  %v2565_v33 = vshrl.u32 %v8815_v59, 16  ;;  %v2627_v8 = vrot.slane %v2625_v36, 3  ;;  %v2635_v11 = vrot.slane %v2633_v63, 3  ;;  %v2659_v7 = vshrl.u32 %v2532_v17, 16 }
 0x175   : > { %7200 = vmatprep.mubr.msk.bf16.mxu0 %vm943_vm7, %v2265_v9  ;;  %v2574_v9 = vshrl.u32 %v2522_v24, 16  ;;  %v2605_v24 = vor.u32 %v2604_v50, %v2601_v57  ;;  %v2647_v14 = vrot.slane %v2645_v3, 4  ;;  %v2662_v28 = vshll.u32 %v2532_v17, 16 }
 0x176   : > { %v2567_v16 = vrot.slane %v2565_v33, 3  ;;  %v2622_v33 = vor.u32 %v2621_v58, %v2618_v56  ;;  %v2639_v26 = vor.u32 %v2638_v12, %v2635_v11  ;;  %v2681_v55 = vrot.slane %v2679_v29, 4 }
 0x177   : > { %v2576_v45 = vrot.slane %v2574_v9, 3  ;;  %v2686_v56 = vrot.slane %v2684_v43, 3  ;;  %v2689_v58 = vrot.slane %v2687_v35, 4  ;;  %v2910_v29 = vrot.slane %v8815_v59, 4 }
 0x178   : > { %v2571_v32 = vor.u32 %v2570_v19, %v2567_v16  ;;  %v2913_v35 = vrot.slane %v8819_v2, 4  ;;  %v8942_v2 = vld [vmem:[#allocation2 + $0x60] sm:$0xf0] }
 0x17a   : > { %v2572_v39 = vsel %vm710_vm8, %v2563_v31, %v2571_v32 }
 0x17c   : > { %7201 = vmatmul.mubr.msk.bf16.gmra.mrb[8].mxu0 %vm943_vm7, %v2282_v25  ;;  %v2591_v25 = vshrl.u32 %v2524_v18, 16  ;;  %v2623_v18 = vsel %vm710_vm8, %v2614_v6, %v2622_v33 }
 0x17d   : > { %7204 = vmatprep.mubr.msk.bf16.mxu0 %vm943_vm7, %v2299_v41  ;;  %v2580_v41 = vor.u32 %v2579_v21, %v2576_v45  ;;  %v8863_v45 = vld [vmem:[#allocation2 + $0x98] sm:$0xf] }
 0x17e   : > { %v2593_v37 = vrot.slane %v2591_v25, 3  ;;  %v2667_v32 = vshrl.u32 %v8863_v45, 16 }
 0x17f   : > { %v2589_v1 = vsel %vm710_vm8, %v2580_v41, %v2588_v34  ;;  %v2670_v41 = vshll.u32 %v8863_v45, 16  ;;  %v2676_v34 = vshrl.u32 %v2534_v49, 16 }
 0x180   : > { %v2597_v53 = vor.u32 %v2596_v38, %v2593_v37  ;;  %v2661_v37 = vrot.slane %v2659_v7, 3  ;;  %v2536_v38 = vld [vmem:[#allocation2 + $0xb0] sm:$0xf8] }
 0x181   : > { %v2678_v20 = vrot.slane %v2676_v34, 3  ;;  %v2693_v36 = vshrl.u32 %v2536_v38, 16 }
 0x182   : > { %v2606_v9 = vsel %vm710_vm8, %v2597_v53, %v2605_v24  ;;  %v2696_v24 = vshll.u32 %v2536_v38, 16 }
 0x183   : > { %v2695_v6 = vrot.slane %v2693_v36, 3 }
 0x184   : > { %7205 = vmatmul.mubr.msk.bf16.gmra.mrb[12].mxu0 %vm943_vm7, %v2316_v61  ;;  %v8847_v61 = vld [vmem:[#allocation2 + $0x88] sm:$0xf]  ;;  %v2698_v33 = vrot.slane %v2696_v24, 4  ;;  %v8953_v24 = vld [vmem:[#allocation2 + $0x70] sm:$0xf0] }
 0x185   : > { %7208 = vmatprep.mubr.msk.bf16.mxu0 %vm943_vm7, %v2333_v62  ;;  %v2628_v62 = vshll.u32 %v2528_v47, 16  ;;  %v2650_v4 = vshrl.u32 %v8847_v61, 16  ;;  %v2653_v5 = vshll.u32 %v8847_v61, 16  ;;  %v2664_v47 = vrot.slane %v2662_v28, 4 }
 0x187   : > { %v2630_v10 = vrot.slane %v2628_v62, 4  ;;  %v2652_v15 = vrot.slane %v2650_v4, 3  ;;  %v2655_v16 = vrot.slane %v2653_v5, 4  ;;  %v2682_v4 = vor.u32 %v2681_v55, %v2678_v20 }
 0x188   : > { %v2690_v5 = vor.u32 %v2689_v58, %v2686_v56  ;;  %v2916_v20 = vrot.slane %v8827_v40, 4  ;;  %v2918_v55 = vrot.slane %v8942_v2, 4  ;;  %v2919_v56 = vrot.slane %v8832_v51, 4 }
 0x189   : > { %v2631_v25 = vor.u32 %v2630_v10, %v2627_v8  ;;  %v2656_v31 = vor.u32 %v2655_v16, %v2652_v15  ;;  %v8902_v16 = vld [vmem:[#allocation2 + $0x20] sm:$0xf0]  ;;  %v2922_v40 = vrot.slane %v8842_v48, 4  ;;  %v2925_v51 = vrot.slane %v8847_v61, 4 }
 0x18a   : > { %v2691_v17 = vsel %vm710_vm8, %v2682_v4, %v2690_v5  ;;  %v2906_v49 = vrot.slane %v8902_v16, 4  ;;  %v2920_v36 = vsel %vm912_vm2, %v2918_v55, %v2919_v56  ;;  %v8965_v5 = vld [vmem:[#allocation2 + $0x90] sm:$0xf0]  ;;  %v2928_v48 = vrot.slane %v8863_v45, 4 }
 0x18b   : > { %v2640_v30 = vsel %vm710_vm8, %v2631_v25, %v2639_v26  ;;  %v2907_v25 = vrot.slane %v8810_v42, 4  ;;  %v2931_v61 = vrot.slane %v8868_v22, 4  ;;  %v3104_v22 = vld [vmem:[#allocation2 + $0x48] sm:$0x1f] }
 0x18c   : > { %7209 = vmatmul.mubr.msk.bf16.gmra.mrb[16].mxu0 %vm943_vm7, %v2350_v13  ;;  %v2644_v13 = vrot.slane %v2642_v46, 3  ;;  %v2665_v46 = vor.u32 %v2664_v47, %v2661_v37 }
 0x18d   : > { %7214 = vmatprep.mubr.msk.bf16.mxu0 %vm943_vm7, %v2555_v23 }
 0x18e   : > { %v2648_v54 = vor.u32 %v2647_v14, %v2644_v13  ;;  %v2699_v14 = vor.u32 %v2698_v33, %v2695_v6  ;;  %v8967_v6 = vld [vmem:[#allocation2 + $0xa0] sm:$0xf0]  ;;  %v3102_v33 = vld [vmem:[#allocation2 + $0x28] sm:$0x1f] }
 0x190   : > { %v2657_v50 = vsel %vm710_vm8, %v2648_v54, %v2656_v31  ;;  %v2908_v54 = vsel %vm912_vm2, %v2906_v49, %v2907_v25  ;;  %v8915_v31 = vld [vmem:[#allocation2 + $0x30] sm:$0xf0] }
 0x191   : > { %v2909_v42 = vrot.slane %v8915_v31, 4 }
 0x193   : > { %v2911_v38 = vsel %vm912_vm2, %v2909_v42, %v2910_v29 }
 0x194   : > { %7215 = vmatmul.mubr.msk.bf16.vlgmr.msra.gmra.mrb[0].mxu0 %vm943_vm7, %v2572_v39  ;;  %v2669_v39 = vrot.slane %v2667_v32, 3 }
 0x195   : > { %7235 = vmatpush3.bf16.msra.mxu0 %v2967_v44  ;;  %7218 = vmatprep.mubr.msk.bf16.mxu0 %vm943_vm7, %v2589_v1  ;;  %v8877_v44 = vld [vmem:[#allocation2 + $0xb8] sm:$0xf]  ;;  %v2672_v1 = vrot.slane %v2670_v41, 4  ;;  %v8920_v41 = vld [vmem:[#allocation2 + $0x40] sm:$0xf0] }
 0x196   : > { %7862 = vmatprep.subr.msk.bf16.mxu0 %vm912_vm2, %v8844_v60  ;;  %v2701_v62 = vshrl.u32 %v8877_v44, 16  ;;  %v2704_v63 = vshll.u32 %v8877_v44, 16  ;;  %v2912_v43 = vrot.slane %v8920_v41, 4  ;;  %v3151_v55 = vshll.u32 %v8920_v41, 16 }
 0x197   : > { %v2673_v3 = vor.u32 %v2672_v1, %v2669_v39  ;;  %v8937_v39 = vld [vmem:[#allocation2 + $0x50] sm:$0xf0] }
 0x198   : > { %v2703_v8 = vrot.slane %v2701_v62, 3  ;;  %v2914_v47 = vsel %vm912_vm2, %v2912_v43, %v2913_v35  ;;  %v2915_v1 = vrot.slane %v8937_v39, 4  ;;  %v8956_v62 = vld [vmem:[#allocation2 + $0x80] sm:$0xf0]  ;;  %v3103_v43 = vld [vmem:[#allocation2 + $0x38] sm:$0x1f] }
 0x199   : > { %v2674_v11 = vsel %vm710_vm8, %v2665_v46, %v2673_v3  ;;  %v2924_v46 = vrot.slane %v8956_v62, 4  ;;  %v2934_v35 = vrot.slane %v8877_v44, 4 }
 0x19a   : > { %v8857_v0 = vpop.f32.mrb[0].mxu1  ;;  %v2917_v58 = vsel %vm912_vm2, %v2915_v1, %v2916_v20  ;;  %v3142_v1 = vshll.u32 %v3103_v43, 16  ;;  %v3148_v20 = vshrl.u32 %v8920_v41, 16  ;;  %v3165_v41 = vshrl.u32 %v8937_v39, 16 }
 0x19b   : > { %v8859_v19 = vpop.f32.mrb[1].mxu1  ;;  %v2926_v4 = vsel %vm912_vm2, %v2924_v46, %v2925_v51 }
 0x19c   : > { %7219 = vmatmul.mubr.msk.bf16.gmra.mrb[4].mxu0 %vm943_vm7, %v2606_v9  ;;  %v8865_v21 = vpop.f32.mrb[2].mxu1  ;;  %v2706_v9 = vrot.slane %v2704_v63, 4  ;;  %v2921_v63 = vrot.slane %v8953_v24, 4  ;;  %v3144_v44 = vrot.slane %v3142_v1, 5 }
 0x19d   : > { %7222 = vmatprep.mubr.msk.bf16.mxu0 %vm943_vm7, %v2623_v18  ;;  %v8870_v23 = vpop.f32.mrb[3].mxu1 }
 0x19e   : > { %v2707_v15 = vor.u32 %v2706_v9, %v2703_v8  ;;  %v2923_v3 = vsel %vm912_vm2, %v2921_v63, %v2922_v40  ;;  %v2927_v8 = vrot.slane %v8965_v5, 4  ;;  %v2930_v9 = vrot.slane %v8967_v6, 4 }
 0x19f   : > { %v3159_v63 = vshll.u32 %v3104_v22, 16 }
 0x1a0   : > { %v2708_v26 = vsel %vm710_vm8, %v2699_v14, %v2707_v15  ;;  %v3122_v14 = vshrl.u32 %v3102_v33, 16  ;;  %v3125_v15 = vshll.u32 %v3102_v33, 16  ;;  %v2929_v49 = vsel %vm912_vm2, %v2927_v8, %v2928_v48  ;;  %v3105_v8 = vld [vmem:[#allocation2 + $0x58] sm:$0x1f] }
 0x1a1   : > { %v2932_v25 = vsel %vm912_vm2, %v2930_v9, %v2931_v61  ;;  %v3153_v33 = vrot.slane %v3151_v55, 5  ;;  %v3161_v9 = vrot.slane %v3159_v63, 5  ;;  %v3168_v61 = vshll.u32 %v8937_v39, 16 }
 0x1a2   : > { %v8879_v57 = vpop.f32.mrb[4].mxu1  ;;  %v3124_v42 = vrot.slane %v3122_v14, 4  ;;  %v3127_v29 = vrot.slane %v3125_v15, 5  ;;  %v3176_v14 = vshll.u32 %v3105_v8, 16 }
 0x1a3   : > { %v8882_v52 = vpop.f32.mrb[5].mxu1 }
 0x1a4   : > { %7223 = vmatmul.mubr.msk.bf16.gmra.mrb[8].mxu0 %vm943_vm7, %v2640_v30  ;;  %v8885_v53 = vpop.f32.mrb[6].mxu1  ;;  %v3314_v30 = vsel %vm912_vm2, %v8844_v60, 0 }
 0x1a5   : > { %7226 = vmatprep.mubr.msk.bf16.mxu0 %vm943_vm7, %v2657_v50  ;;  %v8890_v27 = vpop.f32.mrb[7].mxu1 }
 0x1aa   : > { %v8892_v10 = vpop.f32.mrb[8].mxu1 }
 0x1ab   : > { %v8895_v12 = vpop.f32.mrb[9].mxu1 }
 0x1ac   : > { %7227 = vmatmul.mubr.msk.bf16.gmra.mrb[12].mxu0 %vm943_vm7, %v2674_v11  ;;  %v8899_v13 = vpop.f32.mrb[10].mxu1  ;;  %v3114_v11 = vshrl.u32 %v8902_v16, 16 }
 0x1ad   : > { %7230 = vmatprep.mubr.msk.bf16.mxu0 %vm943_vm7, %v2691_v17  ;;  %v8904_v18 = vpop.f32.mrb[11].mxu1  ;;  %v3117_v17 = vshll.u32 %v8902_v16, 16 }
 0x1af   : > { %v3119_v45 = vrot.slane %v3117_v17, 5  ;;  %v3173_v17 = vshrl.u32 %v3105_v8, 16 }
 0x1b2   : > { %v8909_v7 = vpop.f32.mrb[12].mxu1 }
 0x1b3   : > { %v8911_v28 = vpop.f32.mrb[13].mxu1 }
 0x1b4   : > { %7231 = vmatmul.mubr.msk.bf16.gmra.mrb[16].mxu0 %vm943_vm7, %v2708_v26  ;;  %v8917_v32 = vpop.f32.mrb[14].mxu1  ;;  %v8978_v26 = vld [vmem:[#allocation2 + $0xb0] sm:$0xf0] }
 0x1b5   : > { %7236 = vmatprep.mubr.msk.bf16.mxu0 %vm943_vm7, %v2908_v54  ;;  %v8922_v34 = vpop.f32.mrb[15].mxu1  ;;  %v3116_v54 = vrot.slane %v3114_v11, 4  ;;  %v2933_v16 = vrot.slane %v8978_v26, 4  ;;  %v3106_v11 = vld [vmem:[#allocation2 + $0x68] sm:$0x1f] }
 0x1b7   : > { %v3120_v56 = vor.u32 %v3119_v45, %v3116_v54  ;;  %v2935_v40 = vsel %vm912_vm2, %v2933_v16, %v2934_v35  ;;  %v3182_v54 = vshrl.u32 %v8942_v2, 16  ;;  %v3170_v16 = vrot.slane %v3168_v61, 5 }
 0x1b8   : > { %v3175_v35 = vrot.slane %v3173_v17, 4 }
 0x1b9   : > { %v3184_v39 = vrot.slane %v3182_v54, 4  ;;  %v3233_v54 = vshrl.u32 %v8965_v5, 16 }
 0x1ba   : > { %v8930_v37 = vpop.f32.mrb[16].mxu1 }
 0x1bb   : > { %v8933_v50 = vpop.f32.mrb[17].mxu1 }
 0x1bc   : > { %7237 = vmatmul.mubr.msk.bf16.vlgmr.msra.gmra.mrb[0].mxu0 %vm943_vm7, %v2911_v38  ;;  %v8939_v59 = vpop.f32.mrb[18].mxu1  ;;  %v3134_v38 = vshll.u32 %v8915_v31, 16 }
 0x1bd   : > { %7257 = vmatpush3.bf16.msra.mxu0 %v3314_v30  ;;  %7240 = vmatprep.mubr.msk.bf16.mxu0 %vm943_vm7, %v2914_v47  ;;  %v8944_v60 = vpop.f32.mrb[19].mxu1  ;;  %v3131_v30 = vshrl.u32 %v8915_v31, 16  ;;  %v3139_v47 = vshrl.u32 %v3103_v43, 16  ;;  %v3193_v43 = vshll.u32 %v3106_v11, 16 }
 0x1be   : > { %v3136_v51 = vrot.slane %v3134_v38, 5 }
 0x1bf   : > { %v3133_v46 = vrot.slane %v3131_v30, 4  ;;  %v3178_v30 = vrot.slane %v3176_v14, 5 }
 0x1c1   : > { %v3137_v15 = vor.u32 %v3136_v51, %v3133_v46  ;;  %v3179_v63 = vor.u32 %v3178_v30, %v3175_v35  ;;  %v3250_v30 = vshrl.u32 %v8967_v6, 16 }
 0x1c4   : > { %7241 = vmatmul.mubr.msk.bf16.gmra.mrb[4].mxu0 %vm943_vm7, %v2917_v58  ;;  %v3128_v58 = vor.u32 %v3127_v29, %v3124_v42  ;;  %v3185_v42 = vshll.u32 %v8942_v2, 16  ;;  %v3190_v29 = vshrl.u32 %v3106_v11, 16 }
 0x1c5   : > { %7244 = vmatprep.mubr.msk.bf16.mxu0 %vm943_vm7, %v2920_v36  ;;  %v3156_v36 = vshrl.u32 %v3104_v22, 16  ;;  %v3167_v22 = vrot.slane %v3165_v41, 4 }
 0x1c6   : > { %v3129_v31 = vsel %vm1248_vm9, %v3120_v56, %v3128_v58  ;;  %v3192_v55 = vrot.slane %v3190_v29, 4  ;;  %v3195_v56 = vrot.slane %v3193_v43, 5  ;;  %v3108_v58 = vld [vmem:[#allocation2 + $0x88] sm:$0x1f] }
 0x1c7   : > { %v3158_v48 = vrot.slane %v3156_v36, 4  ;;  %v3171_v2 = vor.u32 %v3170_v16, %v3167_v22  ;;  %v3199_v36 = vshrl.u32 %v8953_v24, 16 }
 0x1c9   : > { %v3162_v45 = vor.u32 %v3161_v9, %v3158_v48  ;;  %v3201_v48 = vrot.slane %v3199_v36, 4  ;;  %v3180_v9 = vsel %vm1248_vm9, %v3171_v2, %v3179_v63  ;;  %v3252_v2 = vrot.slane %v3250_v30, 4 }
 0x1cc   : > { %7245 = vmatmul.mubr.msk.bf16.gmra.mrb[8].mxu0 %vm943_vm7, %v2923_v3  ;;  %v3141_v3 = vrot.slane %v3139_v47, 4  ;;  %v3107_v47 = vld [vmem:[#allocation2 + $0x78] sm:$0x1f] }
 0x1cd   : > { %7248 = vmatprep.mubr.msk.bf16.mxu0 %vm943_vm7, %v2926_v4  ;;  %v3150_v4 = vrot.slane %v3148_v20, 4  ;;  %v3187_v20 = vrot.slane %v3185_v42, 5  ;;  %v3207_v46 = vshrl.u32 %v3107_v47, 16  ;;  %v3210_v51 = vshll.u32 %v3107_v47, 16 }
 0x1cf   : > { %v3188_v8 = vor.u32 %v3187_v20, %v3184_v39  ;;  %v3209_v61 = vrot.slane %v3207_v46, 4  ;;  %v3212_v11 = vrot.slane %v3210_v51, 5  ;;  %v3111_v46 = vld [vmem:[#allocation2 + $0xb8] sm:$0x1f] }
 0x1d1   : > { %v3213_v22 = vor.u32 %v3212_v11, %v3209_v61 }
 0x1d4   : > { %7249 = vmatmul.mubr.msk.bf16.gmra.mrb[12].mxu0 %vm943_vm7, %v2929_v49  ;;  %v3145_v49 = vor.u32 %v3144_v44, %v3141_v3  ;;  %v3216_v3 = vshrl.u32 %v8956_v62, 16  ;;  %v3219_v44 = vshll.u32 %v8956_v62, 16  ;;  %v3110_v62 = vld [vmem:[#allocation2 + $0xa8] sm:$0x1f] }
 0x1d5   : > { %7252 = vmatprep.mubr.msk.bf16.mxu0 %vm943_vm7, %v2932_v25  ;;  %v3154_v25 = vor.u32 %v3153_v33, %v3150_v4  ;;  %v3224_v4 = vshrl.u32 %v3108_v58, 16  ;;  %v3227_v33 = vshll.u32 %v3108_v58, 16  ;;  %v3258_v39 = vshrl.u32 %v3110_v62, 16 }
 0x1d6   : > { %v3146_v38 = vsel %vm1248_vm9, %v3137_v15, %v3145_v49  ;;  %v3218_v17 = vrot.slane %v3216_v3, 4  ;;  %v3221_v14 = vrot.slane %v3219_v44, 5  ;;  %v3109_v49 = vld [vmem:[#allocation2 + $0x98] sm:$0x1f]  ;;  %v3261_v47 = vshll.u32 %v3110_v62, 16 }
 0x1d7   : > { %v3163_v1 = vsel %vm1248_vm9, %v3154_v25, %v3162_v45  ;;  %v3226_v15 = vrot.slane %v3224_v4, 4  ;;  %v3236_v45 = vshll.u32 %v8965_v5, 16  ;;  %v3241_v42 = vshrl.u32 %v3109_v49, 16 }
 0x1d8   : > { %v3244_v29 = vshll.u32 %v3109_v49, 16  ;;  %v3222_v16 = vor.u32 %v3221_v14, %v3218_v17  ;;  %v3260_v63 = vrot.slane %v3258_v39, 4  ;;  %v3267_v3 = vshrl.u32 %v8978_v26, 16  ;;  %v9027_v49 = vld [vmem:[%s9746_s4] ss:$0 sm:$0xff] }
 0x1d9   : > { %v3238_v20 = vrot.slane %v3236_v45, 5  ;;  %v3270_v44 = vshll.u32 %v8978_v26, 16  ;;  %v3275_v4 = vshrl.u32 %v3111_v46, 16 }
 0x1db   : > { %v3277_v61 = vrot.slane %v3275_v4, 4 }
 0x1dc   : > { %7253 = vmatmul.mubr.msk.bf16.gmra.mrb[16].mxu0 %vm943_vm7, %v2935_v40  ;;  %v3202_v40 = vshll.u32 %v8953_v24, 16  ;;  %v3229_v24 = vrot.slane %v3227_v33, 5  ;;  %v3278_v33 = vshll.u32 %v3111_v46, 16 }
 0x1dd   : > { %7258 = vmatprep.mubr.msk.bf16.mxu0 %vm943_vm7, %v3129_v31  ;;  %v3196_v31 = vor.u32 %v3195_v56, %v3192_v55  ;;  %v3243_v55 = vrot.slane %v3241_v42, 4  ;;  %v3246_v56 = vrot.slane %v3244_v29, 5 }
 0x1de   : > { %v3204_v41 = vrot.slane %v3202_v40, 5  ;;  %v3230_v35 = vor.u32 %v3229_v24, %v3226_v15  ;;  %v3263_v40 = vrot.slane %v3261_v47, 5  ;;  %v3280_v11 = vrot.slane %v3278_v33, 5 }
 0x1df   : > { %v3197_v25 = vsel %vm1248_vm9, %v3188_v8, %v3196_v31  ;;  %v3247_v51 = vor.u32 %v3246_v56, %v3243_v55 }
 0x1e0   : > { %v3205_v43 = vor.u32 %v3204_v41, %v3201_v48  ;;  %v3231_v5 = vsel %vm1248_vm9, %v3222_v16, %v3230_v35  ;;  %v3264_v31 = vor.u32 %v3263_v40, %v3260_v63  ;;  %v3272_v41 = vrot.slane %v3270_v44, 5 }
 0x1e1   : > { %v3281_v15 = vor.u32 %v3280_v11, %v3277_v61 }
 0x1e2   : > { %v3214_v58 = vsel %vm1248_vm9, %v3205_v43, %v3213_v22 }
 0x1e4   : > { %7259 = vmatmul.mubr.msk.bf16.vlgmr.msra.gmra.mrb[0].mxu0 %vm943_vm7, %v3146_v38  ;;  %v3253_v38 = vshll.u32 %v8967_v6, 16 }
 0x1e5   : > { %7262 = vmatprep.mubr.msk.bf16.mxu0 %vm943_vm7, %v3163_v1  ;;  %v3235_v1 = vrot.slane %v3233_v54, 4  ;;  %v9033_v54 = vld [vmem:[%s9747_s5] ss:$0 sm:$0xff] }
 0x1e6   : > { %v3255_v36 = vrot.slane %v3253_v38, 5 }
 0x1e7   : > { %v3239_v6 = vor.u32 %v3238_v20, %v3235_v1 }
 0x1e8   : > { %v3256_v8 = vor.u32 %v3255_v36, %v3252_v2 }
 0x1e9   : > { %v3248_v48 = vsel %vm1248_vm9, %v3239_v6, %v3247_v51 }
 0x1ea   : > { %v3265_v17 = vsel %vm1248_vm9, %v3256_v8, %v3264_v31 }
 0x1ec   : > { %7263 = vmatmul.mubr.msk.bf16.gmra.mrb[4].mxu0 %vm943_vm7, %v3180_v9  ;;  %v3269_v9 = vrot.slane %v3267_v3, 4 }
 0x1ed   : > { %7266 = vmatprep.mubr.msk.bf16.mxu0 %vm943_vm7, %v3197_v25 }
 0x1ee   : > { %v3273_v14 = vor.u32 %v3272_v41, %v3269_v9 }
 0x1f0   : > { %v3282_v26 = vsel %vm1248_vm9, %v3273_v14, %v3281_v15 }
 0x1f4   : > { %7267 = vmatmul.mubr.msk.bf16.gmra.mrb[8].mxu0 %vm943_vm7, %v3214_v58 }
 0x1f5   : > { %7270 = vmatprep.mubr.msk.bf16.mxu0 %vm943_vm7, %v3231_v5 }
 0x1fc   : > { %7271 = vmatmul.mubr.msk.bf16.gmra.mrb[12].mxu0 %vm943_vm7, %v3248_v48 }
 0x1fd   : > { %7274 = vmatprep.mubr.msk.bf16.mxu0 %vm943_vm7, %v3265_v17 }
 0x204   : > { %7275 = vmatmul.mubr.msk.bf16.gmra.mrb[16].mxu0 %vm943_vm7, %v3282_v26 }
 0x2b7   : > { %v7260_v24 = vpop.f32.mrb[0].mxu0 }
 0x2b8   : > { %v7566_v25 = vadd.f32 %v7260_v24, %v8857_v0  ;;  %v3350_v62 = vpop.f32.mrb[1].mxu0 }
 0x2b9   : > { %v7567_v45 = vadd.f32 %v3350_v62, %v8859_v19  ;;  %v7261_v42 = vpop.f32.mrb[2].mxu0 }
 0x2ba   : > { %v3458_v29 = vmul.f32 %v7566_v25, %v9027_v49  ;;  %v7568_v43 = vadd.f32 %v7261_v42, %v8865_v21  ;;  %v3353_v22 = vpop.f32.mrb[3].mxu0 }
 0x2bb   : > { %v3456_v16 = vmul.f32 %v7567_v45, %v9027_v49  ;;  %v7569_v35 = vadd.f32 %v3353_v22, %v8870_v23 }
 0x2bc   : > { %v3485_v0 = vadd.f32 %v9033_v54, %v3458_v29  ;;  %v3459_v30 = vmul.f32 %v7568_v43, %v9027_v49 }
 0x2bd   : > { %v3483_v38 = vadd.f32 %v9033_v54, %v3456_v16  ;;  %v3457_v39 = vmul.f32 %v7569_v35, %v9027_v49 }
 0x2be   : > { %v3486_v19 = vadd.f32 %v9033_v54, %v3459_v30  ;;  %v3505_v20 = vmax.f32 %v3485_v0, 0.0 }
 0x2bf   : > { %v3484_v47 = vadd.f32 %v9033_v54, %v3457_v39  ;;  %v7264_v1 = vpop.f32.mrb[4].mxu0  ;;  %v3503_v58 = vmax.f32 %v3483_v38, 0.0 }
 0x2c0   : > { %v3506_v21 = vmax.f32 %v3486_v19, 0.0  ;;  %v7570_v55 = vadd.f32 %v7264_v1, %v8879_v57  ;;  %v3366_v56 = vpop.f32.mrb[5].mxu0 }
 0x2c1   : > { %v3504_v23 = vmax.f32 %v3484_v47, 0.0  ;;  %v7571_v5 = vadd.f32 %v3366_v56, %v8882_v52  ;;  %v7265_v2 = vpop.f32.mrb[6].mxu0 }
 0x2c2   : > { %v3524_v36 = vpack.c.bf16 %v3506_v21, %v3505_v20  ;;  %v3462_v63 = vmul.f32 %v7570_v55, %v9027_v49  ;;  %v7572_v40 = vadd.f32 %v7265_v2, %v8885_v53  ;;  %v3369_v46 = vpop.f32.mrb[7].mxu0 }
 0x2c3   : > { %v3523_v6 = vpack.c.bf16 %v3504_v23, %v3503_v58  ;;  %v3460_v51 = vmul.f32 %v7571_v5, %v9027_v49  ;;  %v7573_v3 = vadd.f32 %v3369_v46, %v8890_v27 }
 0x2c4   : > { %v3544_v44 = vrot.slane %v3524_v36, 4  ;;  %v3489_v57 = vadd.f32 %v9033_v54, %v3462_v63  ;;  %v3463_v4 = vmul.f32 %v7572_v40, %v9027_v49 }
 0x2c5   : > { %v3543_v33 = vrot.slane %v3523_v6, 4  ;;  %v3487_v52 = vadd.f32 %v9033_v54, %v3460_v51  ;;  %v3461_v8 = vmul.f32 %v7573_v3, %v9027_v49 }
 0x2c6   : > { %3565 = vst [vmem:[#allocation3 + $0x18] ss:$-4 sps:$4 sm:$0xff] %v3544_v44   ;;  %v3490_v31 = vadd.f32 %v9033_v54, %v3463_v4  ;;  %v3509_v9 = vmax.f32 %v3489_v57, 0.0 }
 0x2c7   : > { %3563 = vst [vmem:[#allocation3 + $0x8] ss:$-4 sps:$4 sm:$0xff] %v3543_v33   ;;  %v3488_v53 = vadd.f32 %v9033_v54, %v3461_v8  ;;  %v7268_v48 = vpop.f32.mrb[8].mxu0  ;;  %v3507_v11 = vmax.f32 %v3487_v52, 0.0 }
 0x2c8   : > { %v3510_v41 = vmax.f32 %v3490_v31, 0.0  ;;  %v7574_v27 = vadd.f32 %v7268_v48, %v8892_v10  ;;  %v3382_v61 = vpop.f32.mrb[9].mxu0 }
 0x2c9   : > { %v3508_v17 = vmax.f32 %v3488_v53, 0.0  ;;  %v7575_v14 = vadd.f32 %v3382_v61, %v8895_v12  ;;  %v7269_v15 = vpop.f32.mrb[10].mxu0 }
 0x2ca   : > { %v3526_v26 = vpack.c.bf16 %v3510_v41, %v3509_v9  ;;  %v3466_v24 = vmul.f32 %v7574_v27, %v9027_v49  ;;  %v7576_v25 = vadd.f32 %v7269_v15, %v8899_v13  ;;  %v3385_v62 = vpop.f32.mrb[11].mxu0 }
 0x2cb   : > { %v3525_v45 = vpack.c.bf16 %v3508_v17, %v3507_v11  ;;  %v3464_v42 = vmul.f32 %v7575_v14, %v9027_v49  ;;  %v7577_v29 = vadd.f32 %v3385_v62, %v8904_v18 }
 0x2cc   : > { %v3546_v43 = vrot.slane %v3526_v26, 4  ;;  %v3493_v10 = vadd.f32 %v9033_v54, %v3466_v24  ;;  %v3467_v22 = vmul.f32 %v7576_v25, %v9027_v49 }
 0x2cd   : > { %v3545_v16 = vrot.slane %v3525_v45, 4  ;;  %v3491_v12 = vadd.f32 %v9033_v54, %v3464_v42  ;;  %v3465_v35 = vmul.f32 %v7577_v29, %v9027_v49 }
 0x2ce   : > { %3569 = vst [vmem:[#allocation3 + $0x38] ss:$-4 sps:$4 sm:$0xff] %v3546_v43   ;;  %v3494_v0 = vadd.f32 %v9033_v54, %v3467_v22  ;;  %v3513_v38 = vmax.f32 %v3493_v10, 0.0 }
 0x2cf   : > { %3567 = vst [vmem:[#allocation3 + $0x28] ss:$-4 sps:$4 sm:$0xff] %v3545_v16   ;;  %v3492_v13 = vadd.f32 %v9033_v54, %v3465_v35  ;;  %v7272_v30 = vpop.f32.mrb[12].mxu0  ;;  %v3511_v47 = vmax.f32 %v3491_v12, 0.0 }
 0x2d0   : > { %v3514_v39 = vmax.f32 %v3494_v0, 0.0  ;;  %v7578_v18 = vadd.f32 %v7272_v30, %v8909_v7  ;;  %v3398_v19 = vpop.f32.mrb[13].mxu0 }
 0x2d1   : > { %v3512_v1 = vmax.f32 %v3492_v13, 0.0  ;;  %v7579_v20 = vadd.f32 %v3398_v19, %v8911_v28  ;;  %v7273_v21 = vpop.f32.mrb[14].mxu0 }
 0x2d2   : > { %v3528_v55 = vpack.c.bf16 %v3514_v39, %v3513_v38  ;;  %v3470_v56 = vmul.f32 %v7578_v18, %v9027_v49  ;;  %v7580_v58 = vadd.f32 %v7273_v21, %v8917_v32  ;;  %v3401_v23 = vpop.f32.mrb[15].mxu0 }
 0x2d3   : > { %v3527_v5 = vpack.c.bf16 %v3512_v1, %v3511_v47  ;;  %v3468_v2 = vmul.f32 %v7579_v20, %v9027_v49  ;;  %v7581_v36 = vadd.f32 %v3401_v23, %v8922_v34 }
 0x2d4   : > { %v3548_v63 = vrot.slane %v3528_v55, 4  ;;  %v3497_v7 = vadd.f32 %v9033_v54, %v3470_v56  ;;  %v3471_v40 = vmul.f32 %v7580_v58, %v9027_v49 }
 0x2d5   : > { %v3547_v46 = vrot.slane %v3527_v5, 4  ;;  %v3495_v28 = vadd.f32 %v9033_v54, %v3468_v2  ;;  %v3469_v6 = vmul.f32 %v7581_v36, %v9027_v49 }
 0x2d6   : > { %3573 = vst [vmem:[#allocation3 + $0x58] ss:$-4 sps:$4 sm:$0xff] %v3548_v63   ;;  %v3498_v51 = vadd.f32 %v9033_v54, %v3471_v40  ;;  %v3517_v44 = vmax.f32 %v3497_v7, 0.0 }
 0x2d7   : > { %3571 = vst [vmem:[#allocation3 + $0x48] ss:$-4 sps:$4 sm:$0xff] %v3547_v46   ;;  %v3496_v32 = vadd.f32 %v9033_v54, %v3469_v6  ;;  %v7276_v3 = vpop.f32.mrb[16].mxu0  ;;  %v3515_v33 = vmax.f32 %v3495_v28, 0.0 }
 0x2d8   : > { %v3518_v57 = vmax.f32 %v3498_v51, 0.0  ;;  %v7582_v34 = vadd.f32 %v7276_v3, %v8930_v37  ;;  %v3414_v4 = vpop.f32.mrb[17].mxu0 }
 0x2d9   : > { %v3516_v52 = vmax.f32 %v3496_v32, 0.0  ;;  %v7583_v8 = vadd.f32 %v3414_v4, %v8933_v50  ;;  %v7277_v31 = vpop.f32.mrb[18].mxu0 }
 0x2da   : > { %v3530_v53 = vpack.c.bf16 %v3518_v57, %v3517_v44  ;;  %v3474_v48 = vmul.f32 %v7582_v34, %v9027_v49  ;;  %v7584_v9 = vadd.f32 %v7277_v31, %v8939_v59  ;;  %v3417_v41 = vpop.f32.mrb[19].mxu0 }
 0x2db   : > { %v3529_v27 = vpack.c.bf16 %v3516_v52, %v3515_v33  ;;  %v3472_v61 = vmul.f32 %v7583_v8, %v9027_v49  ;;  %v7585_v11 = vadd.f32 %v3417_v41, %v8944_v60 }
 0x2dc   : > { %v3550_v17 = vrot.slane %v3530_v53, 4  ;;  %v3501_v37 = vadd.f32 %v9033_v54, %v3474_v48  ;;  %v3475_v14 = vmul.f32 %v7584_v9, %v9027_v49 }
 0x2dd   : > { %v3549_v15 = vrot.slane %v3529_v27, 4  ;;  %v3499_v50 = vadd.f32 %v9033_v54, %v3472_v61  ;;  %v3473_v26 = vmul.f32 %v7585_v11, %v9027_v49  ;;  %v8195_v49 = vmov (!%p6670_p8), 0  }
 0x2de   : > { %3577 = vst [vmem:[#allocation3 + $0x78] ss:$-4 sps:$4 sm:$0xff] %v3550_v17   ;;  %v3502_v59 = vadd.f32 %v9033_v54, %v3475_v14  ;;  %v3521_v25 = vmax.f32 %v3501_v37, 0.0  ;;  %3587 = vst [vmem:[#allocation3] sm:$0xf0] (!%p6670_p8), %v8195_v49 }
 0x2df   : > { %3575 = vst [vmem:[#allocation3 + $0x68] ss:$-4 sps:$4 sm:$0xff] %v3549_v15   ;;  %v3500_v24 = vadd.f32 %v9033_v54, %v3473_v26  ;;  %v3519_v60 = vmax.f32 %v3499_v50, 0.0  ;;  %3588 = vst [vmem:[#allocation3 + $0x8] sm:$0xf] (!%p6670_p8), %v8195_v49 }
 0x2e0   : > { %v3522_v62 = vmax.f32 %v3502_v59, 0.0 }
 0x2e1   : > { %v3520_v45 = vmax.f32 %v3500_v24, 0.0  ;;  %3586 = sbr.rel (%p6670_p8) target bundleno = 744 (0x2e8), region = 60 }
 0x2e2   : > { %v3532_v42 = vpack.c.bf16 %v3522_v62, %v3521_v25 }
 0x2e3   : > { %v3531_v29 = vpack.c.bf16 %v3520_v45, %v3519_v60 }
 0x2e4   : > { %v3552_v43 = vrot.slane %v3532_v42, 4 }
 0x2e5   : > { %v3551_v10 = vrot.slane %v3531_v29, 4 }
 0x2e6   : > { %3581 = vst [vmem:[#allocation3 + $0x98] ss:$-4 sps:$4 sm:$0xff] %v3552_v43  }
 0x2e7   : > { %3579 = vst [vmem:[#allocation3 + $0x88] ss:$-4 sps:$4 sm:$0xff] %v3551_v10  }
 0x2e8 PF: > { %p6671_p10 = scmp.ne.s32.totalorder %s8172_s30, 1 }
 0x2e9   : > { %v8196_v54 = vmov (!%p6671_p10), 0  }
 0x2ea   : > { %3592 = sbr.rel (%p6671_p10) target bundleno = 753 (0x2f1), region = 64  ;;  %3594 = vst [vmem:[#allocation3 + $0x90] sm:$0xf0] (!%p6671_p10), %v8196_v54  ;;  %3595 = vst [vmem:[#allocation3 + $0x98] sm:$0xf] (!%p6671_p10), %v8196_v54 }
 0x2f1 PF: > { %v7990_v22 = vld [vmem:[%s9745_s3 + $0x40] sm:$0xff]   ;;  %v7991_v16 = vld [vmem:[%s9745_s3 + $0x48] sm:$0xff]   ;;  %v7992_v12 = vld [vmem:[%s9745_s3 + $0x50] sm:$0xff]   ;;  %s6789_s14 = sshll.u32 %s8172_s30, 4  ;;  %s6765_s18 = sshll.u32 %s8176_s9, 5 }
 0x2f2   : > { %7278 = vmatprep.subr.bf16.mxu1 %v7990_v22  ;;  %v7993_v35 = vld [vmem:[%s9745_s3 + $0x58] sm:$0xff]   ;;  %v9111_v0 = vld [vmem:[#allocation3 + $0x8] sm:$0xf]  ;;  %v9113_v13 = vld [vmem:[#allocation3] sm:$0xf0]  ;;  %s6419_s13 = sadd.s32 %s6789_s14, %s6765_s18  ;;  %s6422_s9 = sshll.u32 %s9095_s16, 4  ;;  %s9683_s9 = int_to_ptr.vmem [resolvable:$true] %s6422_s9 }
 0x2f3   : > { %7279 = vmatpush3.bf16.msra.mxu1 %v7990_v22  ;;  %v3812_v30 = vrot.slane %v9113_v13, 4  ;;  %v3813_v38 = vrot.slane %v9111_v0, 4  ;;  %v7994_v18 = vld [vmem:[%s9745_s3 + $0x60] sm:$0xff]   ;;  %v7995_v19 = vld [vmem:[%s9745_s3 + $0x68] sm:$0xff]   ;;  %v7996_v47 = vld [vmem:[%s9745_s3 + $0x70] sm:$0xff]   ;;  %v3637_v15 = vshrl.u32 %v9111_v0, 16 }
 0x2f4   : > { %7280 = vmatprep.subr.bf16.mxu1 %v7991_v16  ;;  %v7997_v1 = vld [vmem:[%s9745_s3 + $0x78] sm:$0xff]   ;;  %v9132_v21 = vld [vmem:[#allocation3 + $0x10] sm:$0xf0]  ;;  %v9134_v55 = vld [vmem:[#allocation3 + $0x28] sm:$0xf]  ;;  %v3640_v50 = vshll.u32 %v9111_v0, 16 }
 0x2f5   : > { %v3814_v39 = vsel %vm912_vm2, %v3812_v30, %v3813_v38  ;;  %v9130_v20 = vld [vmem:[#allocation3 + $0x18] sm:$0xf]  ;;  %v9136_v56 = vld [vmem:[#allocation3 + $0x20] sm:$0xf0]  ;;  %v3815_v58 = vrot.slane %v9132_v21, 4  ;;  %v3819_v36 = vrot.slane %v9134_v55, 4 }
 0x2f6   : > { %7294 = vmatprep.mubr.bf16.mxu1 %v3814_v39  ;;  %v3816_v23 = vrot.slane %v9130_v20, 4  ;;  %v7998_v5 = vld [vmem:[%s9745_s3] sm:$0xff]   ;;  %v3818_v2 = vrot.slane %v9136_v56, 4  ;;  %v7999_v7 = vld [vmem:[%s9745_s3 + $0x8] sm:$0xff]   ;;  %v9149_v40 = vld [vmem:[#allocation3 + $0x38] sm:$0xf] }
 0x2f7   : > { %7281 = vmatpush3.bf16.msra.mxu1 %v7991_v16  ;;  %v9152_v28 = vld [vmem:[#allocation3 + $0x30] sm:$0xf0]  ;;  %v9154_v6 = vld [vmem:[#allocation3 + $0x48] sm:$0xf]  ;;  %v9156_v51 = vld [vmem:[#allocation3 + $0x40] sm:$0xf0] }
 0x2f8   : > { %7282 = vmatprep.subr.bf16.mxu1 %v7992_v12  ;;  %v3817_v63 = vsel %vm912_vm2, %v3815_v58, %v3816_v23  ;;  %v3820_v46 = vsel %vm912_vm2, %v3818_v2, %v3819_v36  ;;  %v3821_v32 = vrot.slane %v9152_v28, 4  ;;  %v3822_v3 = vrot.slane %v9149_v40, 4  ;;  %v8000_v44 = vld [vmem:[%s9745_s3 + $0x10] sm:$0xff]   ;;  %v8001_v4 = vld [vmem:[%s9745_s3 + $0x18] sm:$0xff]   ;;  %v9173_v31 = vld [vmem:[#allocation3 + $0x68] sm:$0xf] }
 0x2f9   : > { %v3824_v57 = vrot.slane %v9156_v51, 4  ;;  %v3825_v34 = vrot.slane %v9154_v6, 4  ;;  %v9169_v52 = vld [vmem:[#allocation3 + $0x58] sm:$0xf]  ;;  %v9171_v8 = vld [vmem:[#allocation3 + $0x50] sm:$0xf0] }
 0x2fa   : > { %v3823_v33 = vsel %vm912_vm2, %v3821_v32, %v3822_v3  ;;  %v9176_v48 = vld [vmem:[#allocation3 + $0x60] sm:$0xf0]  ;;  %v3827_v41 = vrot.slane %v9171_v8, 4  ;;  %v3828_v27 = vrot.slane %v9169_v52, 4  ;;  %v3831_v11 = vrot.slane %v9173_v31, 4  ;;  %v8003_v26 = vld [vmem:[%s9745_s3 + $0x28] sm:$0xff]  }
 0x2fb   : > { %7283 = vmatpush3.bf16.msra.mxu1 %v7992_v12  ;;  %v3826_v53 = vsel %vm912_vm2, %v3824_v57, %v3825_v34  ;;  %v3596_v9 = vld [vmem:[#allocation3] sm:$0xf8]  ;;  %v3830_v61 = vrot.slane %v9176_v48, 4  ;;  %v9190_v59 = vld [vmem:[#allocation3 + $0x78] sm:$0xf]  ;;  %v3639_v29 = vrot.slane %v3637_v15, 3 }
 0x2fc   : > { %7284 = vmatprep.subr.bf16.mxu1 %v7993_v35  ;;  %v8002_v17 = vld [vmem:[%s9745_s3 + $0x20] sm:$0xff]   ;;  %v3629_v37 = vshrl.u32 %v3596_v9, 16  ;;  %v3632_v14 = vshll.u32 %v3596_v9, 16  ;;  %v3829_v24 = vsel %vm912_vm2, %v3827_v41, %v3828_v27  ;;  %v9194_v62 = vld [vmem:[#allocation3 + $0x70] sm:$0xf0]  ;;  %v3642_v43 = vrot.slane %v3640_v50, 4 }
 0x2fd   : > { %v3832_v25 = vsel %vm912_vm2, %v3830_v61, %v3831_v11  ;;  %v3598_v60 = vld [vmem:[#allocation3 + $0x10] sm:$0xf8]  ;;  %v3600_v10 = vld [vmem:[#allocation3 + $0x20] sm:$0xf8]  ;;  %v3654_v49 = vshrl.u32 %v9130_v20, 16  ;;  %v3657_v54 = vshll.u32 %v9130_v20, 16 }
 0x2fe   : > { %v3631_v45 = vrot.slane %v3629_v37, 3  ;;  %v3634_v42 = vrot.slane %v3632_v14, 4  ;;  %v3833_v22 = vrot.slane %v9194_v62, 4  ;;  %v3834_v16 = vrot.slane %v9190_v59, 4  ;;  %v3602_v2 = vld [vmem:[#allocation3 + $0x30] sm:$0xf8] }
 0x2ff   : > { %7285 = vmatpush3.bf16.msra.mxu1 %v7993_v35  ;;  %v3646_v12 = vshrl.u32 %v3598_v60, 16  ;;  %v3649_v35 = vshll.u32 %v3598_v60, 16  ;;  %v3663_v0 = vshrl.u32 %v3600_v10, 16  ;;  %v3666_v30 = vshll.u32 %v3600_v10, 16  ;;  %v3604_v3 = vld [vmem:[#allocation3 + $0x40] sm:$0xf8] }
 0x300   : > { %7286 = vmatprep.subr.bf16.mxu1 %v7994_v18  ;;  %v3671_v38 = vshrl.u32 %v9134_v55, 16  ;;  %v3674_v39 = vshll.u32 %v9134_v55, 16  ;;  %v3659_v20 = vrot.slane %v3657_v54, 4  ;;  %v3835_v58 = vsel %vm912_vm2, %v3833_v22, %v3834_v16  ;;  %v8005_v55 = vld [vmem:[%s9745_s3 + $0x38] sm:$0xff]   ;;  %v8007_v50 = vld [vmem:[%s9745_s3 + $0x88] sm:$0xff]   ;;  %s6766_s30 = sshll.u32 %s6419_s13, 6 }
 0x301   : > { %v3648_v23 = vrot.slane %v3646_v12, 3  ;;  %v3665_v36 = vrot.slane %v3663_v0, 3  ;;  %v3680_v34 = vshrl.u32 %v3602_v2, 16  ;;  %v3688_v41 = vshrl.u32 %v9149_v40, 16  ;;  %v3606_v60 = vld [vmem:[#allocation3 + $0x50] sm:$0xf8]  ;;  %s9681_s21 = scalar_lea.hbm %s9750_s8, %s6766_s30 }
 0x302   : > { %v3691_v27 = vshll.u32 %v9149_v40, 16  ;;  %v3697_v61 = vshrl.u32 %v3604_v3, 16  ;;  %v3700_v11 = vshll.u32 %v3604_v3, 16  ;;  %v3708_v37 = vshll.u32 %v9154_v6, 16  ;;  %s9689_s22 = scalar_lea.sflag [#allocation6], %s340_s11  ;;  %s8090_s23 = scalar_lea.vmem %s9683_s9, 1024 }
 0x303   : > { %7287 = vmatpush3.bf16.msra.mxu1 %v7994_v18  ;;  %v8004_v18 = vld [vmem:[%s9745_s3 + $0x30] sm:$0xff]   ;;  %v3682_v15 = vrot.slane %v3680_v34, 3  ;;  %v3714_v10 = vshrl.u32 %v3606_v60, 16  ;;  %v3722_v54 = vshrl.u32 %v9169_v52, 16  ;;  %v3725_v22 = vshll.u32 %v9169_v52, 16  ;;  %p8091_p12 = scmp.ne.s32.totalorder %s9683_s9, %s8090_s23  ;;  %p9768_p0 = scmp.ne.s32.totalorder %s9760_s19, 0 }
 0x304   : > { %7288 = vmatprep.subr.bf16.mxu1 %v7995_v19  ;;  %v3693_v40 = vrot.slane %v3691_v27, 4  ;;  %v3739_v0 = vshrl.u32 %v9173_v31, 16  ;;  %v3759_v34 = vshll.u32 %v9190_v59, 16  ;;  %s8197_s24 = smov [#allocation7]  }
 0x305   : > { %v3724_v52 = vrot.slane %v3722_v54, 3  ;;  %p8092_p2 = pnand %p8091_p12, %p9768_p0  ;;  %s8094_s14 = sshll.u32 %s8197_s24, 4  ;;  %s8095_s14 = int_to_ptr.vmem [resolvable:$false] %s8094_s14 }
 0x306   : > { %s8096_s18 = scalar_lea.vmem %s8095_s14, 2048  ;;  %p8097_p6 = scmp.lt.s32.totalorder %s9683_s9, %s8095_s14 }
 0x307   : > { %7289 = vmatpush3.bf16.msra.mxu1 %v7995_v19  ;;  %v3635_v19 = vor.u32 %v3634_v42, %v3631_v45  ;;  %v3699_v45 = vrot.slane %v3697_v61, 3  ;;  %v3702_v42 = vrot.slane %v3700_v11, 4  ;;  %v4176_v11 = vshrl.u32 %v9132_v21, 16  ;;  %p8093_p5 = pneg %p8092_p2  ;;  %p8098_p7 = scmp.lt.s32.totalorder %s8096_s18, %s8090_s23 }
 0x308   : > { %7290 = vmatprep.subr.bf16.mxu1 %v7996_v47 }
 0x309   : > { %p8099_p9 = por %p8098_p7, %p8097_p6 }
 0x30b   : > { %7291 = vmatpush3.bf16.msra.mxu1 %v7996_v47  ;;  %v3643_v47 = vor.u32 %v3642_v43, %v3639_v29  ;;  %v3710_v43 = vrot.slane %v3708_v37, 4  ;;  %p8100_p11 = pnand %p8099_p9, %p8093_p5 }
 0x30c   : > { %7292 = vmatprep.subr.bf16.mxu1 %v7997_v1 }
 0x30d   : > { %v3644_v32 = vsel %vm710_vm8, %v3635_v19, %v3643_v47  ;;  %v3742_v19 = vshll.u32 %v9173_v31, 16  ;;  %v3716_v47 = vrot.slane %v3714_v10, 3  ;;  %v4196_v10 = vshll.u32 %v9136_v56, 16 }
 0x30f   : > { %7293 = vmatpush3.bf16.msra.mxu1 %v7997_v1  ;;  %v3656_v1 = vrot.slane %v3654_v49, 3  ;;  %v3717_v49 = vshll.u32 %v3606_v60, 16 }
 0x310   : > { %7310 = vmatprep.subr.bf16.mxu1 %v7998_v5 }
 0x311   : > { %v3660_v57 = vor.u32 %v3659_v20, %v3656_v1  ;;  %v3719_v1 = vrot.slane %v3717_v49, 4  ;;  %v3727_v20 = vrot.slane %v3725_v22, 4 }
 0x312   : > { %7295 = vmatmul.mubr.bf16.vlgmr.msra.gmra.mrb[20].mxu1 %v3817_v63  ;;  %v3668_v63 = vrot.slane %v3666_v30, 4  ;;  %v8008_v30 = vld [vmem:[%s9745_s3 + $0x90] sm:$0xff]  }
 0x313   : > { %7311 = vmatpush3.bf16.msra.mxu1 %v7998_v5  ;;  %7298 = vmatprep.mubr.bf16.mxu1 %v3820_v46  ;;  %v3651_v5 = vrot.slane %v3649_v35, 4  ;;  %v3676_v46 = vrot.slane %v3674_v39, 4  ;;  %v3720_v3 = vor.u32 %v3719_v1, %v3716_v47  ;;  %v4210_v47 = vshrl.u32 %v9152_v28, 16 }
 0x314   : > { %7312 = vmatprep.subr.bf16.mxu1 %v7999_v7 }
 0x317   : > { %7313 = vmatpush3.bf16.msra.mxu1 %v7999_v7  ;;  %v3673_v7 = vrot.slane %v3671_v38, 3  ;;  %v3703_v38 = vor.u32 %v3702_v42, %v3699_v45  ;;  %v4136_v45 = vld [vmem:[#allocation3 + $0x28] sm:$0x1f]  ;;  %v4179_v42 = vshll.u32 %v9132_v21, 16 }
 0x318   : > { %7314 = vmatprep.subr.bf16.mxu1 %v8000_v44  ;;  %v4201_v22 = vshrl.u32 %v4136_v45, 16 }
 0x319   : > { %v3677_v9 = vor.u32 %v3676_v46, %v3673_v7  ;;  %v3744_v46 = vrot.slane %v3742_v19, 4 }
 0x31a   : > { %7299 = vmatmul.mubr.bf16.gmra.mrb[24].mxu1 %v3823_v33  ;;  %v8006_v33 = vld [vmem:[%s9745_s3 + $0x80] sm:$0xff]  }
 0x31b   : > { %7315 = vmatpush3.bf16.msra.mxu1 %v8000_v44  ;;  %7302 = vmatprep.mubr.bf16.mxu1 %v3826_v53  ;;  %v3652_v44 = vor.u32 %v3651_v5, %v3648_v23  ;;  %v3669_v53 = vor.u32 %v3668_v63, %v3665_v36  ;;  %v8009_v5 = vld [vmem:[%s9745_s3 + $0x98] sm:$0xff]   ;;  %v3741_v36 = vrot.slane %v3739_v0, 3  ;;  %v4204_v0 = vshll.u32 %v4136_v45, 16 }
 0x31c   : > { %7316 = vmatprep.subr.bf16.mxu1 %v8001_v4  ;;  %v4264_v45 = vshll.u32 %v9176_v48, 16 }
 0x31d   : > { %v3661_v14 = vsel %vm710_vm8, %v3652_v44, %v3660_v57  ;;  %v3728_v44 = vor.u32 %v3727_v20, %v3724_v52  ;;  %v3756_v57 = vshrl.u32 %v9190_v59, 16  ;;  %v8011_v59 = vld [vmem:[%s9745_s3 + $0xa8] sm:$0xff]   ;;  %v4203_v52 = vrot.slane %v4201_v22, 4 }
 0x31e   : > { %v4213_v20 = vshll.u32 %v9152_v28, 16 }
 0x31f   : > { %7317 = vmatpush3.bf16.msra.mxu1 %v8001_v4  ;;  %v3683_v4 = vshll.u32 %v3602_v2, 16 }
 0x320   : > { %7318 = vmatprep.subr.bf16.mxu1 %v8002_v17 }
 0x322   : > { %7303 = vmatmul.mubr.bf16.gmra.mrb[28].mxu1 %v3829_v24  ;;  %v3685_v24 = vrot.slane %v3683_v4, 4  ;;  %v4159_v4 = vshrl.u32 %v9113_v13, 16 }
 0x323   : > { %7319 = vmatpush3.bf16.msra.mxu1 %v8002_v17  ;;  %7306 = vmatprep.mubr.bf16.mxu1 %v3832_v25  ;;  %v3705_v17 = vshrl.u32 %v9154_v6, 16  ;;  %v3690_v25 = vrot.slane %v3688_v41, 3  ;;  %v3608_v6 = vld [vmem:[#allocation3 + $0x60] sm:$0xf8]  ;;  %v3745_v41 = vor.u32 %v3744_v46, %v3741_v36  ;;  %v4230_v46 = vshll.u32 %v9156_v51, 16 }
 0x324   : > { %7320 = vmatprep.subr.bf16.mxu1 %v8003_v26  ;;  %v3686_v16 = vor.u32 %v3685_v24, %v3682_v15  ;;  %v3731_v35 = vshrl.u32 %v3608_v6, 16  ;;  %v3758_v15 = vrot.slane %v3756_v57, 3 }
 0x325   : > { %v3707_v29 = vrot.slane %v3705_v17, 3  ;;  %v3694_v12 = vor.u32 %v3693_v40, %v3690_v25 }
 0x326   : > { %v3733_v2 = vrot.slane %v3731_v35, 3 }
 0x327   : > { %7321 = vmatpush3.bf16.msra.mxu1 %v8003_v26  ;;  %v3678_v26 = vsel %vm710_vm8, %v3669_v53, %v3677_v9  ;;  %v3711_v39 = vor.u32 %v3710_v43, %v3707_v29  ;;  %v3695_v23 = vsel %vm710_vm8, %v3686_v16, %v3694_v12  ;;  %v8010_v53 = vld [vmem:[%s9745_s3 + $0xa0] sm:$0xff]   ;;  %v4178_v16 = vrot.slane %v4176_v11, 4  ;;  %v8012_v12 = vld [vmem:[%s9745_s3 + $0xb0] sm:$0xff]   ;;  %v4139_v11 = vld [vmem:[#allocation3 + $0x58] sm:$0x1f] }
 0x328   : > { %7322 = vmatprep.subr.bf16.mxu1 %v8004_v18 }
 0x329   : > { %v3712_v63 = vsel %vm710_vm8, %v3703_v38, %v3711_v39  ;;  %v4137_v39 = vld [vmem:[#allocation3 + $0x38] sm:$0x1f] }
 0x32a   : > { %7307 = vmatmul.mubr.bf16.gmra.mrb[32].mxu1 %v3835_v58  ;;  %v3610_v58 = vld [vmem:[#allocation3 + $0x70] sm:$0xf8]  ;;  %v4218_v36 = vshrl.u32 %v4137_v39, 16 }
 0x32b   : > { %7323 = vmatpush3.bf16.msra.mxu1 %v8004_v18  ;;  %7326 = vmatprep.mubr.bf16.mxu1 %v3644_v32  ;;  %v3734_v18 = vshll.u32 %v3608_v6, 16  ;;  %v3748_v31 = vshrl.u32 %v3610_v58, 16  ;;  %v4134_v32 = vld [vmem:[#allocation3 + $0x8] sm:$0x1f]  ;;  %v4193_v6 = vshrl.u32 %v9136_v56, 16  ;;  %v4198_v56 = vrot.slane %v4196_v10, 5 }
 0x32c   : > { %7324 = vmatprep.subr.bf16.mxu1 %v8005_v55  ;;  %v4167_v27 = vshrl.u32 %v4134_v32, 16  ;;  %v4170_v61 = vshll.u32 %v4134_v32, 16  ;;  %v4141_v10 = vld [vmem:[#allocation3 + $0x78] sm:$0x1f] }
 0x32d   : > { %v3736_v7 = vrot.slane %v3734_v18, 4  ;;  %v3750_v17 = vrot.slane %v3748_v31, 3  ;;  %v4195_v19 = vrot.slane %v4193_v6, 4 }
 0x32e   : > { %v4169_v40 = vrot.slane %v4167_v27, 4  ;;  %v4172_v60 = vrot.slane %v4170_v61, 5 }
 0x32f   : > { %7325 = vmatpush3.bf16.msra.mxu1 %v8005_v55  ;;  %v3751_v55 = vshll.u32 %v3610_v58, 16  ;;  %v3737_v9 = vor.u32 %v3736_v7, %v3733_v2  ;;  %v4138_v58 = vld [vmem:[#allocation3 + $0x48] sm:$0x1f]  ;;  %v4206_v2 = vrot.slane %v4204_v0, 5  ;;  %v4227_v7 = vshrl.u32 %v9156_v51, 16 }
 0x330   : > { %7342 = vmatprep.subr.bf16.mxu1 %v8006_v33  ;;  %v4173_v21 = vor.u32 %v4172_v60, %v4169_v40  ;;  %v4235_v31 = vshrl.u32 %v4138_v58, 16  ;;  %v4232_v51 = vrot.slane %v4230_v46, 5  ;;  %v4255_v40 = vshll.u32 %v4139_v11, 16 }
 0x331   : > { %v3753_v37 = vrot.slane %v3751_v55, 4  ;;  %v3746_v25 = vsel %vm710_vm8, %v3737_v9, %v3745_v41  ;;  %v4238_v55 = vshll.u32 %v4138_v58, 16  ;;  %v4207_v57 = vor.u32 %v4206_v2, %v4203_v52  ;;  %v8018_v58 = vld [vmem:[%s9745_s3 + $0xe0] sm:$0xff]  }
 0x332   : > { %7327 = vmatmul.mubr.bf16.vlgmr.msra.gmra.mrb[20].mxu1 %v3661_v14  ;;  %v3729_v14 = vsel %vm710_vm8, %v3720_v3, %v3728_v44  ;;  %v8014_v3 = vld [vmem:[%s9745_s3 + $0xc0] sm:$0xff]   ;;  %v4199_v44 = vor.u32 %v4198_v56, %v4195_v19  ;;  %v4229_v9 = vrot.slane %v4227_v7, 4  ;;  %v4237_v41 = vrot.slane %v4235_v31, 4  ;;  %v4464_v19 = vld [vmem:[#allocation3 + $0x10] sm:$0xf8]  ;;  %v8019_v31 = vld [vmem:[%s9745_s3 + $0xe8] sm:$0xff]  }
 0x333   : > { %7343 = vmatpush3.bf16.msra.mxu1 %v8006_v33  ;;  %7330 = vmatprep.mubr.bf16.mxu1 %v3678_v26  ;;  %v4162_v33 = vshll.u32 %v9113_v13, 16  ;;  %v4135_v13 = vld [vmem:[#allocation3 + $0x18] sm:$0x1f]  ;;  %v4161_v26 = vrot.slane %v4159_v4, 4  ;;  %v3754_v49 = vor.u32 %v3753_v37, %v3750_v17  ;;  %v4215_v4 = vrot.slane %v4213_v20, 5  ;;  %v8015_v17 = vld [vmem:[%s9745_s3 + $0xc8] sm:$0xff]  }
 0x334   : > { %7344 = vmatprep.subr.bf16.mxu1 %v8007_v50  ;;  %v4184_v29 = vshrl.u32 %v4135_v13, 16  ;;  %v4187_v43 = vshll.u32 %v4135_v13, 16  ;;  %v4240_v27 = vrot.slane %v4238_v55, 5  ;;  %v4208_v37 = vsel %vm1248_vm9, %v4199_v44, %v4207_v57  ;;  %v9284_v56 = vld [vmem:[#allocation3 + $0x18] sm:$0xf] }
 0x335   : > { %v4164_v24 = vrot.slane %v4162_v33, 5  ;;  %v4220_v33 = vrot.slane %v4218_v36, 4  ;;  %v4261_v60 = vshrl.u32 %v9176_v48, 16  ;;  %v8017_v48 = vld [vmem:[%s9745_s3 + $0xd8] sm:$0xff]   ;;  %v4278_v0 = vshrl.u32 %v9194_v62, 16 }
 0x336   : > { %v4186_v38 = vrot.slane %v4184_v29, 4  ;;  %v4189_v18 = vrot.slane %v4187_v43, 5  ;;  %v8016_v29 = vld [vmem:[%s9745_s3 + $0xd0] sm:$0xff]   ;;  %v4497_v52 = vshrl.u32 %v4464_v19, 16  ;;  %v4500_v20 = vshll.u32 %v4464_v19, 16  ;;  %v8022_v19 = vld [vmem:[%s9745_s3 + $0x100] sm:$0xff]  }
 0x337   : > { %7345 = vmatpush3.bf16.msra.mxu1 %v8007_v50  ;;  %v3761_v50 = vrot.slane %v3759_v34, 4  ;;  %v4165_v35 = vor.u32 %v4164_v24, %v4161_v26  ;;  %v4212_v34 = vrot.slane %v4210_v47, 4  ;;  %v4233_v26 = vor.u32 %v4232_v51, %v4229_v9  ;;  %v4466_v55 = vld [vmem:[#allocation3 + $0x20] sm:$0xf8]  ;;  %v4468_v57 = vld [vmem:[#allocation3 + $0x30] sm:$0xf8] }
 0x338   : > { %7346 = vmatprep.subr.bf16.mxu1 %v8008_v30  ;;  %v4190_v32 = vor.u32 %v4189_v18, %v4186_v38  ;;  %v4241_v24 = vor.u32 %v4240_v27, %v4237_v41  ;;  %v4281_v38 = vshll.u32 %v9194_v62, 16  ;;  %v4289_v18 = vshll.u32 %v4141_v10, 16 }
 0x339   : > { %v3762_v54 = vor.u32 %v3761_v50, %v3758_v15  ;;  %v4244_v15 = vshrl.u32 %v9171_v8, 16  ;;  %v4247_v50 = vshll.u32 %v9171_v8, 16  ;;  %v4505_v62 = vshrl.u32 %v9284_v56, 16 }
 0x33a   : > { %7331 = vmatmul.mubr.bf16.gmra.mrb[24].mxu1 %v3695_v23  ;;  %v8013_v23 = vld [vmem:[%s9745_s3 + $0xb8] sm:$0xff]   ;;  %v4508_v2 = vshll.u32 %v9284_v56, 16  ;;  %v4280_v36 = vrot.slane %v4278_v0, 4  ;;  %v4291_v46 = vrot.slane %v4289_v18, 5  ;;  %v4502_v44 = vrot.slane %v4500_v20, 4 }
 0x33b   : > { %7347 = vmatpush3.bf16.msra.mxu1 %v8008_v30  ;;  %7334 = vmatprep.mubr.bf16.mxu1 %v3712_v63  ;;  %v4181_v30 = vrot.slane %v4179_v42, 5  ;;  %v3763_v1 = vsel %vm710_vm8, %v3754_v49, %v3762_v54  ;;  %v4221_v63 = vshll.u32 %v4137_v39, 16  ;;  %v4246_v6 = vrot.slane %v4244_v15, 4 }
 0x33c   : > { %7348 = vmatprep.subr.bf16.mxu1 %v8009_v5  ;;  %v4249_v8 = vrot.slane %v4247_v50, 5  ;;  %v4242_v54 = vsel %vm1248_vm9, %v4233_v26, %v4241_v24  ;;  %v4286_v39 = vshrl.u32 %v4141_v10, 16  ;;  %v4514_v41 = vshrl.u32 %v4466_v55, 16  ;;  %v4470_v26 = vld [vmem:[#allocation3 + $0x40] sm:$0xf8] }
 0x33d   : > { %v4182_v28 = vor.u32 %v4181_v30, %v4178_v16  ;;  %v4257_v16 = vrot.slane %v4255_v40, 5  ;;  %v4517_v27 = vshll.u32 %v4466_v55, 16  ;;  %v4548_v10 = vshrl.u32 %v4470_v26, 16 }
 0x33e   : > { %v4250_v47 = vor.u32 %v4249_v8, %v4246_v6  ;;  %v4288_v7 = vrot.slane %v4286_v39, 4  ;;  %v4516_v40 = vrot.slane %v4514_v41, 3 }
 0x33f   : > { %7349 = vmatpush3.bf16.msra.mxu1 %v8009_v5  ;;  %v4174_v5 = vsel %vm1248_vm9, %v4165_v35, %v4173_v21  ;;  %v4191_v61 = vsel %vm1248_vm9, %v4182_v28, %v4190_v32  ;;  %v4266_v35 = vrot.slane %v4264_v45, 5  ;;  %v9294_v28 = vld [vmem:[#allocation3 + $0x28] sm:$0xf] }
 0x340   : > { %7350 = vmatprep.subr.bf16.mxu1 %v8010_v53  ;;  %v4292_v51 = vor.u32 %v4291_v46, %v4288_v7  ;;  %v9324_v46 = vld [vmem:[#allocation3 + $0x68] sm:$0xf] }
 0x342   : > { %7335 = vmatmul.mubr.bf16.gmra.mrb[28].mxu1 %v3729_v14  ;;  %v4140_v14 = vld [vmem:[#allocation3 + $0x68] sm:$0x1f] }
 0x343   : > { %7351 = vmatpush3.bf16.msra.mxu1 %v8010_v53  ;;  %7338 = vmatprep.mubr.bf16.mxu1 %v3746_v25  ;;  %v4223_v53 = vrot.slane %v4221_v63, 5  ;;  %v4252_v25 = vshrl.u32 %v4139_v11, 16  ;;  %v4269_v42 = vshrl.u32 %v4140_v14, 16  ;;  %v4272_v43 = vshll.u32 %v4140_v14, 16 }
 0x344   : > { %7352 = vmatprep.subr.bf16.mxu1 %v8011_v59  ;;  %v4283_v63 = vrot.slane %v4281_v38, 5  ;;  %v4525_v11 = vshll.u32 %v9294_v28, 16 }
 0x345   : > { %v4224_v13 = vor.u32 %v4223_v53, %v4220_v33  ;;  %v4254_v22 = vrot.slane %v4252_v25, 4  ;;  %v4271_v21 = vrot.slane %v4269_v42, 4  ;;  %v4274_v30 = vrot.slane %v4272_v43, 5  ;;  %v9298_v53 = vld [vmem:[#allocation3 + $0x38] sm:$0xf] }
 0x346   : > { %v4510_v33 = vrot.slane %v4508_v2, 4  ;;  %v4284_v9 = vor.u32 %v4283_v63, %v4280_v36  ;;  %v4539_v14 = vshrl.u32 %v9298_v53, 16  ;;  %v4542_v50 = vshll.u32 %v9298_v53, 16  ;;  %v8021_v25 = vld [vmem:[%s9745_s3 + $0xf8] sm:$0xff]  }
 0x347   : > { %7353 = vmatpush3.bf16.msra.mxu1 %v8011_v59  ;;  %v4216_v59 = vor.u32 %v4215_v4, %v4212_v34  ;;  %v4507_v4 = vrot.slane %v4505_v62, 3  ;;  %v4527_v42 = vrot.slane %v4525_v11, 4 }
 0x348   : > { %7354 = vmatprep.subr.bf16.mxu1 %v8012_v12  ;;  %v4293_v24 = vsel %vm1248_vm9, %v4284_v9, %v4292_v51  ;;  %v4541_v8 = vrot.slane %v4539_v14, 3  ;;  %v4590_v9 = vshrl.u32 %v9324_v46, 16  ;;  %v8024_v51 = vld [vmem:[%s9745_s3 + $0x110] sm:$0xff]  }
 0x349   : > { %v4225_v49 = vsel %vm1248_vm9, %v4216_v59, %v4224_v13  ;;  %v8020_v59 = vld [vmem:[%s9745_s3 + $0xf0] sm:$0xff]   ;;  %v4511_v15 = vor.u32 %v4510_v33, %v4507_v4 }
 0x34a   : > { %7339 = vmatmul.mubr.bf16.gmra.mrb[32].mxu1 %v3763_v1  ;;  %v4258_v1 = vor.u32 %v4257_v16, %v4254_v22  ;;  %v4544_v22 = vrot.slane %v4542_v50, 4  ;;  %v4551_v16 = vshll.u32 %v4470_v26, 16  ;;  %v4592_v26 = vrot.slane %v4590_v9, 3  ;;  %v8032_v9 = vld [vmem:[%s9745_s3 + $0x150] sm:$0xff]  }
 0x34b   : > { %7355 = vmatpush3.bf16.msra.mxu1 %v8012_v12  ;;  %7358 = vmatprep.mubr.bf16.mxu1 %v4174_v5  ;;  %v4263_v12 = vrot.slane %v4261_v60, 4  ;;  %v4275_v5 = vor.u32 %v4274_v30, %v4271_v21  ;;  %v4519_v60 = vrot.slane %v4517_v27, 4  ;;  %v4593_v27 = vshll.u32 %v9324_v46, 16 }
 0x34c   : > { %7356 = vmatprep.subr.bf16.mxu1 %v8013_v23  ;;  %v4259_v32 = vsel %vm1248_vm9, %v4250_v47, %v4258_v1  ;;  %v4545_v1 = vor.u32 %v4544_v22, %v4541_v8  ;;  %v4553_v20 = vrot.slane %v4551_v16, 4  ;;  %v8026_v16 = vld [vmem:[%s9745_s3 + $0x120] sm:$0xff]  }
 0x34d   : > { %v4520_v30 = vor.u32 %v4519_v60, %v4516_v40 }
 0x34f   : > { %7357 = vmatpush3.bf16.msra.mxu1 %v8013_v23  ;;  %v4267_v23 = vor.u32 %v4266_v35, %v4263_v12 }
 0x350   : > { %7374 = vmatprep.subr.bf16.mxu1 %v8014_v3 }
 0x351   : > { %v4276_v34 = vsel %vm1248_vm9, %v4267_v23, %v4275_v5  ;;  %v4474_v5 = vld [vmem:[#allocation3 + $0x60] sm:$0xf8] }
 0x352   : > { %7359 = vmatmul.mubr.bf16.vlgmr.msra.gmra.mrb[20].mxu1 %v4191_v61  ;;  %v4522_v61 = vshrl.u32 %v9294_v28, 16  ;;  %v4582_v4 = vshrl.u32 %v4474_v5, 16  ;;  %v4585_v33 = vshll.u32 %v4474_v5, 16 }
 0x353   : > { %7375 = vmatpush3.bf16.msra.mxu1 %v8014_v3  ;;  %7362 = vmatprep.mubr.bf16.mxu1 %v4208_v37  ;;  %v4499_v3 = vrot.slane %v4497_v52, 3  ;;  %v4534_v37 = vshll.u32 %v4468_v57, 16  ;;  %v4550_v52 = vrot.slane %v4548_v10, 3 }
 0x354   : > { %7376 = vmatprep.subr.bf16.mxu1 %v8015_v17  ;;  %v4524_v45 = vrot.slane %v4522_v61, 3  ;;  %v4587_v50 = vrot.slane %v4585_v33, 4 }
 0x355   : > { %v4503_v13 = vor.u32 %v4502_v44, %v4499_v3  ;;  %v4536_v6 = vrot.slane %v4534_v37, 4  ;;  %v4554_v3 = vor.u32 %v4553_v20, %v4550_v52  ;;  %v8028_v20 = vld [vmem:[%s9745_s3 + $0x130] sm:$0xff]  }
 0x356   : > { %v4528_v38 = vor.u32 %v4527_v42, %v4524_v45 }
 0x357   : > { %7377 = vmatpush3.bf16.msra.mxu1 %v8015_v17  ;;  %v4531_v17 = vshrl.u32 %v4468_v57, 16  ;;  %v9330_v57 = vld [vmem:[#allocation3 + $0x78] sm:$0xf] }
 0x358   : > { %7378 = vmatprep.subr.bf16.mxu1 %v8016_v29  ;;  %v4529_v36 = vsel %vm710_vm8, %v4520_v30, %v4528_v38  ;;  %v4610_v37 = vshll.u32 %v9330_v57, 16 }
 0x359   : > { %v4533_v43 = vrot.slane %v4531_v17, 3  ;;  %v4607_v17 = vshrl.u32 %v9330_v57, 16 }
 0x35a   : > { %7363 = vmatmul.mubr.bf16.gmra.mrb[24].mxu1 %v4225_v49  ;;  %v4472_v49 = vld [vmem:[#allocation3 + $0x50] sm:$0xf8]  ;;  %v4612_v42 = vrot.slane %v4610_v37, 4  ;;  %v5034_v37 = vld [vmem:[#allocation3 + $0x18] sm:$0x1f] }
 0x35b   : > { %7379 = vmatpush3.bf16.msra.mxu1 %v8016_v29  ;;  %7366 = vmatprep.mubr.bf16.mxu1 %v4242_v54  ;;  %v9311_v29 = vld [vmem:[#allocation3 + $0x48] sm:$0xf]  ;;  %v4512_v54 = vsel %vm710_vm8, %v4503_v13, %v4511_v15  ;;  %v4565_v21 = vshrl.u32 %v4472_v49, 16  ;;  %v4568_v0 = vshll.u32 %v4472_v49, 16  ;;  %v4537_v47 = vor.u32 %v4536_v6, %v4533_v43  ;;  %v8025_v13 = vld [vmem:[%s9745_s3 + $0x118] sm:$0xff]  }
 0x35c   : > { %7380 = vmatprep.subr.bf16.mxu1 %v8017_v48  ;;  %v4556_v12 = vshrl.u32 %v9311_v29, 16  ;;  %v4559_v35 = vshll.u32 %v9311_v29, 16  ;;  %v4609_v45 = vrot.slane %v4607_v17, 3  ;;  %v9344_v43 = vld [vmem:[#allocation3 + $0x88] sm:$0xf] }
 0x35d   : > { %v4567_v62 = vrot.slane %v4565_v21, 3  ;;  %v4570_v2 = vrot.slane %v4568_v0, 4  ;;  %v4546_v55 = vsel %vm710_vm8, %v4537_v47, %v4545_v1  ;;  %v4627_v22 = vshll.u32 %v9344_v43, 16  ;;  %v9356_v47 = vld [vmem:[#allocation3 + $0x10] sm:$0xf0] }
 0x35e   : > { %v4561_v23 = vrot.slane %v4559_v35, 4  ;;  %v4613_v35 = vor.u32 %v4612_v42, %v4609_v45  ;;  %v9402_v17 = vld [vmem:[#allocation3 + $0x70] sm:$0xf0]  ;;  %v5035_v45 = vld [vmem:[#allocation3 + $0x28] sm:$0x1f] }
 0x35f   : > { %7381 = vmatpush3.bf16.msra.mxu1 %v8017_v48  ;;  %v9314_v48 = vld [vmem:[#allocation3 + $0x58] sm:$0xf] }
 0x360   : > { %7382 = vmatprep.subr.bf16.mxu1 %v8018_v58  ;;  %v4573_v39 = vshrl.u32 %v9314_v48, 16  ;;  %v4576_v18 = vshll.u32 %v9314_v48, 16 }
 0x362   : > { %7367 = vmatmul.mubr.bf16.gmra.mrb[28].mxu1 %v4259_v32  ;;  %v4575_v63 = vrot.slane %v4573_v39, 3  ;;  %v4578_v7 = vrot.slane %v4576_v18, 4  ;;  %v4476_v32 = vld [vmem:[#allocation3 + $0x70] sm:$0xf8]  ;;  %v4629_v39 = vrot.slane %v4627_v22, 4  ;;  %v8027_v18 = vld [vmem:[%s9745_s3 + $0x128] sm:$0xff]  }
 0x363   : > { %7383 = vmatpush3.bf16.msra.mxu1 %v8018_v58  ;;  %7370 = vmatprep.mubr.bf16.mxu1 %v4276_v34  ;;  %v4558_v58 = vrot.slane %v4556_v12, 3  ;;  %v4571_v34 = vor.u32 %v4570_v2, %v4567_v62  ;;  %v4599_v61 = vshrl.u32 %v4476_v32, 16  ;;  %v4602_v11 = vshll.u32 %v4476_v32, 16  ;;  %v8029_v62 = vld [vmem:[%s9745_s3 + $0x138] sm:$0xff]  }
 0x364   : > { %7384 = vmatprep.subr.bf16.mxu1 %v8019_v31  ;;  %v4579_v41 = vor.u32 %v4578_v7, %v4575_v63  ;;  %v9370_v63 = vld [vmem:[#allocation3 + $0x30] sm:$0xf0]  ;;  %v4848_v32 = vrot.slane %v9298_v53, 4  ;;  %v4851_v53 = vrot.slane %v9311_v29, 4  ;;  %v9400_v29 = vld [vmem:[#allocation3 + $0x60] sm:$0xf0] }
 0x365   : > { %v4562_v44 = vor.u32 %v4561_v23, %v4558_v58  ;;  %v4601_v40 = vrot.slane %v4599_v61, 3  ;;  %v4604_v60 = vrot.slane %v4602_v11, 4  ;;  %v4841_v58 = vrot.slane %v9356_v47, 4  ;;  %v8033_v61 = vld [vmem:[%s9745_s3 + $0x158] sm:$0xff]  }
 0x366   : > { %v4580_v15 = vsel %vm710_vm8, %v4571_v34, %v4579_v41  ;;  %v4842_v23 = vrot.slane %v9284_v56, 4  ;;  %v4845_v56 = vrot.slane %v9294_v28, 4  ;;  %v9384_v28 = vld [vmem:[#allocation3 + $0x40] sm:$0xf0]  ;;  %v4854_v41 = vrot.slane %v9314_v48, 4 }
 0x367   : > { %7385 = vmatpush3.bf16.msra.mxu1 %v8019_v31  ;;  %v8023_v31 = vld [vmem:[%s9745_s3 + $0x108] sm:$0xff]   ;;  %v4563_v14 = vsel %vm710_vm8, %v4554_v3, %v4562_v44  ;;  %v4605_v12 = vor.u32 %v4604_v60, %v4601_v40  ;;  %v4850_v33 = vrot.slane %v9384_v28, 4  ;;  %v4856_v48 = vrot.slane %v9400_v29, 4  ;;  %v9413_v40 = vld [vmem:[#allocation3 + $0x80] sm:$0xf0] }
 0x368   : > { %7386 = vmatprep.subr.bf16.mxu1 %v8020_v59  ;;  %v4843_v2 = vsel %vm912_vm2, %v4841_v58, %v4842_v23  ;;  %v8031_v44 = vld [vmem:[%s9745_s3 + $0x148] sm:$0xff]   ;;  %v4863_v22 = vrot.slane %v9344_v43, 4 }
 0x36a   : > { %7371 = vmatmul.mubr.bf16.gmra.mrb[32].mxu1 %v4293_v24  ;;  %v4595_v24 = vrot.slane %v4593_v27, 4  ;;  %v4852_v27 = vsel %vm912_vm2, %v4850_v33, %v4851_v53 }
 0x36b   : > { %7387 = vmatpush3.bf16.msra.mxu1 %v8020_v59  ;;  %7390 = vmatprep.mubr.bf16.mxu1 %v4512_v54  ;;  %v4584_v59 = vrot.slane %v4582_v4, 3  ;;  %v4624_v54 = vshrl.u32 %v9344_v43, 16  ;;  %v9386_v4 = vld [vmem:[#allocation3 + $0x50] sm:$0xf0] }
 0x36c   : > { %7388 = vmatprep.subr.bf16.mxu1 %v8021_v25  ;;  %v4596_v49 = vor.u32 %v4595_v24, %v4592_v26  ;;  %v5062_v26 = vshll.u32 %v9356_v47, 16  ;;  %v5067_v24 = vshrl.u32 %v5034_v37, 16  ;;  %v8036_v43 = vld [vmem:[%s9745_s3 + $0x170] sm:$0xff]  }
 0x36d   : > { %v4588_v10 = vor.u32 %v4587_v50, %v4584_v59  ;;  %v4626_v38 = vrot.slane %v4624_v54, 3  ;;  %v4859_v59 = vrot.slane %v9402_v17, 4  ;;  %v5059_v50 = vshrl.u32 %v9356_v47, 16 }
 0x36e   : > { %v4862_v54 = vrot.slane %v9413_v40, 4 }
 0x36f   : > { %7389 = vmatpush3.bf16.msra.mxu1 %v8021_v25  ;;  %v4478_v25 = vld [vmem:[#allocation3 + $0x80] sm:$0xf8]  ;;  %v4597_v30 = vsel %vm710_vm8, %v4588_v10, %v4596_v49  ;;  %v4630_v52 = vor.u32 %v4629_v39, %v4626_v38  ;;  %v5061_v42 = vrot.slane %v5059_v50, 4  ;;  %v5036_v49 = vld [vmem:[#allocation3 + $0x38] sm:$0x1f] }
 0x370   : > { %7406 = vmatprep.subr.bf16.mxu1 %v8022_v19  ;;  %v4616_v6 = vshrl.u32 %v4478_v25, 16  ;;  %v4619_v8 = vshll.u32 %v4478_v25, 16  ;;  %v5070_v25 = vshll.u32 %v5034_v37, 16  ;;  %v5101_v38 = vshrl.u32 %v5036_v49, 16 }
 0x371   : > { %v5104_v39 = vshll.u32 %v5036_v49, 16  ;;  %v4864_v47 = vsel %vm912_vm2, %v4862_v54, %v4863_v22  ;;  %v8040_v49 = vld [vmem:[%s9745_s3 + $0x190] sm:$0xff]  }
 0x372   : > { %7391 = vmatmul.mubr.bf16.vlgmr.msra.gmra.mrb[20].mxu1 %v4529_v36  ;;  %v4618_v21 = vrot.slane %v4616_v6, 3  ;;  %v4621_v0 = vrot.slane %v4619_v8, 4  ;;  %v9368_v36 = vld [vmem:[#allocation3 + $0x20] sm:$0xf0]  ;;  %v5064_v6 = vrot.slane %v5062_v26, 5  ;;  %v5069_v8 = vrot.slane %v5067_v24, 4 }
 0x373   : > { %7407 = vmatpush3.bf16.msra.mxu1 %v8022_v19  ;;  %7394 = vmatprep.mubr.bf16.mxu1 %v4546_v55  ;;  %v4614_v19 = vsel %vm710_vm8, %v4605_v12, %v4613_v35  ;;  %v4844_v7 = vrot.slane %v9368_v36, 4  ;;  %v4847_v55 = vrot.slane %v9370_v63, 4  ;;  %v5072_v10 = vrot.slane %v5070_v25, 5  ;;  %v5040_v25 = vld [vmem:[#allocation3 + $0x78] sm:$0x1f] }
 0x374   : > { %7408 = vmatprep.subr.bf16.mxu1 %v8023_v31  ;;  %v4622_v1 = vor.u32 %v4621_v0, %v4618_v21  ;;  %v5079_v12 = vshll.u32 %v9368_v36, 16  ;;  %v5084_v35 = vshrl.u32 %v5035_v45, 16  ;;  %v5087_v21 = vshll.u32 %v5035_v45, 16 }
 0x375   : > { %v4846_v3 = vsel %vm912_vm2, %v4844_v7, %v4845_v56  ;;  %v4849_v34 = vsel %vm912_vm2, %v4847_v55, %v4848_v32  ;;  %v5093_v0 = vshrl.u32 %v9370_v63, 16  ;;  %v5037_v7 = vld [vmem:[#allocation3 + $0x48] sm:$0x1f]  ;;  %v5038_v56 = vld [vmem:[#allocation3 + $0x58] sm:$0x1f]  ;;  %v5110_v32 = vshrl.u32 %v9384_v28, 16 }
 0x376   : > { %v4631_v5 = vsel %vm710_vm8, %v4622_v1, %v4630_v52  ;;  %v5081_v52 = vrot.slane %v5079_v12, 5  ;;  %v5089_v58 = vrot.slane %v5087_v21, 5  ;;  %v5118_v33 = vshrl.u32 %v5037_v7, 16 }
 0x377   : > { %7409 = vmatpush3.bf16.msra.mxu1 %v8023_v31  ;;  %v8030_v31 = vld [vmem:[%s9745_s3 + $0x140] sm:$0xff]   ;;  %v5095_v23 = vrot.slane %v5093_v0, 4  ;;  %v5121_v53 = vshll.u32 %v5037_v7, 16  ;;  %v5172_v12 = vshll.u32 %v5040_v25, 16 }
 0x378   : > { %7410 = vmatprep.subr.bf16.mxu1 %v8024_v51  ;;  %v8042_v7 = vld [vmem:[%s9745_s3 + $0x1a0] sm:$0xff]  }
 0x37a   : > { %7395 = vmatmul.mubr.bf16.gmra.mrb[24].mxu1 %v4563_v14  ;;  %v4857_v14 = vrot.slane %v9324_v46, 4 }
 0x37b   : > { %7411 = vmatpush3.bf16.msra.mxu1 %v8024_v51  ;;  %7398 = vmatprep.mubr.bf16.mxu1 %v4580_v15  ;;  %v4853_v51 = vrot.slane %v9386_v4, 4  ;;  %v8034_v15 = vld [vmem:[%s9745_s3 + $0x160] sm:$0xff]  }
 0x37c   : > { %7412 = vmatprep.subr.bf16.mxu1 %v8025_v13  ;;  %v4858_v46 = vsel %vm912_vm2, %v4856_v48, %v4857_v14  ;;  %v5120_v14 = vrot.slane %v5118_v33, 4 }
 0x37d   : > { %v4855_v11 = vsel %vm912_vm2, %v4853_v51, %v4854_v41  ;;  %v5127_v51 = vshrl.u32 %v9386_v4, 16  ;;  %v5130_v41 = vshll.u32 %v9386_v4, 16 }
 0x37f   : > { %7413 = vmatpush3.bf16.msra.mxu1 %v8025_v13  ;;  %v4860_v13 = vrot.slane %v9330_v57, 4  ;;  %v8035_v57 = vld [vmem:[%s9745_s3 + $0x168] sm:$0xff]   ;;  %v5129_v50 = vrot.slane %v5127_v51, 4  ;;  %v5132_v26 = vrot.slane %v5130_v41, 5 }
 0x380   : > { %7414 = vmatprep.subr.bf16.mxu1 %v8026_v16  ;;  %v8043_v41 = vld [vmem:[%s9745_s3 + $0x1a8] sm:$0xff]  }
 0x381   : > { %v4861_v60 = vsel %vm912_vm2, %v4859_v59, %v4860_v13  ;;  %v5123_v59 = vrot.slane %v5121_v53, 5  ;;  %v5039_v13 = vld [vmem:[#allocation3 + $0x68] sm:$0x1f]  ;;  %v5133_v54 = vor.u32 %v5132_v26, %v5129_v50 }
 0x382   : > { %7399 = vmatmul.mubr.bf16.gmra.mrb[28].mxu1 %v4597_v30  ;;  %v5096_v30 = vshll.u32 %v9370_v63, 16  ;;  %v5155_v45 = vshll.u32 %v5039_v13, 16 }
 0x383   : > { %7415 = vmatpush3.bf16.msra.mxu1 %v8026_v16  ;;  %7402 = vmatprep.mubr.bf16.mxu1 %v4614_v19  ;;  %v5076_v16 = vshrl.u32 %v9368_v36, 16  ;;  %v5073_v19 = vor.u32 %v5072_v10, %v5069_v8  ;;  %v8037_v36 = vld [vmem:[%s9745_s3 + $0x178] sm:$0xff]   ;;  %v5161_v8 = vshrl.u32 %v9402_v17, 16  ;;  %v5164_v10 = vshll.u32 %v9402_v17, 16 }
 0x384   : > { %7416 = vmatprep.subr.bf16.mxu1 %v8027_v18  ;;  %v5157_v0 = vrot.slane %v5155_v45, 5  ;;  %v8041_v17 = vld [vmem:[%s9745_s3 + $0x198] sm:$0xff]  }
 0x385   : > { %v5078_v1 = vrot.slane %v5076_v16, 4  ;;  %v5169_v16 = vshrl.u32 %v5040_v25, 16  ;;  %v8044_v25 = vld [vmem:[%s9745_s3 + $0x1b0] sm:$0xff]  }
 0x387   : > { %7417 = vmatpush3.bf16.msra.mxu1 %v8027_v18  ;;  %v5065_v18 = vor.u32 %v5064_v6, %v5061_v42  ;;  %v5124_v6 = vor.u32 %v5123_v59, %v5120_v14 }
 0x388   : > { %7418 = vmatprep.subr.bf16.mxu1 %v8028_v20 }
 0x389   : > { %v5074_v63 = vsel %vm1248_vm9, %v5065_v18, %v5073_v19  ;;  %v5171_v18 = vrot.slane %v5169_v16, 4  ;;  %v5174_v19 = vrot.slane %v5172_v12, 5  ;;  %v5370_v12 = vld [vmem:[#allocation3 + $0x50] sm:$0xf8] }
 0x38a   : > { %7403 = vmatmul.mubr.bf16.gmra.mrb[32].mxu1 %v4631_v5  ;;  %v5098_v5 = vrot.slane %v5096_v30, 5 }
 0x38b   : > { %7419 = vmatpush3.bf16.msra.mxu1 %v8028_v20  ;;  %7422 = vmatprep.mubr.bf16.mxu1 %v4843_v2  ;;  %v5086_v20 = vrot.slane %v5084_v35, 4  ;;  %v5106_v2 = vrot.slane %v5104_v39, 5  ;;  %v5166_v39 = vrot.slane %v5164_v10, 5 }
 0x38c   : > { %7420 = vmatprep.subr.bf16.mxu1 %v8029_v62 }
 0x38d   : > { %v5090_v55 = vor.u32 %v5089_v58, %v5086_v20 }
 0x38f   : > { %7421 = vmatpush3.bf16.msra.mxu1 %v8029_v62  ;;  %v5103_v62 = vrot.slane %v5101_v38, 4  ;;  %v5163_v38 = vrot.slane %v5161_v8, 4 }
 0x390   : > { %7438 = vmatprep.subr.bf16.mxu1 %v8030_v31 }
 0x392   : > { %7423 = vmatmul.mubr.bf16.vlgmr.msra.gmra.mrb[20].mxu1 %v4846_v3  ;;  %v5113_v3 = vshll.u32 %v9384_v28, 16  ;;  %v5112_v28 = vrot.slane %v5110_v32, 4 }
 0x393   : > { %7439 = vmatpush3.bf16.msra.mxu1 %v8030_v31  ;;  %7426 = vmatprep.mubr.bf16.mxu1 %v4849_v34  ;;  %v5082_v31 = vor.u32 %v5081_v52, %v5078_v1  ;;  %v5107_v34 = vor.u32 %v5106_v2, %v5103_v62  ;;  %v5364_v1 = vld [vmem:[#allocation3 + $0x20] sm:$0xf8]  ;;  %v9458_v52 = vld [vmem:[#allocation3 + $0x28] sm:$0xf]  ;;  %v5167_v62 = vor.u32 %v5166_v39, %v5163_v38 }
 0x394   : > { %7440 = vmatprep.subr.bf16.mxu1 %v8031_v44  ;;  %v5115_v48 = vrot.slane %v5113_v3, 5  ;;  %v5408_v32 = vshll.u32 %v9458_v52, 16 }
 0x396   : > { %v5116_v42 = vor.u32 %v5115_v48, %v5112_v28  ;;  %v5410_v28 = vrot.slane %v5408_v32, 4 }
 0x397   : > { %7441 = vmatpush3.bf16.msra.mxu1 %v8031_v44  ;;  %v5099_v44 = vor.u32 %v5098_v5, %v5095_v23  ;;  %v5178_v23 = vshrl.u32 %v9413_v40, 16  ;;  %v5181_v5 = vshll.u32 %v9413_v40, 16 }
 0x398   : > { %7442 = vmatprep.subr.bf16.mxu1 %v8032_v9  ;;  %v5125_v30 = vsel %vm1248_vm9, %v5116_v42, %v5124_v6 }
 0x399   : > { %v5108_v37 = vsel %vm1248_vm9, %v5099_v44, %v5107_v34  ;;  %v5180_v40 = vrot.slane %v5178_v23, 4  ;;  %v5366_v44 = vld [vmem:[#allocation3 + $0x30] sm:$0xf8]  ;;  %v9468_v34 = vld [vmem:[#allocation3 + $0x38] sm:$0xf]  ;;  %v5183_v33 = vrot.slane %v5181_v5, 5 }
 0x39a   : > { %7427 = vmatmul.mubr.bf16.gmra.mrb[24].mxu1 %v4852_v27  ;;  %v5135_v27 = vshrl.u32 %v5038_v56, 16  ;;  %v5414_v48 = vshrl.u32 %v5366_v44, 16  ;;  %v5417_v14 = vshll.u32 %v5366_v44, 16  ;;  %v5422_v59 = vshrl.u32 %v9468_v34, 16  ;;  %v8046_v5 = vld [vmem:[%s9745_s3 + $0x1c0] sm:$0xff]  }
 0x39b   : > { %7443 = vmatpush3.bf16.msra.mxu1 %v8032_v9  ;;  %7430 = vmatprep.mubr.bf16.mxu1 %v4855_v11  ;;  %v8038_v9 = vld [vmem:[%s9745_s3 + $0x180] sm:$0xff]   ;;  %v5091_v11 = vsel %vm1248_vm9, %v5082_v31, %v5090_v55  ;;  %v5400_v31 = vshll.u32 %v5364_v1, 16  ;;  %v5405_v55 = vshrl.u32 %v9458_v52, 16  ;;  %v5184_v50 = vor.u32 %v5183_v33, %v5180_v40  ;;  %v5374_v44 = vld [vmem:[#allocation3 + $0x70] sm:$0xf8]  ;;  %v8047_v33 = vld [vmem:[%s9745_s3 + $0x1c8] sm:$0xff]  }
 0x39c   : > { %7444 = vmatprep.subr.bf16.mxu1 %v8033_v61  ;;  %v5137_v4 = vrot.slane %v5135_v27, 4  ;;  %v5416_v42 = vrot.slane %v5414_v48, 3  ;;  %v5419_v6 = vrot.slane %v5417_v14, 4  ;;  %v5424_v8 = vrot.slane %v5422_v59, 3 }
 0x39e   : > { %v5420_v38 = vor.u32 %v5419_v6, %v5416_v42 }
 0x39f   : > { %7445 = vmatpush3.bf16.msra.mxu1 %v8033_v61  ;;  %v5138_v61 = vshll.u32 %v5038_v56, 16  ;;  %v5175_v56 = vor.u32 %v5174_v19, %v5171_v18  ;;  %v5451_v18 = vshll.u32 %v5370_v12, 16 }
 0x3a0   : > { %7446 = vmatprep.subr.bf16.mxu1 %v8034_v15 }
 0x3a1   : > { %v5140_v24 = vrot.slane %v5138_v61, 5  ;;  %v5176_v27 = vsel %vm1248_vm9, %v5167_v62, %v5175_v56  ;;  %v5402_v61 = vrot.slane %v5400_v31, 4 }
 0x3a2   : > { %7431 = vmatmul.mubr.bf16.gmra.mrb[28].mxu1 %v4858_v46  ;;  %v5144_v46 = vshrl.u32 %v9400_v29, 16 }
 0x3a3   : > { %7447 = vmatpush3.bf16.msra.mxu1 %v8034_v15  ;;  %7434 = vmatprep.mubr.bf16.mxu1 %v4861_v60  ;;  %v8039_v15 = vld [vmem:[%s9745_s3 + $0x188] sm:$0xff]   ;;  %v5152_v60 = vshrl.u32 %v5039_v13, 16  ;;  %v5141_v22 = vor.u32 %v5140_v24, %v5137_v4  ;;  %v5425_v13 = vshll.u32 %v9468_v34, 16 }
 0x3a4   : > { %7448 = vmatprep.subr.bf16.mxu1 %v8035_v57 }
 0x3a5   : > { %v5154_v21 = vrot.slane %v5152_v60, 4  ;;  %v5427_v10 = vrot.slane %v5425_v13, 4  ;;  %v8048_v13 = vld [vmem:[%s9745_s3 + $0x1d0] sm:$0xff]  }
 0x3a7   : > { %7449 = vmatpush3.bf16.msra.mxu1 %v8035_v57  ;;  %v5147_v57 = vshll.u32 %v9400_v29, 16  ;;  %v5146_v29 = vrot.slane %v5144_v46, 4  ;;  %v5158_v58 = vor.u32 %v5157_v0, %v5154_v21  ;;  %v5428_v39 = vor.u32 %v5427_v10, %v5424_v8  ;;  %v5378_v8 = vld [vmem:[#allocation3 + $0x90] sm:$0xf8] }
 0x3a8   : > { %7450 = vmatprep.subr.bf16.mxu1 %v8036_v43 }
 0x3a9   : > { %v5149_v35 = vrot.slane %v5147_v57, 5 }
 0x3aa   : > { %7435 = vmatmul.mubr.bf16.gmra.mrb[32].mxu1 %v4864_v47  ;;  %v5041_v47 = vld [vmem:[#allocation3 + $0x88] sm:$0x1f] }
 0x3ab   : > { %7451 = vmatpush3.bf16.msra.mxu1 %v8036_v43  ;;  %7454 = vmatprep.mubr.bf16.mxu1 %v5074_v63  ;;  %v5142_v43 = vsel %vm1248_vm9, %v5133_v54, %v5141_v22  ;;  %v5150_v20 = vor.u32 %v5149_v35, %v5146_v29  ;;  %v5186_v2 = vshrl.u32 %v5041_v47, 16  ;;  %v5397_v63 = vshrl.u32 %v5364_v1, 16  ;;  %v9487_v29 = vld [vmem:[#allocation3 + $0x58] sm:$0xf] }
 0x3ac   : > { %7452 = vmatprep.subr.bf16.mxu1 %v8037_v36  ;;  %v5456_v19 = vshrl.u32 %v9487_v29, 16 }
 0x3ad   : > { %v5159_v3 = vsel %vm1248_vm9, %v5150_v20, %v5158_v58  ;;  %v5188_v53 = vrot.slane %v5186_v2, 4  ;;  %v5399_v51 = vrot.slane %v5397_v63, 3 }
 0x3ae   : > { %v5458_v56 = vrot.slane %v5456_v19, 3 }
 0x3af   : > { %7453 = vmatpush3.bf16.msra.mxu1 %v8037_v36  ;;  %v5189_v36 = vshll.u32 %v5041_v47, 16  ;;  %v5403_v46 = vor.u32 %v5402_v61, %v5399_v51  ;;  %v5459_v47 = vshll.u32 %v9487_v29, 16  ;;  %v5376_v51 = vld [vmem:[#allocation3 + $0x80] sm:$0xf8] }
 0x3b0   : > { %7470 = vmatprep.subr.bf16.mxu1 %v8038_v9 }
 0x3b1   : > { %v5461_v31 = vrot.slane %v5459_v47, 4 }
 0x3b2   : > { %7455 = vmatmul.mubr.bf16.vlgmr.msra.gmra.mrb[20].mxu1 %v5091_v11  ;;  %v5407_v11 = vrot.slane %v5405_v55, 3 }
 0x3b3   : > { %7471 = vmatpush3.bf16.msra.mxu1 %v8038_v9  ;;  %7458 = vmatprep.mubr.bf16.mxu1 %v5108_v37  ;;  %v5191_v9 = vrot.slane %v5189_v36, 5  ;;  %v5368_v37 = vld [vmem:[#allocation3 + $0x40] sm:$0xf8]  ;;  %v5429_v36 = vsel %vm710_vm8, %v5420_v38, %v5428_v39  ;;  %v5462_v61 = vor.u32 %v5461_v31, %v5458_v56  ;;  %v5742_v56 = vrot.slane %v9458_v52, 4 }
 0x3b4   : > { %7472 = vmatprep.subr.bf16.mxu1 %v8039_v15  ;;  %v5431_v4 = vshrl.u32 %v5368_v37, 16  ;;  %v5434_v24 = vshll.u32 %v5368_v37, 16  ;;  %v5411_v57 = vor.u32 %v5410_v28, %v5407_v11  ;;  %v5482_v11 = vshrl.u32 %v5374_v44, 16  ;;  %v8050_v39 = vld [vmem:[%s9745_s3 + $0x1e0] sm:$0xff]  }
 0x3b5   : > { %v5192_v26 = vor.u32 %v5191_v9, %v5188_v53  ;;  %v9504_v9 = vld [vmem:[#allocation3 + $0x78] sm:$0xf]  ;;  %v5485_v28 = vshll.u32 %v5374_v44, 16  ;;  %v5745_v52 = vrot.slane %v9468_v34, 4  ;;  %v9560_v34 = vld [vmem:[#allocation3 + $0x50] sm:$0xf0] }
 0x3b6   : > { %v5433_v22 = vrot.slane %v5431_v4, 3  ;;  %v5436_v16 = vrot.slane %v5434_v24, 4  ;;  %v5412_v35 = vsel %vm710_vm8, %v5403_v46, %v5411_v57  ;;  %v5490_v14 = vshrl.u32 %v9504_v9, 16 }
 0x3b7   : > { %7473 = vmatpush3.bf16.msra.mxu1 %v8039_v15  ;;  %v9476_v15 = vld [vmem:[#allocation3 + $0x48] sm:$0xf]  ;;  %v5193_v54 = vsel %vm1248_vm9, %v5184_v50, %v5192_v26  ;;  %v5493_v59 = vshll.u32 %v9504_v9, 16  ;;  %v5499_v50 = vshrl.u32 %v5376_v51, 16  ;;  %v5502_v26 = vshll.u32 %v5376_v51, 16 }
 0x3b8   : > { %7474 = vmatprep.subr.bf16.mxu1 %v8040_v49  ;;  %v5439_v60 = vshrl.u32 %v9476_v15, 16  ;;  %v5442_v45 = vshll.u32 %v9476_v15, 16  ;;  %v5437_v62 = vor.u32 %v5436_v16, %v5433_v22  ;;  %v5487_v46 = vrot.slane %v5485_v28, 4  ;;  %v9520_v16 = vld [vmem:[#allocation3 + $0x98] sm:$0xf] }
 0x3b9   : > { %v5492_v42 = vrot.slane %v5490_v14, 3  ;;  %v5495_v6 = vrot.slane %v5493_v59, 4  ;;  %v5501_v10 = vrot.slane %v5499_v50, 3  ;;  %v5527_v38 = vshll.u32 %v9520_v16, 16  ;;  %v9562_v28 = vld [vmem:[#allocation3 + $0x60] sm:$0xf0] }
 0x3ba   : > { %7459 = vmatmul.mubr.bf16.gmra.mrb[24].mxu1 %v5125_v30  ;;  %v5441_v21 = vrot.slane %v5439_v60, 3  ;;  %v5444_v0 = vrot.slane %v5442_v45, 4  ;;  %v5372_v30 = vld [vmem:[#allocation3 + $0x60] sm:$0xf8]  ;;  %v8049_v60 = vld [vmem:[%s9745_s3 + $0x1d8] sm:$0xff]   ;;  %v5748_v51 = vrot.slane %v9476_v15, 4 }
 0x3bb   : > { %7475 = vmatpush3.bf16.msra.mxu1 %v8040_v49  ;;  %7462 = vmatprep.mubr.bf16.mxu1 %v5142_v43  ;;  %v8045_v49 = vld [vmem:[%s9745_s3 + $0x1b8] sm:$0xff]   ;;  %v5448_v43 = vshrl.u32 %v5370_v12, 16  ;;  %v5465_v1 = vshrl.u32 %v5372_v30, 16  ;;  %v5468_v20 = vshll.u32 %v5372_v30, 16  ;;  %v5524_v30 = vshrl.u32 %v9520_v16, 16 }
 0x3bc   : > { %7476 = vmatprep.subr.bf16.mxu1 %v8041_v17  ;;  %v5445_v2 = vor.u32 %v5444_v0, %v5441_v21  ;;  %v5496_v21 = vor.u32 %v5495_v6, %v5492_v42  ;;  %v5519_v0 = vshll.u32 %v5378_v8, 16  ;;  %v5751_v15 = vrot.slane %v9487_v29, 4  ;;  %v9572_v50 = vld [vmem:[#allocation3 + $0x70] sm:$0xf0]  ;;  %v8058_v42 = vld [vmem:[%s9745_s3 + $0x220] sm:$0xff]  }
 0x3bd   : > { %v5450_v63 = vrot.slane %v5448_v43, 3  ;;  %v5467_v55 = vrot.slane %v5465_v1, 3  ;;  %v5470_v32 = vrot.slane %v5468_v20, 4  ;;  %v5526_v20 = vrot.slane %v5524_v30, 3 }
 0x3be   : > { %v5446_v53 = vsel %vm710_vm8, %v5437_v62, %v5445_v2  ;;  %v5521_v1 = vrot.slane %v5519_v0, 4  ;;  %v9532_v62 = vld [vmem:[#allocation3 + $0x20] sm:$0xf0]  ;;  %v5753_v14 = vrot.slane %v9562_v28, 4  ;;  %v9594_v0 = vld [vmem:[#allocation3 + $0x90] sm:$0xf0] }
 0x3bf   : > { %7477 = vmatpush3.bf16.msra.mxu1 %v8041_v17  ;;  %v9490_v17 = vld [vmem:[#allocation3 + $0x68] sm:$0xf]  ;;  %v5471_v37 = vor.u32 %v5470_v32, %v5467_v55  ;;  %v8053_v55 = vld [vmem:[%s9745_s3 + $0x1f8] sm:$0xff]  }
 0x3c0   : > { %7478 = vmatprep.subr.bf16.mxu1 %v8042_v7  ;;  %v5473_v58 = vshrl.u32 %v9490_v17, 16  ;;  %v5476_v23 = vshll.u32 %v9490_v17, 16  ;;  %v5754_v59 = vrot.slane %v9490_v17, 4  ;;  %v5757_v17 = vrot.slane %v9504_v9, 4  ;;  %v5935_v9 = vld [vmem:[#allocation3 + $0x38] sm:$0x1f] }
 0x3c2   : > { %7463 = vmatmul.mubr.bf16.gmra.mrb[28].mxu1 %v5159_v3  ;;  %v5475_v3 = vrot.slane %v5473_v58, 3  ;;  %v5478_v40 = vrot.slane %v5476_v23, 4  ;;  %v5529_v58 = vrot.slane %v5527_v38, 4  ;;  %v8051_v23 = vld [vmem:[%s9745_s3 + $0x1e8] sm:$0xff]   ;;  %v5755_v29 = vsel %vm912_vm2, %v5753_v14, %v5754_v59 }
 0x3c3   : > { %7479 = vmatpush3.bf16.msra.mxu1 %v8042_v7  ;;  %7466 = vmatprep.mubr.bf16.mxu1 %v5176_v27  ;;  %v5453_v7 = vrot.slane %v5451_v18, 4  ;;  %v5984_v38 = vshrl.u32 %v5935_v9, 16 }
 0x3c4   : > { %7480 = vmatprep.subr.bf16.mxu1 %v8043_v41  ;;  %v5479_v48 = vor.u32 %v5478_v40, %v5475_v3  ;;  %v9544_v3 = vld [vmem:[#allocation3 + $0x30] sm:$0xf0]  ;;  %v9546_v40 = vld [vmem:[#allocation3 + $0x40] sm:$0xf0] }
 0x3c5   : > { %v5454_v27 = vor.u32 %v5453_v7, %v5450_v63  ;;  %v8052_v63 = vld [vmem:[%s9745_s3 + $0x1f0] sm:$0xff]   ;;  %v5741_v7 = vrot.slane %v9532_v62, 4  ;;  %v5744_v44 = vrot.slane %v9544_v3, 4  ;;  %v5976_v30 = vshrl.u32 %v9544_v3, 16 }
 0x3c6   : > { %v5480_v45 = vsel %vm710_vm8, %v5471_v37, %v5479_v48  ;;  %v5750_v37 = vrot.slane %v9560_v34, 4  ;;  %v8056_v48 = vld [vmem:[%s9745_s3 + $0x210] sm:$0xff]  }
 0x3c7   : > { %7481 = vmatpush3.bf16.msra.mxu1 %v8043_v41  ;;  %v9506_v41 = vld [vmem:[#allocation3 + $0x88] sm:$0xf]  ;;  %v5463_v57 = vsel %vm710_vm8, %v5454_v27, %v5462_v61  ;;  %v5743_v32 = vsel %vm912_vm2, %v5741_v7, %v5742_v56  ;;  %v5746_v27 = vsel %vm912_vm2, %v5744_v44, %v5745_v52  ;;  %v8061_v56 = vld [vmem:[%s9745_s3 + $0x238] sm:$0xff]  }
 0x3c8   : > { %7482 = vmatprep.subr.bf16.mxu1 %v8044_v25  ;;  %v5507_v4 = vshrl.u32 %v9506_v41, 16  ;;  %v5510_v24 = vshll.u32 %v9506_v41, 16  ;;  %v8055_v61 = vld [vmem:[%s9745_s3 + $0x208] sm:$0xff]  }
 0x3c9   : > { %v5938_v52 = vld [vmem:[#allocation3 + $0x68] sm:$0x1f] }
 0x3ca   : > { %7467 = vmatmul.mubr.bf16.gmra.mrb[32].mxu1 %v5193_v54  ;;  %v5509_v54 = vrot.slane %v5507_v4, 3  ;;  %v5512_v22 = vrot.slane %v5510_v24, 4  ;;  %v5934_v4 = vld [vmem:[#allocation3 + $0x28] sm:$0x1f]  ;;  %v9578_v24 = vld [vmem:[#allocation3 + $0x80] sm:$0xf0] }
 0x3cb   : > { %7483 = vmatpush3.bf16.msra.mxu1 %v8044_v25  ;;  %7486 = vmatprep.mubr.bf16.mxu1 %v5412_v35  ;;  %v5484_v25 = vrot.slane %v5482_v11, 3  ;;  %v5516_v35 = vshrl.u32 %v5378_v8, 16  ;;  %v5759_v6 = vrot.slane %v9578_v24, 4  ;;  %v5760_v8 = vrot.slane %v9506_v41, 4 }
 0x3cc   : > { %7484 = vmatprep.subr.bf16.mxu1 %v8045_v49  ;;  %v5513_v18 = vor.u32 %v5512_v22, %v5509_v54  ;;  %v5979_v41 = vshll.u32 %v9544_v3, 16  ;;  %v6038_v14 = vshll.u32 %v5938_v52, 16 }
 0x3cd   : > { %v5488_v12 = vor.u32 %v5487_v46, %v5484_v25  ;;  %v5518_v19 = vrot.slane %v5516_v35, 3  ;;  %v5756_v25 = vrot.slane %v9572_v50, 4  ;;  %v5959_v46 = vshrl.u32 %v9532_v62, 16  ;;  %v8059_v35 = vld [vmem:[%s9745_s3 + $0x228] sm:$0xff]  }
 0x3cf   : > { %7485 = vmatpush3.bf16.msra.mxu1 %v8045_v49  ;;  %v5504_v49 = vrot.slane %v5502_v26, 4  ;;  %v5497_v47 = vsel %vm710_vm8, %v5488_v12, %v5496_v21  ;;  %v5522_v2 = vor.u32 %v5521_v1, %v5518_v19  ;;  %v8057_v26 = vld [vmem:[%s9745_s3 + $0x218] sm:$0xff]   ;;  %v5761_v21 = vsel %vm912_vm2, %v5759_v6, %v5760_v8 }
 0x3d0   : > { %7502 = vmatprep.subr.bf16.mxu1 %v8046_v5  ;;  %v5763_v19 = vrot.slane %v9520_v16, 4  ;;  %v6044_v6 = vshrl.u32 %v9572_v50, 16  ;;  %v6047_v8 = vshll.u32 %v9572_v50, 16 }
 0x3d1   : > { %v5505_v43 = vor.u32 %v5504_v49, %v5501_v10  ;;  %v5758_v10 = vsel %vm912_vm2, %v5756_v25, %v5757_v17  ;;  %v5961_v49 = vrot.slane %v5959_v46, 4 }
 0x3d2   : > { %7487 = vmatmul.mubr.bf16.vlgmr.msra.gmra.mrb[20].mxu1 %v5429_v36  ;;  %v5530_v36 = vor.u32 %v5529_v58, %v5526_v20  ;;  %v8060_v20 = vld [vmem:[%s9745_s3 + $0x230] sm:$0xff]   ;;  %v5993_v58 = vshrl.u32 %v9546_v40, 16 }
 0x3d3   : > { %7503 = vmatpush3.bf16.msra.mxu1 %v8046_v5  ;;  %7490 = vmatprep.mubr.bf16.mxu1 %v5446_v53  ;;  %v5514_v5 = vsel %vm710_vm8, %v5505_v43, %v5513_v18  ;;  %v5747_v53 = vrot.slane %v9546_v40, 4  ;;  %v5936_v43 = vld [vmem:[#allocation3 + $0x48] sm:$0x1f]  ;;  %v5762_v18 = vrot.slane %v9594_v0, 4 }
 0x3d4   : > { %7504 = vmatprep.subr.bf16.mxu1 %v8047_v33  ;;  %v5531_v31 = vsel %vm710_vm8, %v5522_v2, %v5530_v36  ;;  %v5978_v2 = vrot.slane %v5976_v30, 4  ;;  %v5981_v36 = vrot.slane %v5979_v41, 5 }
 0x3d5   : > { %v5749_v11 = vsel %vm912_vm2, %v5747_v53, %v5748_v51  ;;  %v5764_v16 = vsel %vm912_vm2, %v5762_v18, %v5763_v19  ;;  %v6010_v51 = vshrl.u32 %v9560_v34, 16 }
 0x3d7   : > { %7505 = vmatpush3.bf16.msra.mxu1 %v8047_v33  ;;  %v8054_v33 = vld [vmem:[%s9745_s3 + $0x200] sm:$0xff]  }
 0x3d8   : > { %7506 = vmatprep.subr.bf16.mxu1 %v8048_v13 }
 0x3da   : > { %7491 = vmatmul.mubr.bf16.gmra.mrb[24].mxu1 %v5463_v57  ;;  %v5962_v57 = vshll.u32 %v9532_v62, 16  ;;  %v6004_v62 = vshll.u32 %v5936_v43, 16 }
 0x3db   : > { %7507 = vmatpush3.bf16.msra.mxu1 %v8048_v13  ;;  %7494 = vmatprep.mubr.bf16.mxu1 %v5480_v45  ;;  %v5752_v13 = vsel %vm912_vm2, %v5750_v37, %v5751_v15  ;;  %v5970_v45 = vshll.u32 %v5934_v4, 16  ;;  %v6027_v37 = vshrl.u32 %v9562_v28, 16  ;;  %v6030_v15 = vshll.u32 %v9562_v28, 16  ;;  %v5940_v28 = vld [vmem:[#allocation3 + $0x88] sm:$0x1f] }
 0x3dc   : > { %7508 = vmatprep.subr.bf16.mxu1 %v8049_v60  ;;  %v5964_v54 = vrot.slane %v5962_v57, 5  ;;  %v6006_v44 = vrot.slane %v6004_v62, 5  ;;  %v6069_v30 = vshrl.u32 %v5940_v28, 16  ;;  %v6072_v41 = vshll.u32 %v5940_v28, 16 }
 0x3dd   : > { %v5972_v12 = vrot.slane %v5970_v45, 5  ;;  %v6032_v46 = vrot.slane %v6030_v15, 5  ;;  %v5939_v45 = vld [vmem:[#allocation3 + $0x78] sm:$0x1f] }
 0x3df   : > { %7509 = vmatpush3.bf16.msra.mxu1 %v8049_v60  ;;  %v5967_v60 = vshrl.u32 %v5934_v4, 16 }
 0x3e0   : > { %7510 = vmatprep.subr.bf16.mxu1 %v8050_v39 }
 0x3e1   : > { %v5969_v22 = vrot.slane %v5967_v60, 4  ;;  %v6040_v60 = vrot.slane %v6038_v14, 5 }
 0x3e2   : > { %7495 = vmatmul.mubr.bf16.gmra.mrb[28].mxu1 %v5497_v47  ;;  %v5965_v47 = vor.u32 %v5964_v54, %v5961_v49 }
 0x3e3   : > { %7511 = vmatpush3.bf16.msra.mxu1 %v8050_v39  ;;  %7498 = vmatprep.mubr.bf16.mxu1 %v5514_v5  ;;  %v5987_v39 = vshll.u32 %v5935_v9, 16  ;;  %v5973_v1 = vor.u32 %v5972_v12, %v5969_v22  ;;  %v6001_v5 = vshrl.u32 %v5936_v43, 16  ;;  %v6055_v9 = vshll.u32 %v5939_v45, 16 }
 0x3e4   : > { %7512 = vmatprep.subr.bf16.mxu1 %v8051_v23 }
 0x3e5   : > { %v5989_v7 = vrot.slane %v5987_v39, 5  ;;  %v6049_v39 = vrot.slane %v6047_v8, 5  ;;  %v6057_v18 = vrot.slane %v6055_v9, 5 }
 0x3e7   : > { %7513 = vmatpush3.bf16.msra.mxu1 %v8051_v23  ;;  %v5996_v23 = vshll.u32 %v9546_v40, 16  ;;  %v6003_v40 = vrot.slane %v6001_v5, 4 }
 0x3e8   : > { %7514 = vmatprep.subr.bf16.mxu1 %v8052_v63 }
 0x3e9   : > { %v5998_v3 = vrot.slane %v5996_v23, 5  ;;  %v5941_v23 = vld [vmem:[#allocation3 + $0x98] sm:$0x1f] }
 0x3ea   : > { %7499 = vmatmul.mubr.bf16.gmra.mrb[32].mxu1 %v5531_v31  ;;  %v5974_v31 = vsel %vm1248_vm9, %v5965_v47, %v5973_v1 }
 0x3eb   : > { %7515 = vmatpush3.bf16.msra.mxu1 %v8052_v63  ;;  %7518 = vmatprep.mubr.bf16.mxu1 %v5743_v32  ;;  %v5986_v63 = vrot.slane %v5984_v38, 4  ;;  %v5995_v32 = vrot.slane %v5993_v58, 4  ;;  %v6046_v38 = vrot.slane %v6044_v6, 4  ;;  %v6074_v58 = vrot.slane %v6072_v41, 5 }
 0x3ec   : > { %7516 = vmatprep.subr.bf16.mxu1 %v8053_v55 }
 0x3ed   : > { %v5990_v53 = vor.u32 %v5989_v7, %v5986_v63  ;;  %v5999_v59 = vor.u32 %v5998_v3, %v5995_v32  ;;  %v6050_v5 = vor.u32 %v6049_v39, %v6046_v38  ;;  %v6089_v63 = vshll.u32 %v5941_v23, 16 }
 0x3ef   : > { %7517 = vmatpush3.bf16.msra.mxu1 %v8053_v55  ;;  %v5937_v55 = vld [vmem:[#allocation3 + $0x58] sm:$0x1f]  ;;  %v6091_v3 = vrot.slane %v6089_v63, 5 }
 0x3f0   : > { %7534 = vmatprep.subr.bf16.mxu1 %v8054_v33 }
 0x3f2   : > { %7519 = vmatmul.mubr.bf16.vlgmr.msra.gmra.mrb[20].mxu1 %v5746_v27  ;;  %v6013_v27 = vshll.u32 %v9560_v34, 16  ;;  %v6029_v34 = vrot.slane %v6027_v37, 4 }
 0x3f3   : > { %7535 = vmatpush3.bf16.msra.mxu1 %v8054_v33  ;;  %7522 = vmatprep.mubr.bf16.mxu1 %v5749_v11  ;;  %v5982_v33 = vor.u32 %v5981_v36, %v5978_v2  ;;  %v6021_v11 = vshll.u32 %v5937_v55, 16  ;;  %v6081_v2 = vshll.u32 %v9594_v0, 16  ;;  %v6086_v36 = vshrl.u32 %v5941_v23, 16 }
 0x3f4   : > { %7536 = vmatprep.subr.bf16.mxu1 %v8055_v61  ;;  %v6015_v4 = vrot.slane %v6013_v27, 5  ;;  %v6033_v22 = vor.u32 %v6032_v46, %v6029_v34 }
 0x3f5   : > { %v6023_v17 = vrot.slane %v6021_v11, 5  ;;  %v6088_v32 = vrot.slane %v6086_v36, 4 }
 0x3f7   : > { %7537 = vmatpush3.bf16.msra.mxu1 %v8055_v61  ;;  %v6018_v61 = vshrl.u32 %v5937_v55, 16  ;;  %v6083_v55 = vrot.slane %v6081_v2, 5 }
 0x3f8   : > { %7538 = vmatprep.subr.bf16.mxu1 %v8056_v48 }
 0x3f9   : > { %v6020_v25 = vrot.slane %v6018_v61, 4 }
 0x3fa   : > { %7523 = vmatmul.mubr.bf16.gmra.mrb[24].mxu1 %v5752_v13  ;;  %v6007_v13 = vor.u32 %v6006_v44, %v6003_v40 }
 0x3fb   : > { %7539 = vmatpush3.bf16.msra.mxu1 %v8056_v48  ;;  %7526 = vmatprep.mubr.bf16.mxu1 %v5755_v29  ;;  %v6035_v48 = vshrl.u32 %v5938_v52, 16  ;;  %v6012_v29 = vrot.slane %v6010_v51, 4  ;;  %v6024_v54 = vor.u32 %v6023_v17, %v6020_v25  ;;  %v6092_v52 = vor.u32 %v6091_v3, %v6088_v32  ;;  %v9635_v51 = vld [vmem:[%s9749_s7] ss:$0 sm:$0xff] }
 0x3fc   : > { %7540 = vmatprep.subr.bf16.mxu1 %v8057_v26 }
 0x3fd   : > { %v6037_v57 = vrot.slane %v6035_v48, 4  ;;  %v6016_v49 = vor.u32 %v6015_v4, %v6012_v29 }
 0x3ff   : > { %7541 = vmatpush3.bf16.msra.mxu1 %v8057_v26  ;;  %v5991_v26 = vsel %vm1248_vm9, %v5982_v33, %v5990_v53  ;;  %v6041_v12 = vor.u32 %v6040_v60, %v6037_v57  ;;  %v6025_v19 = vsel %vm1248_vm9, %v6016_v49, %v6024_v54 }
 0x400   : > { %7542 = vmatprep.subr.bf16.mxu1 %v8058_v42 }
 0x401   : > { %v6042_v50 = vsel %vm1248_vm9, %v6033_v22, %v6041_v12 }
 0x402   : > { %7527 = vmatmul.mubr.bf16.gmra.mrb[28].mxu1 %v5758_v10  ;;  %v6052_v10 = vshrl.u32 %v5939_v45, 16 }
 0x403   : > { %7543 = vmatpush3.bf16.msra.mxu1 %v8058_v42  ;;  %7530 = vmatprep.mubr.bf16.mxu1 %v5761_v21  ;;  %v6008_v42 = vsel %vm1248_vm9, %v5999_v59, %v6007_v13  ;;  %v6064_v21 = vshll.u32 %v9578_v24, 16 }
 0x404   : > { %7544 = vmatprep.subr.bf16.mxu1 %v8059_v35  ;;  %v6054_v43 = vrot.slane %v6052_v10, 4 }
 0x405   : > { %v6066_v1 = vrot.slane %v6064_v21, 5 }
 0x406   : > { %v6058_v62 = vor.u32 %v6057_v18, %v6054_v43 }
 0x407   : > { %7545 = vmatpush3.bf16.msra.mxu1 %v8059_v35  ;;  %v6061_v35 = vshrl.u32 %v9578_v24, 16  ;;  %v6078_v24 = vshrl.u32 %v9594_v0, 16  ;;  %v9630_v0 = vld [vmem:[%s9748_s6] ss:$0 sm:$0xff] }
 0x408   : > { %7546 = vmatprep.subr.bf16.mxu1 %v8060_v20 }
 0x409   : > { %v6063_v47 = vrot.slane %v6061_v35, 4 }
 0x40a   : > { %7531 = vmatmul.mubr.bf16.gmra.mrb[32].mxu1 %v5764_v16 }
 0x40b   : > { %7547 = vmatpush3.bf16.msra.mxu1 %v8060_v20  ;;  %7550 = vmatprep.mubr.bf16.mxu1 %v5974_v31  ;;  %v6071_v20 = vrot.slane %v6069_v30, 4  ;;  %v6067_v7 = vor.u32 %v6066_v1, %v6063_v47  ;;  %v6080_v31 = vrot.slane %v6078_v24, 4 }
 0x40c   : > { %7548 = vmatprep.subr.bf16.mxu1 %v8061_v56 }
 0x40d   : > { %v6075_v16 = vor.u32 %v6074_v58, %v6071_v20  ;;  %v6084_v44 = vor.u32 %v6083_v55, %v6080_v31 }
 0x40f   : > { %7549 = vmatpush3.bf16.msra.mxu1 %v8061_v56  ;;  %v6059_v56 = vsel %vm1248_vm9, %v6050_v5, %v6058_v62  ;;  %v6076_v40 = vsel %vm1248_vm9, %v6067_v7, %v6075_v16  ;;  %v6093_v33 = vsel %vm1248_vm9, %v6084_v44, %v6092_v52 }
 0x412   : > { %7551 = vmatmul.mubr.bf16.vlgmr.msra.gmra.mrb[20].mxu1 %v5991_v26 }
 0x413   : > { %7554 = vmatprep.mubr.bf16.mxu1 %v6008_v42 }
 0x41a   : > { %7555 = vmatmul.mubr.bf16.gmra.mrb[24].mxu1 %v6025_v19 }
 0x41b   : > { %7558 = vmatprep.mubr.bf16.mxu1 %v6042_v50 }
 0x422   : > { %7559 = vmatmul.mubr.bf16.gmra.mrb[28].mxu1 %v6059_v56 }
 0x423   : > { %7562 = vmatprep.mubr.bf16.mxu1 %v6076_v40 }
 0x42a   : > { %7563 = vmatmul.mubr.bf16.gmra.mrb[32].mxu1 %v6093_v33 }
 0x4e5   : > { %v7552_v53 = vpop.f32.mrb[20].mxu1 }
 0x4e6   : > { %v6272_v27 = vmul.f32 %v7552_v53, %v9630_v0  ;;  %v6184_v61 = vpop.f32.mrb[21].mxu1 }
 0x4e7   : > { %v6270_v11 = vmul.f32 %v9630_v0, %v6184_v61  ;;  %v7553_v37 = vpop.f32.mrb[22].mxu1 }
 0x4e8   : > { %v6295_v15 = vadd.f32 %v9635_v51, %v6272_v27  ;;  %v6273_v48 = vmul.f32 %v7553_v37, %v9630_v0  ;;  %v6187_v14 = vpop.f32.mrb[23].mxu1 }
 0x4e9   : > { %v6293_v59 = vadd.f32 %v9635_v51, %v6270_v11  ;;  %v6271_v13 = vmul.f32 %v9630_v0, %v6187_v14 }
 0x4ea   : > { %v6296_v26 = vadd.f32 %v9635_v51, %v6273_v48  ;;  %v6311_v4 = vmax.f32 %v6295_v15, 0.0 }
 0x4eb   : > { %v6294_v29 = vadd.f32 %v9635_v51, %v6271_v13  ;;  %v6309_v17 = vmax.f32 %v6293_v59, 0.0 }
 0x4ec   : > { %v6312_v25 = vmax.f32 %v6296_v26, 0.0 }
 0x4ed   : > { %v6310_v34 = vmax.f32 %v6294_v29, 0.0  ;;  %v7556_v46 = vpop.f32.mrb[24].mxu1 }
 0x4ee   : > { %v6798_v57 = vpack.c.bf16 %v6312_v25, %v6311_v4  ;;  %v6276_v60 = vmul.f32 %v7556_v46, %v9630_v0  ;;  %v6200_v45 = vpop.f32.mrb[25].mxu1 }
 0x4ef   : > { %v6793_v42 = vpack.c.bf16 %v6310_v34, %v6309_v17  ;;  %v6274_v28 = vmul.f32 %v9630_v0, %v6200_v45  ;;  %v7557_v6 = vpop.f32.mrb[26].mxu1 }
 0x4f0   : > { %6830 = vst [vmem:[%s9095_s16 + $0x8] sm:$0xff] %v6798_v57   ;;  %v6299_v8 = vadd.f32 %v9635_v51, %v6276_v60  ;;  %v6277_v10 = vmul.f32 %v7557_v6, %v9630_v0  ;;  %v6203_v9 = vpop.f32.mrb[27].mxu1 }
 0x4f1   : > { %6794 = vst [vmem:[%s9095_s16] sm:$0xff] %v6793_v42   ;;  %v6297_v49 = vadd.f32 %v9635_v51, %v6274_v28  ;;  %v6275_v54 = vmul.f32 %v9630_v0, %v6203_v9 }
 0x4f2   : > { %v6300_v22 = vadd.f32 %v9635_v51, %v6277_v10  ;;  %v6315_v35 = vmax.f32 %v6299_v8, 0.0 }
 0x4f3   : > { %v6298_v12 = vadd.f32 %v9635_v51, %v6275_v54  ;;  %v6313_v30 = vmax.f32 %v6297_v49, 0.0 }
 0x4f4   : > { %v6316_v21 = vmax.f32 %v6300_v22, 0.0 }
 0x4f5   : > { %v6314_v41 = vmax.f32 %v6298_v12, 0.0  ;;  %v7560_v38 = vpop.f32.mrb[28].mxu1 }
 0x4f6   : > { %v6808_v39 = vpack.c.bf16 %v6316_v21, %v6315_v35  ;;  %v6280_v43 = vmul.f32 %v7560_v38, %v9630_v0  ;;  %v6216_v18 = vpop.f32.mrb[29].mxu1 }
 0x4f7   : > { %v6803_v19 = vpack.c.bf16 %v6314_v41, %v6313_v30  ;;  %v6278_v50 = vmul.f32 %v9630_v0, %v6216_v18  ;;  %v7561_v47 = vpop.f32.mrb[30].mxu1 }
 0x4f8   : > { %6832 = vst [vmem:[%s9095_s16 + $0x18] sm:$0xff] %v6808_v39   ;;  %v6303_v1 = vadd.f32 %v9635_v51, %v6280_v43  ;;  %v6281_v20 = vmul.f32 %v7561_v47, %v9630_v0  ;;  %v6219_v58 = vpop.f32.mrb[31].mxu1 }
 0x4f9   : > { %6831 = vst [vmem:[%s9095_s16 + $0x10] sm:$0xff] %v6803_v19   ;;  %v6301_v23 = vadd.f32 %v9635_v51, %v6278_v50  ;;  %v6279_v5 = vmul.f32 %v9630_v0, %v6219_v58 }
 0x4fa   : > { %v6304_v62 = vadd.f32 %v9635_v51, %v6281_v20  ;;  %v6319_v2 = vmax.f32 %v6303_v1, 0.0 }
 0x4fb   : > { %v6302_v24 = vadd.f32 %v9635_v51, %v6279_v5  ;;  %v6317_v63 = vmax.f32 %v6301_v23, 0.0 }
 0x4fc   : > { %v6320_v36 = vmax.f32 %v6304_v62, 0.0 }
 0x4fd   : > { %v6318_v7 = vmax.f32 %v6302_v24, 0.0  ;;  %v7564_v16 = vpop.f32.mrb[32].mxu1 }
 0x4fe   : > { %v6818_v56 = vpack.c.bf16 %v6320_v36, %v6319_v2  ;;  %v6284_v31 = vmul.f32 %v7564_v16, %v9630_v0  ;;  %v6232_v55 = vpop.f32.mrb[33].mxu1 }
 0x4ff   : > { %v6813_v32 = vpack.c.bf16 %v6318_v7, %v6317_v63  ;;  %v6282_v3 = vmul.f32 %v9630_v0, %v6232_v55  ;;  %v7565_v40 = vpop.f32.mrb[34].mxu1 }
 0x500   : > { %6834 = vst [vmem:[%s9095_s16 + $0x28] sm:$0xff] %v6818_v56   ;;  %v6307_v44 = vadd.f32 %v9635_v51, %v6284_v31  ;;  %v6285_v52 = vmul.f32 %v7565_v40, %v9630_v0  ;;  %v6235_v33 = vpop.f32.mrb[35].mxu1 }
 0x501   : > { %6833 = vst [vmem:[%s9095_s16 + $0x20] sm:$0xff] %v6813_v32   ;;  %v6305_v53 = vadd.f32 %v9635_v51, %v6282_v3  ;;  %v6283_v27 = vmul.f32 %v9630_v0, %v6235_v33 }
 0x502   : > { %v6308_v61 = vadd.f32 %v9635_v51, %v6285_v52  ;;  %v6323_v37 = vmax.f32 %v6307_v44, 0.0 }
 0x503   : > { %v6306_v11 = vadd.f32 %v9635_v51, %v6283_v27  ;;  %v6321_v48 = vmax.f32 %v6305_v53, 0.0 }
 0x504   : > { %v6324_v15 = vmax.f32 %v6308_v61, 0.0 }
 0x505   : > { %v6322_v14 = vmax.f32 %v6306_v11, 0.0 }
 0x506   : > { %v6828_v59 = vpack.c.bf16 %v6324_v15, %v6323_v37 }
 0x507   : > { %v6823_v13 = vpack.c.bf16 %v6322_v14, %v6321_v48 }
 0x508   : > { %6836 = vst [vmem:[%s9095_s16 + $0x38] sm:$0xff] %v6828_v59  }
 0x509   : > { %6835 = vst [vmem:[%s9095_s16 + $0x30] sm:$0xff] %v6823_v13  }
 0x50a   : > { %8103 = shalt.err (!%p8100_p11)
}
 0x50b   : > { %s8104_s11 = scalar_lea.hbm %s9681_s21, 1024  ;;  %s8108_s30 = scalar_lea.hbm %s9750_s8, 4096 }
 0x50c   : > { %p8105_p13 = scmp.ne.s32.totalorder %s9681_s21, %s8104_s11  ;;  %p8109_p3 = scmp.lt.u32.totalorder %s9681_s21, %s9750_s8 }
 0x50d   : > { %p8110_p8 = scmp.lt.u32.totalorder %s8108_s30, %s8104_s11  ;;  %p8112_p12 = scmp.lt.u32.totalorder %s8104_s11, %s9681_s21 }
 0x50e   : > { %p8106_p1 = pnand %p8105_p13, %p9768_p0 }
 0x50f   : > { %p8111_p10 = por %p8110_p8, %p8109_p3 }
 0x510   : > { %p8107_p4 = pneg %p8106_p1 }
 0x511   : > { %p8113_p2 = por %p8112_p12, %p8111_p10 }
 0x513   : > { %p8114_p5 = pnand %p8113_p2, %p8107_p4 }
 0x515   : > { %8117 = shalt.err (!%p8114_p5)
}
 0x516   : > { %s8198_s23 = smov 64  }
 0x517   : > { %7869 = dma.vmem_to_hbm [thread:$0]  (%p9768_p0), %s9683_s9, 1024, %s9681_s21, %s9689_s22, %s8198_s23, %s8198_s23, %s8194_s26  }
 0x518 PF: > { %p7881_p6 = scmp.ge.s32.totalorder %s8188_s12, 2  ;;  %s6437_s24 = sand.u32 1, %s8160_s27  }
 0x519   : > { %p9769_p7 = scmp.ne.s32.totalorder %s9762_s20, 0  ;;  %s6438_s14 = scalar_lea.sflag [#allocation6], %s6437_s24 }
 0x51b   : > { %p7876_p9 = pnand %p7881_p6, %p9769_p7 }
 0x51d   : > { %8155 = dma.done.wait (!%p7876_p9), %s6438_s14, 1024  }
 0x51e   : > { %8157 = vsyncadd (!%p7876_p9), %s6438_s14, 4294966272  ;;  %s22_s12 = sadd.s32 1, %s8188_s12   ;;  %s9770_s9 = sld [smem:[#allocation10_spill]] }
 0x51f   : > { %p19_p11 = scmp.ge.s32.totalorder %s22_s12, 6   ;;  %s9771_s19 = sld [smem:[#allocation11_spill]] }
 0x520   : > { %s9772_s11 = sld [smem:[#allocation12_spill]]  ;;  %s9773_s27 = smov %s8164_s28 }
 0x521   : > { %s9774_s28 = smov %s8168_s29  ;;  %s9775_s29 = smov %s8323_s25 }
 0x522   : > { %s9776_s30 = smov %s8180_s10  ;;  %21 = sbr.rel (!%p19_p11) target bundleno = 6 (0x6), region = 110 }
 0x525   : > { %s9777_s10 = smov %s9771_s19 }
 0x529   :  { %6443 = vsyncpa [#allocation5], 1 }
 0x52a   :  { %6445 = vsyncpa [#allocation5 + $0x1], 1 }
 0x52b   :  { %6446 = vsyncpa [#allocation6], 1 }
 0x52c   :  { %6448 = vsyncpa [#allocation6 + $0x1], 1 }

</bundles_post_ra>
